<compile_context>
chip_gen: v6e
topology: v6e:2x2x1
jax: 0.10.0
libtpu: 0.0.40
codegen_flags: <defaults>
</compile_context>

<pallas_src>
import math
import jax
import jax.numpy as jnp
from jax.experimental import pallas as pl
from jax.experimental.pallas import tpu as pltpu

N_COND = 3                        # len(COND_FEATURES)
N_FEATURES = 10                   # len(FEATURES)
HIDDEN_DIM = 128
LATENT_DIM = 100
SEQ_LENGTH = 24
FC1_OUT = 256
K_PAD = 128                       # concat(z, cond) = 103 features, padded to one lane vreg
HID = SEQ_LENGTH * HIDDEN_DIM     # 3072
N_PRE = SEQ_LENGTH * N_FEATURES   # 240  (lane-dense output width)
SCORE_OFF = 256                   # score columns start on a lane-tile boundary
N_PROJ = SCORE_OFF + SEQ_LENGTH   # 280  (combined projection width)


def _round_up(n, m):
    return ((n + m - 1) // m) * m


def generator_kernel(x_ref, w1_ref, b1_ref, w2_ref, b2_ref,
                     wexp_ref, expand_ref, bo_ref, out_ref):
    x = x_ref[...]                                                   # (tb, 128) bf16

    # fc[0]: Linear(103 -> 256) + ReLU   (bf16 MXU inputs, f32 accumulation)
    h1 = jnp.dot(x, w1_ref[...], preferred_element_type=jnp.float32) + b1_ref[...]
    h1 = jnp.maximum(h1, 0.0).astype(jnp.bfloat16)                   # (tb, 256)

    # fc[2]: Linear(256 -> 24*128) + ReLU  (f32 epilogue: portable to v5e VPU)
    h2 = jnp.dot(h1, w2_ref[...], preferred_element_type=jnp.float32) + b2_ref[...]
    h2 = jnp.maximum(h2, 0.0).astype(jnp.bfloat16)                   # (tb, 3072)

    # Combined block-structured projection (wo and wa folded together):
    #   proj[:, t*10 + o]      = h3[b, t, :] @ wo[:, o]   (output layout, lane dense)
    #   proj[:, SCORE_OFF + t] = h3[b, t, :] @ wa          (attention scores)
    # One 2D MXU matmul; no (tb, 24, 128) reshape / relayout, no rank-3 einsum.
    proj = jnp.dot(h2, wexp_ref[...], preferred_element_type=jnp.float32)  # (tb, 280)

    pre = proj[:, :N_PRE]                                            # (tb, 240)
    scores = proj[:, SCORE_OFF:SCORE_OFF + SEQ_LENGTH]               # (tb, 24)

    # Softmax over the sequence axis (now the lane axis).  The attention bias is
    # shared across the seq axis, so it cancels under softmax and is omitted.
    m = jnp.max(scores, axis=-1, keepdims=True)
    e = jnp.exp(scores - m)
    denom = jnp.sum(e, axis=-1, keepdims=True)
    attn = e * pl.reciprocal(denom, approx=True)                     # (tb, 24)

    # Expand each per-(b, t) attention scalar across its 10 output lanes with a
    # tiny f32 matmul against a constant 0/1 matrix (K zero-padded 24 -> 128).
    # attn * (h3 @ wo) == (attn * h3) @ wo, so scaling the projection is exact.
    tb = attn.shape[0]
    attn_p = jnp.concatenate(
        [attn, jnp.zeros((tb, K_PAD - SEQ_LENGTH), jnp.float32)], axis=-1)  # (tb, 128)
    attn240 = jnp.dot(attn_p, expand_ref[...],
                      preferred_element_type=jnp.float32)            # (tb, 240)

    logits = attn240 * pre + bo_ref[...]                             # (tb, 240)
    out_ref[...] = jax.nn.sigmoid(logits).astype(out_ref.dtype)


def time_series_generator(z, cond, params, *, block_b=512):
    """block_b: batch tile (multiple of 8); 512 fits <=48 MiB VMEM on v5e/v6e/v7x."""
    B = z.shape[0]
    x = jnp.concatenate([z, cond], axis=1).astype(jnp.float32)       # (B, 103)
    x = jnp.pad(x, ((0, 0), (0, K_PAD - x.shape[1])))                # lane-align K -> 128

    tb = min(block_b, _round_up(B, 8))
    b_pad = _round_up(B, tb)
    if b_pad != B:
        x = jnp.pad(x, ((0, b_pad - B), (0, 0)))
    x_bf = x.astype(jnp.bfloat16)

    # ---- weight prep (host side, one time) --------------------------------
    w1 = jnp.pad(params['w1'], ((0, K_PAD - params['w1'].shape[0]), (0, 0)))
    w1 = w1.astype(jnp.bfloat16)                                     # (128, 256)
    w2 = params['w2'].astype(jnp.bfloat16)                           # (256, 3072)
    b1 = params['b1'].astype(jnp.float32)                            # (1, 256)
    b2 = params['b2'].astype(jnp.float32)                            # (1, 3072)

    # Fold wa into wo: block-diagonal combined projection weight.
    wo = params['wo'].astype(jnp.float32)                            # (128, 10)
    wa = params['wa'].reshape(HIDDEN_DIM, 1).astype(jnp.float32)     # (128, 1)
    eye_t = jnp.eye(SEQ_LENGTH, dtype=jnp.float32)
    w_pre = jnp.kron(eye_t, wo)                                      # (3072, 240)
    w_sc = jnp.kron(eye_t, wa)                                       # (3072, 24)
    wexp = jnp.concatenate(
        [w_pre, jnp.zeros((HID, SCORE_OFF - N_PRE), jnp.float32), w_sc],
        axis=1).astype(jnp.bfloat16)                                 # (3072, 280)

    # Constant 0/1 expansion: row t broadcasts attn[:, t] over output lanes
    # t*10 .. t*10+9.  Rows 24..127 are zero padding (contraction K aligned to 128).
    expand = jnp.kron(eye_t, jnp.ones((1, N_FEATURES), jnp.float32))   # (24, 240)
    expand = jnp.pad(expand, ((0, K_PAD - SEQ_LENGTH), (0, 0)))        # (128, 240)

    bo_full = jnp.tile(params['bo'].astype(jnp.float32), (1, SEQ_LENGTH))  # (1, 240)

    grid = (b_pad // tb,)

    flops = 2 * b_pad * (K_PAD * FC1_OUT + FC1_OUT * HID
                         + HID * N_PROJ + K_PAD * N_PRE)
    transcendentals = b_pad * (SEQ_LENGTH + N_PRE)
    bytes_accessed = (x_bf.size * 2 + b_pad * N_PRE * 2
                      + (w1.size + w2.size + wexp.size) * 2
                      + (b1.size + b2.size + expand.size + bo_full.size) * 4)

    out2d = pl.pallas_call(
        generator_kernel,
        out_shape=jax.ShapeDtypeStruct((b_pad, N_PRE), jnp.bfloat16),
        grid=grid,
        in_specs=[
            pl.BlockSpec((tb, K_PAD), lambda i: (i, 0)),             # x (batch tiled)
            pl.BlockSpec((K_PAD, FC1_OUT), lambda i: (0, 0)),        # w1 (resident)
            pl.BlockSpec((1, FC1_OUT), lambda i: (0, 0)),            # b1
            pl.BlockSpec((FC1_OUT, HID), lambda i: (0, 0)),          # w2 (resident)
            pl.BlockSpec((1, HID), lambda i: (0, 0)),                # b2
            pl.BlockSpec((HID, N_PROJ), lambda i: (0, 0)),           # wexp (wo+wa fold)
            pl.BlockSpec((K_PAD, N_PRE), lambda i: (0, 0)),          # expansion matrix
            pl.BlockSpec((1, N_PRE), lambda i: (0, 0)),              # bo (tiled 24x)
        ],
        out_specs=pl.BlockSpec((tb, N_PRE), lambda i: (i, 0)),       # lane-dense out
        compiler_params=pltpu.CompilerParams(
            dimension_semantics=("parallel",),
            vmem_limit_bytes=48 * 1024 * 1024),
        cost_estimate=pl.CostEstimate(flops=flops,
                                      transcendentals=transcendentals,
                                      bytes_accessed=bytes_accessed),
    )(x_bf, w1, b1, w2, b2, wexp, expand, bo_full)

    out2d = out2d[:B] if b_pad != B else out2d
    return out2d.astype(jnp.float32).reshape(B, SEQ_LENGTH, N_FEATURES)


def init_params(key):
    """Deterministic init matching PyTorch default U(-1/sqrt(fan_in), 1/sqrt(fan_in))."""
    ks = jax.random.split(key, 8)

    def lin(kw, kb, fan_in, fan_out):
        bound = 1.0 / math.sqrt(fan_in)
        w = jax.random.uniform(kw, (fan_in, fan_out), jnp.float32, -bound, bound)
        b = jax.random.uniform(kb, (1, fan_out), jnp.float32, -bound, bound)
        return w, b

    w1, b1 = lin(ks[0], ks[1], LATENT_DIM + N_COND, FC1_OUT)
    w2, b2 = lin(ks[2], ks[3], FC1_OUT, SEQ_LENGTH * HIDDEN_DIM)
    wa_t, ba = lin(ks[4], ks[5], HIDDEN_DIM, 1)     # attn: Linear(128, 1)
    wo, bo = lin(ks[6], ks[7], HIDDEN_DIM, N_FEATURES)
    return {
        'w1': w1, 'b1': b1,                     # (103, 256), (1, 256)
        'w2': w2, 'b2': b2,                     # (256, 3072), (1, 3072)
        'wa': wa_t.T, 'ba': ba,                 # (1, 128), (1, 1)
        'wo': wo, 'bo': bo,                     # (128, 10), (1, 10)
    }


def reference(z, cond, p):
    x = jnp.concatenate([z, cond], axis=1)
    h1 = jnp.maximum(x @ p['w1'] + p['b1'], 0.0)
    h2 = jnp.maximum(h1 @ p['w2'] + p['b2'], 0.0)
    h3 = h2.reshape(-1, SEQ_LENGTH, HIDDEN_DIM)
    scores = jnp.einsum('btd,od->bto', h3, p['wa']) + p['ba']
    w = jax.nn.softmax(scores, axis=1)
    xw = h3 * w
    return jax.nn.sigmoid(jnp.einsum('btd,do->bto', xw, p['wo']) + p['bo'])


if __name__ == "__main__":
    key = jax.random.PRNGKey(0)
    kp, kz, kc = jax.random.split(key, 3)

    B = 2
    params = init_params(kp)
    z = jax.random.normal(kz, (B, LATENT_DIM), jnp.float32)
    cond = jax.random.normal(kc, (B, N_COND), jnp.float32)

    out = time_series_generator(z, cond, params)
    out = jax.block_until_ready(out)

    ref = reference(z, cond, params)
    assert out.shape == (B, SEQ_LENGTH, N_FEATURES), out.shape
    # bf16 MXU operands, bf16 output and an approx reciprocal in the softmax all
    # stack -> compare against the f32 reference with a loose absolute tolerance
    # (outputs are sigmoid-bounded in [0, 1]).
    err = float(jnp.max(jnp.abs(out - ref)))
    assert err < 2e-2, err

    print("KERNEL_OK")
</pallas_src>

<mosaic_0001>
module attributes {stable_mosaic.version = 11 : i64} {
  func.func @generator_kernel(%arg0: i32, %arg1: memref<8x128xbf16, #tpu.memory_space<vmem>>, %arg2: memref<128x256xbf16, #tpu.memory_space<vmem>>, %arg3: memref<1x256xf32, #tpu.memory_space<vmem>>, %arg4: memref<256x3072xbf16, #tpu.memory_space<vmem>>, %arg5: memref<1x3072xf32, #tpu.memory_space<vmem>>, %arg6: memref<3072x280xbf16, #tpu.memory_space<vmem>>, %arg7: memref<128x240xf32, #tpu.memory_space<vmem>>, %arg8: memref<1x240xf32, #tpu.memory_space<vmem>>, %arg9: memref<8x240xbf16, #tpu.memory_space<vmem>>) attributes {dimension_semantics = [#tpu.dimension_semantics<parallel>], iteration_bounds = array<i64: 1>, scalar_prefetch = 0 : i64, scratch_operands = 0 : i64, tpu.core_type = #tpu.core_type<tc>, window_params = [{transform_indices = @transform_0, window_bounds = array<i64: 8, 128>}, {pipeline_mode = #tpu.pipeline_mode<synchronous>, transform_indices = @transform_1, window_bounds = array<i64: 128, 256>}, {pipeline_mode = #tpu.pipeline_mode<synchronous>, transform_indices = @transform_2, window_bounds = array<i64: 1, 256>}, {pipeline_mode = #tpu.pipeline_mode<synchronous>, transform_indices = @transform_3, window_bounds = array<i64: 256, 3072>}, {pipeline_mode = #tpu.pipeline_mode<synchronous>, transform_indices = @transform_4, window_bounds = array<i64: 1, 3072>}, {pipeline_mode = #tpu.pipeline_mode<synchronous>, transform_indices = @transform_5, window_bounds = array<i64: 3072, 280>}, {pipeline_mode = #tpu.pipeline_mode<synchronous>, transform_indices = @transform_6, window_bounds = array<i64: 128, 240>}, {pipeline_mode = #tpu.pipeline_mode<synchronous>, transform_indices = @transform_7, window_bounds = array<i64: 1, 240>}, {transform_indices = @transform_8, window_bounds = array<i64: 8, 240>}]} {
    %c0 = arith.constant 0 : index
    %c0_0 = arith.constant 0 : index
    %0 = vector.load %arg1[%c0, %c0_0] : memref<8x128xbf16, #tpu.memory_space<vmem>>, vector<8x128xbf16>
    %c0_1 = arith.constant 0 : index
    %c0_2 = arith.constant 0 : index
    %1 = vector.load %arg2[%c0_1, %c0_2] : memref<128x256xbf16, #tpu.memory_space<vmem>>, vector<128x256xbf16>
    %cst = arith.constant dense<0.000000e+00> : vector<8x256xf32>
    %2 = tpu.matmul %0, %1, %cst {dimension_numbers = #tpu.dot_dimension_numbers<[1], [0], [0], [1], [0, 0, 1, 1], [], []>} : vector<8x128xbf16>, vector<128x256xbf16>, vector<8x256xf32> -> vector<8x256xf32>
    %c0_3 = arith.constant 0 : index
    %c0_4 = arith.constant 0 : index
    %3 = vector.load %arg3[%c0_3, %c0_4] : memref<1x256xf32, #tpu.memory_space<vmem>>, vector<1x256xf32>
    %4 = vector.broadcast %3 : vector<1x256xf32> to vector<8x256xf32>
    %5 = arith.addf %2, %4 : vector<8x256xf32>
    %cst_5 = arith.constant 0.000000e+00 : f32
    %6 = vector.broadcast %cst_5 : f32 to vector<8x256xf32>
    %7 = arith.maximumf %5, %6 : vector<8x256xf32>
    %8 = arith.truncf %7 : vector<8x256xf32> to vector<8x256xbf16>
    %c0_6 = arith.constant 0 : index
    %c0_7 = arith.constant 0 : index
    %9 = vector.load %arg4[%c0_6, %c0_7] : memref<256x3072xbf16, #tpu.memory_space<vmem>>, vector<256x3072xbf16>
    %cst_8 = arith.constant dense<0.000000e+00> : vector<8x3072xf32>
    %10 = tpu.matmul %8, %9, %cst_8 {dimension_numbers = #tpu.dot_dimension_numbers<[1], [0], [0], [1], [0, 0, 1, 1], [], []>} : vector<8x256xbf16>, vector<256x3072xbf16>, vector<8x3072xf32> -> vector<8x3072xf32>
    %c0_9 = arith.constant 0 : index
    %c0_10 = arith.constant 0 : index
    %11 = vector.load %arg5[%c0_9, %c0_10] : memref<1x3072xf32, #tpu.memory_space<vmem>>, vector<1x3072xf32>
    %12 = vector.broadcast %11 : vector<1x3072xf32> to vector<8x3072xf32>
    %13 = arith.addf %10, %12 : vector<8x3072xf32>
    %cst_11 = arith.constant 0.000000e+00 : f32
    %14 = vector.broadcast %cst_11 : f32 to vector<8x3072xf32>
    %15 = arith.maximumf %13, %14 : vector<8x3072xf32>
    %16 = arith.truncf %15 : vector<8x3072xf32> to vector<8x3072xbf16>
    %c0_12 = arith.constant 0 : index
    %c0_13 = arith.constant 0 : index
    %17 = vector.load %arg6[%c0_12, %c0_13] : memref<3072x280xbf16, #tpu.memory_space<vmem>>, vector<3072x280xbf16>
    %cst_14 = arith.constant dense<0.000000e+00> : vector<8x280xf32>
    %18 = tpu.matmul %16, %17, %cst_14 {dimension_numbers = #tpu.dot_dimension_numbers<[1], [0], [0], [1], [0, 0, 1, 1], [], []>} : vector<8x3072xbf16>, vector<3072x280xbf16>, vector<8x280xf32> -> vector<8x280xf32>
    %19 = vector.extract_strided_slice %18 {offsets = [0, 0], sizes = [8, 240], strides = [1, 1]} : vector<8x280xf32> to vector<8x240xf32>
    %20 = vector.extract_strided_slice %18 {offsets = [0, 256], sizes = [8, 24], strides = [1, 1]} : vector<8x280xf32> to vector<8x24xf32>
    %cst_15 = arith.constant dense<0xFF800000> : vector<8xf32>
    %21 = vector.multi_reduction <maximumf>, %20, %cst_15 [1] : vector<8x24xf32> to vector<8xf32>
    %22 = vector.shape_cast %21 : vector<8xf32> to vector<8x1xf32>
    %23 = vector.broadcast %22 : vector<8x1xf32> to vector<8x24xf32>
    %24 = arith.subf %20, %23 : vector<8x24xf32>
    %25 = math.exp %24 : vector<8x24xf32>
    %cst_16 = arith.constant dense<0.000000e+00> : vector<8xf32>
    %26 = vector.multi_reduction <add>, %25, %cst_16 [1] : vector<8x24xf32> to vector<8xf32>
    %27 = vector.shape_cast %26 : vector<8xf32> to vector<8x1xf32>
    %28 = tpu.reciprocal %27 {approx = true} : vector<8x1xf32> -> vector<8x1xf32>
    %29 = vector.broadcast %28 : vector<8x1xf32> to vector<8x24xf32>
    %30 = arith.mulf %25, %29 : vector<8x24xf32>
    %cst_17 = arith.constant 0.000000e+00 : f32
    %31 = vector.broadcast %cst_17 : f32 to vector<8x104xf32>
    %32 = tpu.concatenate %30, %31 in 1 : vector<8x24xf32>, vector<8x104xf32> -> vector<8x128xf32>
    %c0_18 = arith.constant 0 : index
    %c0_19 = arith.constant 0 : index
    %33 = vector.load %arg7[%c0_18, %c0_19] : memref<128x240xf32, #tpu.memory_space<vmem>>, vector<128x240xf32>
    %cst_20 = arith.constant dense<0.000000e+00> : vector<8x240xf32>
    %34 = tpu.matmul %32, %33, %cst_20 {dimension_numbers = #tpu.dot_dimension_numbers<[1], [0], [0], [1], [0, 0, 1, 1], [], []>} : vector<8x128xf32>, vector<128x240xf32>, vector<8x240xf32> -> vector<8x240xf32>
    %35 = arith.mulf %34, %19 : vector<8x240xf32>
    %c0_21 = arith.constant 0 : index
    %c0_22 = arith.constant 0 : index
    %36 = vector.load %arg8[%c0_21, %c0_22] : memref<1x240xf32, #tpu.memory_space<vmem>>, vector<1x240xf32>
    %37 = vector.broadcast %36 : vector<1x240xf32> to vector<8x240xf32>
    %38 = arith.addf %35, %37 : vector<8x240xf32>
    %39 = arith.negf %38 : vector<8x240xf32>
    %40 = math.exp %39 : vector<8x240xf32>
    %cst_23 = arith.constant 1.000000e+00 : f32
    %41 = vector.broadcast %cst_23 : f32 to vector<8x240xf32>
    %42 = arith.addf %41, %40 : vector<8x240xf32>
    %43 = arith.divf %41, %42 : vector<8x240xf32>
    %44 = arith.truncf %43 : vector<8x240xf32> to vector<8x240xbf16>
    %c0_24 = arith.constant 0 : index
    %c0_25 = arith.constant 0 : index
    %45 = vector.load %arg9[%c0_24, %c0_25] : memref<8x240xbf16, #tpu.memory_space<vmem>>, vector<8x240xbf16>
    tpu.vector_store %arg9[%c0_24, %c0_25], %44 {strides = array<i32>} : memref<8x240xbf16, #tpu.memory_space<vmem>>, vector<8x240xbf16>,
    return
  }
  func.func @transform_0(%arg0: i32) -> (i32, i32) {
    %c0_i32 = arith.constant 0 : i32
    %c0_i32_0 = arith.constant 0 : i32
    return %arg0, %c0_i32 : i32, i32
  }
  func.func @transform_1(%arg0: i32) -> (i32, i32) {
    %c0_i32 = arith.constant 0 : i32
    %c0_i32_0 = arith.constant 0 : i32
    %c0_i32_1 = arith.constant 0 : i32
    return %c0_i32, %c0_i32_0 : i32, i32
  }
  func.func @transform_2(%arg0: i32) -> (i32, i32) {
    %c0_i32 = arith.constant 0 : i32
    %c0_i32_0 = arith.constant 0 : i32
    %c0_i32_1 = arith.constant 0 : i32
    return %c0_i32, %c0_i32_0 : i32, i32
  }
  func.func @transform_3(%arg0: i32) -> (i32, i32) {
    %c0_i32 = arith.constant 0 : i32
    %c0_i32_0 = arith.constant 0 : i32
    %c0_i32_1 = arith.constant 0 : i32
    return %c0_i32, %c0_i32_0 : i32, i32
  }
  func.func @transform_4(%arg0: i32) -> (i32, i32) {
    %c0_i32 = arith.constant 0 : i32
    %c0_i32_0 = arith.constant 0 : i32
    %c0_i32_1 = arith.constant 0 : i32
    return %c0_i32, %c0_i32_0 : i32, i32
  }
  func.func @transform_5(%arg0: i32) -> (i32, i32) {
    %c0_i32 = arith.constant 0 : i32
    %c0_i32_0 = arith.constant 0 : i32
    %c0_i32_1 = arith.constant 0 : i32
    return %c0_i32, %c0_i32_0 : i32, i32
  }
  func.func @transform_6(%arg0: i32) -> (i32, i32) {
    %c0_i32 = arith.constant 0 : i32
    %c0_i32_0 = arith.constant 0 : i32
    %c0_i32_1 = arith.constant 0 : i32
    return %c0_i32, %c0_i32_0 : i32, i32
  }
  func.func @transform_7(%arg0: i32) -> (i32, i32) {
    %c0_i32 = arith.constant 0 : i32
    %c0_i32_0 = arith.constant 0 : i32
    %c0_i32_1 = arith.constant 0 : i32
    return %c0_i32, %c0_i32_0 : i32, i32
  }
  func.func @transform_8(%arg0: i32) -> (i32, i32) {
    %c0_i32 = arith.constant 0 : i32
    %c0_i32_0 = arith.constant 0 : i32
    return %arg0, %c0_i32 : i32, i32
  }
}

</mosaic_0001>

<bundles_post_ra>
// kernel: tpu_custom_call.1
= control target key start
LH: loop header
LB: loop body
LE: loop exit
PB: predicated region body
PF: predicated region fallthrough
CT: control target
= control target key end

     0   :  { %v10211_v2 = vmov 0   ;;  %s13623_s0 = inlined_call_operand.vmem [shape: bf16[8,128], index: 0, kind: input, shape index: {}]   ;;  %s13624_s1 = inlined_call_operand.vmem [shape: bf16[128,256], index: 1, kind: input, shape index: {}]   ;;  %s13625_s2 = inlined_call_operand.vmem [shape: f32[1,256], index: 2, kind: input, shape index: {}]   ;;  %s13626_s3 = inlined_call_operand.vmem [shape: bf16[256,3072], index: 3, kind: input, shape index: {}]   ;;  %s13627_s4 = inlined_call_operand.vmem [shape: f32[1,3072], index: 4, kind: input, shape index: {}]   ;;  %s13628_s5 = inlined_call_operand.vmem [shape: bf16[3072,280], index: 5, kind: input, shape index: {}]   ;;  %s13629_s6 = inlined_call_operand.vmem [shape: f32[128,240], index: 6, kind: input, shape index: {}]   ;;  %s13630_s7 = inlined_call_operand.vmem [shape: f32[1,240], index: 7, kind: input, shape index: {}]   ;;  %s13631_s8 = inlined_call_operand.hbm [shape: bf16[8,240], index: 8, kind: output, shape index: {}]  }
   0x1   :  { %v9385_v0 = vld [vmem:[%s13624_s1 + $0x74] ss:$8 sps:$4 sm:$0xff]   ;;  %v9387_v1 = vld [vmem:[%s13624_s1 + $0x70] ss:$8 sps:$4 sm:$0xff]   ;;  %172 = vmatprep.mubr.bf16.mxu0 %v10211_v2  ;;  %v9388_v3 = vld [vmem:[%s13624_s1 + $0x64] ss:$8 sps:$4 sm:$0xff]  }
   0x2   :  { %140 = vmatprep.subr.bf16.mxu0 %v9385_v0  ;;  %v9390_v4 = vld [vmem:[%s13624_s1 + $0x60] ss:$8 sps:$4 sm:$0xff]   ;;  %v9391_v5 = vld [vmem:[%s13624_s1 + $0x54] ss:$8 sps:$4 sm:$0xff]   ;;  %v9393_v6 = vld [vmem:[%s13624_s1 + $0x50] ss:$8 sps:$4 sm:$0xff]  }
   0x3   :  { %141 = vmatpush1.bf16.msra.mxu0 %v9387_v1  ;;  %v9394_v7 = vld [vmem:[%s13624_s1 + $0x44] ss:$8 sps:$4 sm:$0xff]   ;;  %v9396_v8 = vld [vmem:[%s13624_s1 + $0x40] ss:$8 sps:$4 sm:$0xff]   ;;  %v9397_v11 = vld [vmem:[%s13624_s1 + $0x34] ss:$8 sps:$4 sm:$0xff]  }
   0x4   :  { %142 = vmatprep.subr.bf16.mxu0 %v9388_v3  ;;  %v353_v9 = vld [vmem:[%s13626_s3 + $0x540] sm:$0xff]  ;;  %v9399_v19 = vld [vmem:[%s13624_s1 + $0x30] ss:$8 sps:$4 sm:$0xff]   ;;  %v9403_v27 = vld [vmem:[%s13624_s1 + $0x14] ss:$8 sps:$4 sm:$0xff]  }
   0x5   :  { %v365_v10 = vld [vmem:[%s13626_s3 + $0x5a0] sm:$0xff]  ;;  %v9405_v31 = vld [vmem:[%s13624_s1 + $0x10] ss:$8 sps:$4 sm:$0xff]   ;;  %v354_v34 = vld [vmem:[%s13626_s3 + $0x548] sm:$0xff] }
   0x6   :  { %v8322_v12 = vcombine.high %v353_v9, %v365_v10  ;;  %v8321_v13 = vcombine.low %v353_v9, %v365_v10  ;;  %v329_v14 = vld [vmem:[%s13626_s3 + $0x480] sm:$0xff]  ;;  %v366_v36 = vld [vmem:[%s13626_s3 + $0x5a8] sm:$0xff] }
   0x7   :  { %143 = vmatpush1.bf16.msra.mxu0 %v9390_v4  ;;  %v341_v15 = vld [vmem:[%s13626_s3 + $0x4e0] sm:$0xff]  ;;  %v8324_v41 = vcombine.high %v354_v34, %v366_v36  ;;  %v330_v42 = vld [vmem:[%s13626_s3 + $0x488] sm:$0xff]  ;;  %v8323_v48 = vcombine.low %v354_v34, %v366_v36 }
   0x8   :  { %144 = vmatprep.subr.bf16.mxu0 %v9391_v5  ;;  %v8298_v16 = vcombine.high %v329_v14, %v341_v15  ;;  %v305_v17 = vld [vmem:[%s13626_s3 + $0x3c0] sm:$0xff]  ;;  %2615 = vmatprep.subr.bf16.mxu1 %v8322_v12  ;;  %v8297_v20 = vcombine.low %v329_v14, %v341_v15  ;;  %v342_v45 = vld [vmem:[%s13626_s3 + $0x4e8] sm:$0xff] }
   0x9   :  { %v317_v18 = vld [vmem:[%s13626_s3 + $0x420] sm:$0xff]  ;;  %2616 = vmatpush1.bf16.msra.mxu1 %v8321_v13  ;;  %v306_v49 = vld [vmem:[%s13626_s3 + $0x3c8] sm:$0xff]  ;;  %v8300_v54 = vcombine.high %v330_v42, %v342_v45  ;;  %v8299_v56 = vcombine.low %v330_v42, %v342_v45 }
   0xa   :  { %v9400_v21 = vld [vmem:[%s13624_s1 + $0x24] ss:$8 sps:$4 sm:$0xff]   ;;  %2617 = vmatprep.subr.bf16.mxu1 %v8298_v16  ;;  %v8274_v22 = vcombine.high %v305_v17, %v317_v18  ;;  %v9402_v25 = vld [vmem:[%s13624_s1 + $0x20] ss:$8 sps:$4 sm:$0xff]   ;;  %v8273_v26 = vcombine.low %v305_v17, %v317_v18 }
   0xb   :  { %145 = vmatpush1.bf16.msra.mxu0 %v9393_v6  ;;  %v281_v23 = vld [vmem:[%s13626_s3 + $0x300] sm:$0xff]  ;;  %v318_v50 = vld [vmem:[%s13626_s3 + $0x428] sm:$0xff] }
   0xc   :  { %146 = vmatprep.subr.bf16.mxu0 %v9394_v7  ;;  %v293_v24 = vld [vmem:[%s13626_s3 + $0x360] sm:$0xff]  ;;  %v282_v57 = vld [vmem:[%s13626_s3 + $0x308] sm:$0xff]  ;;  %v8276_v62 = vcombine.high %v306_v49, %v318_v50  ;;  %v8275_v0 = vcombine.low %v306_v49, %v318_v50 }
   0xd   :  { %2618 = vmatpush1.bf16.msra.mxu1 %v8297_v20  ;;  %v8250_v28 = vcombine.high %v281_v23, %v293_v24  ;;  %v257_v29 = vld [vmem:[%s13626_s3 + $0x240] sm:$0xff]  ;;  %v8249_v32 = vcombine.low %v281_v23, %v293_v24  ;;  %v294_v58 = vld [vmem:[%s13626_s3 + $0x368] sm:$0xff] }
   0xe   :  { %2619 = vmatprep.subr.bf16.mxu1 %v8274_v22  ;;  %v269_v30 = vld [vmem:[%s13626_s3 + $0x2a0] sm:$0xff]  ;;  %v258_v1 = vld [vmem:[%s13626_s3 + $0x248] sm:$0xff]  ;;  %v8252_v6 = vcombine.high %v282_v57, %v294_v58 }
   0xf   :  { %147 = vmatpush1.bf16.msra.mxu0 %v9396_v8  ;;  %v9406_v33 = vld [vmem:[%s13624_s1 + $0x4] ss:$8 sps:$4 sm:$0xff]   ;;  %v8226_v35 = vcombine.high %v257_v29, %v269_v30  ;;  %v9408_v39 = vld [vmem:[%s13624_s1] ss:$8 sps:$4 sm:$0xff]   ;;  %v8225_v40 = vcombine.low %v257_v29, %v269_v30  ;;  %v8251_v8 = vcombine.low %v282_v57, %v294_v58 }
  0x10   :  { %148 = vmatprep.subr.bf16.mxu0 %v9397_v11  ;;  %v233_v37 = vld [vmem:[%s13626_s3 + $0x180] sm:$0xff]  ;;  %v270_v2 = vld [vmem:[%s13626_s3 + $0x2a8] sm:$0xff] }
  0x11   :  { %2620 = vmatpush1.bf16.msra.mxu1 %v8273_v26  ;;  %v245_v38 = vld [vmem:[%s13626_s3 + $0x1e0] sm:$0xff]  ;;  %v234_v9 = vld [vmem:[%s13626_s3 + $0x188] sm:$0xff]  ;;  %v8228_v14 = vcombine.high %v258_v1, %v270_v2  ;;  %v8227_v16 = vcombine.low %v258_v1, %v270_v2 }
  0x12   :  { %2621 = vmatprep.subr.bf16.mxu1 %v8250_v28  ;;  %v8202_v43 = vcombine.high %v233_v37, %v245_v38  ;;  %v31_v44 = vld [vmem:[%s13623_s0] sm:$0xf]  ;;  %v8201_v51 = vcombine.low %v233_v37, %v245_v38  ;;  %v246_v10 = vld [vmem:[%s13626_s3 + $0x1e8] sm:$0xff] }
  0x13   :  { %149 = vmatpush1.bf16.msra.mxu0 %v9399_v19  ;;  %v209_v46 = vld [vmem:[%s13626_s3 + $0xc0] sm:$0xff]  ;;  %v210_v17 = vld [vmem:[%s13626_s3 + $0xc8] sm:$0xff]  ;;  %v8204_v22 = vcombine.high %v234_v9, %v246_v10  ;;  %v8203_v24 = vcombine.low %v234_v9, %v246_v10 }
  0x14   :  { %150 = vmatprep.subr.bf16.mxu0 %v9400_v21  ;;  %v221_v47 = vld [vmem:[%s13626_s3 + $0x120] sm:$0xff]  ;;  %v222_v18 = vld [vmem:[%s13626_s3 + $0x128] sm:$0xff] }
  0x15   :  { %2622 = vmatpush1.bf16.msra.mxu1 %v8249_v32  ;;  %v185_v52 = vld [vmem:[%s13626_s3] sm:$0xff]  ;;  %v8178_v55 = vcombine.high %v209_v46, %v221_v47  ;;  %v8177_v59 = vcombine.low %v209_v46, %v221_v47  ;;  %v198_v26 = vld [vmem:[%s13626_s3 + $0x68] sm:$0xff]  ;;  %v8180_v30 = vcombine.high %v210_v17, %v222_v18  ;;  %v8179_v32 = vcombine.low %v210_v17, %v222_v18  ;;  %v355_v18 = vld [vmem:[%s13626_s3 + $0x550] sm:$0xff] }
  0x16   :  { %2623 = vmatprep.subr.bf16.mxu1 %v8226_v35  ;;  %v197_v53 = vld [vmem:[%s13626_s3 + $0x60] sm:$0xff]  ;;  %v558_v34 = vld [vmem:[%s13626_s3 + $0xba8] sm:$0xff] }
  0x17   :  { %151 = vmatpush1.bf16.msra.mxu0 %v9402_v25  ;;  %v545_v60 = vld [vmem:[%s13626_s3 + $0xb40] sm:$0xff]  ;;  %v8154_v63 = vcombine.high %v185_v52, %v197_v53  ;;  %v8153_v3 = vcombine.low %v185_v52, %v197_v53  ;;  %v186_v25 = vld [vmem:[%s13626_s3 + $0x8] sm:$0xff] }
  0x18   :  { %152 = vmatprep.subr.bf16.mxu0 %v9403_v27  ;;  %v557_v61 = vld [vmem:[%s13626_s3 + $0xba0] sm:$0xff]  ;;  %v8156_v38 = vcombine.high %v186_v25, %v198_v26  ;;  %v534_v42 = vld [vmem:[%s13626_s3 + $0xae8] sm:$0xff] }
  0x19   :  { %2624 = vmatpush1.bf16.msra.mxu1 %v8225_v40  ;;  %v521_v4 = vld [vmem:[%s13626_s3 + $0xa80] sm:$0xff]  ;;  %v8514_v7 = vcombine.high %v545_v60, %v557_v61  ;;  %v8513_v11 = vcombine.low %v545_v60, %v557_v61  ;;  %v8155_v40 = vcombine.low %v186_v25, %v198_v26  ;;  %v498_v47 = vld [vmem:[%s13626_s3 + $0x9c8] sm:$0xff]  ;;  %v50_v26 = vlaneseq }
  0x1a   :  { %2625 = vmatprep.subr.bf16.mxu1 %v8202_v43  ;;  %v533_v5 = vld [vmem:[%s13626_s3 + $0xae0] sm:$0xff]  ;;  %v474_v52 = vld [vmem:[%s13626_s3 + $0x908] sm:$0xff] }
  0x1b   :  { %153 = vmatpush1.bf16.msra.mxu0 %v9405_v31  ;;  %v497_v12 = vld [vmem:[%s13626_s3 + $0x9c0] sm:$0xff]  ;;  %v8490_v15 = vcombine.high %v521_v4, %v533_v5  ;;  %v8489_v19 = vcombine.low %v521_v4, %v533_v5  ;;  %v486_v53 = vld [vmem:[%s13626_s3 + $0x968] sm:$0xff] }
  0x1c   :  { %154 = vmatprep.subr.bf16.mxu0 %v9406_v33  ;;  %v509_v13 = vld [vmem:[%s13626_s3 + $0xa20] sm:$0xff]  ;;  %v546_v33 = vld [vmem:[%s13626_s3 + $0xb48] sm:$0xff]  ;;  %v8444_v58 = vcombine.high %v474_v52, %v486_v53 }
  0x1d   :  { %2626 = vmatpush1.bf16.msra.mxu1 %v8201_v51  ;;  %v473_v20 = vld [vmem:[%s13626_s3 + $0x900] sm:$0xff]  ;;  %v8466_v23 = vcombine.high %v497_v12, %v509_v13  ;;  %v8465_v27 = vcombine.low %v497_v12, %v509_v13  ;;  %v8515_v46 = vcombine.low %v546_v33, %v558_v34  ;;  %v462_v57 = vld [vmem:[%s13626_s3 + $0x8a8] sm:$0xff] }
  0x1e   :  { %2627 = vmatprep.subr.bf16.mxu1 %v8178_v55  ;;  %v485_v21 = vld [vmem:[%s13626_s3 + $0x960] sm:$0xff]  ;;  %v426_v60 = vld [vmem:[%s13626_s3 + $0x788] sm:$0xff] }
  0x1f   :  { %155 = vmatpush1.bf16.msra.mxu0 %v9408_v39  ;;  %v449_v28 = vld [vmem:[%s13626_s3 + $0x840] sm:$0xff]  ;;  %v8442_v31 = vcombine.high %v473_v20, %v485_v21  ;;  %v8441_v35 = vcombine.low %v473_v20, %v485_v21  ;;  %v438_v61 = vld [vmem:[%s13626_s3 + $0x7e8] sm:$0xff]  ;;  %v356_v20 = vld [vmem:[%s13626_s3 + $0x558] sm:$0xff] }
  0x20   :  { %2656 = vmatprep.subr.bf16.mxu0 %v8324_v41  ;;  %v461_v29 = vld [vmem:[%s13626_s3 + $0x8a0] sm:$0xff]  ;;  %v522_v41 = vld [vmem:[%s13626_s3 + $0xa88] sm:$0xff]  ;;  %v8395_v1 = vcombine.low %v426_v60, %v438_v61 }
  0x21   :  { %2628 = vmatpush1.bf16.msra.mxu1 %v8177_v59  ;;  %v425_v36 = vld [vmem:[%s13626_s3 + $0x780] sm:$0xff]  ;;  %v8418_v39 = vcombine.high %v449_v28, %v461_v29  ;;  %v8417_v43 = vcombine.low %v449_v28, %v461_v29  ;;  %v8492_v50 = vcombine.high %v522_v41, %v534_v42  ;;  %v8491_v51 = vcombine.low %v522_v41, %v534_v42  ;;  %v402_v4 = vld [vmem:[%s13626_s3 + $0x6c8] sm:$0xff]  ;;  %v332_v41 = vld [vmem:[%s13626_s3 + $0x498] sm:$0xff] }
  0x22   :  { %173 = vmatmul.mubr.bf16.vlgmr.msra.gmra.mxu0 %v31_v44  ;;  %2629 = vmatprep.subr.bf16.mxu1 %v8154_v63  ;;  %v437_v37 = vld [vmem:[%s13626_s3 + $0x7e0] sm:$0xff]  ;;  %v8516_v44 = vcombine.high %v546_v33, %v558_v34  ;;  %v8443_v59 = vcombine.low %v474_v52, %v486_v53  ;;  %v378_v12 = vld [vmem:[%s13626_s3 + $0x608] sm:$0xff]  ;;  %v320_v52 = vld [vmem:[%s13626_s3 + $0x438] sm:$0xff] }
  0x23   :  { %2657 = vmatpush1.bf16.msra.mxu0 %v8323_v48  ;;  %v8394_v45 = vcombine.high %v425_v36, %v437_v37  ;;  %v510_v48 = vld [vmem:[%s13626_s3 + $0xa28] sm:$0xff]  ;;  %v8393_v49 = vcombine.low %v425_v36, %v437_v37  ;;  %v401_v2 = vld [vmem:[%s13626_s3 + $0x6c0] sm:$0xff] }
  0x24   :  { %2658 = vmatprep.subr.bf16.mxu0 %v8300_v54  ;;  %v8468_v54 = vcombine.high %v498_v47, %v510_v48  ;;  %v8467_v55 = vcombine.low %v498_v47, %v510_v48  ;;  %v377_v10 = vld [vmem:[%s13626_s3 + $0x600] sm:$0xff]  ;;  %v307_v47 = vld [vmem:[%s13626_s3 + $0x3d0] sm:$0xff] }
  0x25   :  { %2630 = vmatpush1.bf16.msra.mxu1 %v8153_v3  ;;  %v413_v3 = vld [vmem:[%s13626_s3 + $0x720] sm:$0xff]  ;;  %v319_v48 = vld [vmem:[%s13626_s3 + $0x430] sm:$0xff] }
  0x26   :  { %2631 = vmatprep.subr.bf16.mxu1 %v8514_v7  ;;  %v8370_v5 = vcombine.high %v401_v2, %v413_v3  ;;  %v8369_v9 = vcombine.low %v401_v2, %v413_v3  ;;  %v48_v28 = vld [vmem:[%s13625_s2] sm:$0x3]  ;;  %v271_v2 = vld [vmem:[%s13626_s3 + $0x2b0] sm:$0xff]  ;;  %v260_v3 = vld [vmem:[%s13626_s3 + $0x258] sm:$0xff] }
  0x27   :  { %2659 = vmatpush1.bf16.msra.mxu0 %v8299_v56  ;;  %v450_v56 = vld [vmem:[%s13626_s3 + $0x848] sm:$0xff] }
  0x28   :  { %2660 = vmatprep.subr.bf16.mxu0 %v8276_v62  ;;  %v8420_v62 = vcombine.high %v450_v56, %v462_v57  ;;  %v8419_v63 = vcombine.low %v450_v56, %v462_v57  ;;  %v8278_v56 = vcombine.high %v307_v47, %v319_v48 }
  0x29   :  { %2632 = vmatpush2.bf16.msra.mxu1 %v8513_v11  ;;  %v389_v11 = vld [vmem:[%s13626_s3 + $0x660] sm:$0xff] }
  0x2a   :  { %2633 = vmatprep.subr.bf16.mxu1 %v8490_v15  ;;  %v8346_v13 = vcombine.high %v377_v10, %v389_v11  ;;  %v8345_v17 = vcombine.low %v377_v10, %v389_v11  ;;  %v247_v10 = vld [vmem:[%s13626_s3 + $0x1f0] sm:$0xff]  ;;  %v236_v11 = vld [vmem:[%s13626_s3 + $0x198] sm:$0xff] }
  0x2b   :  { %2661 = vmatpush1.bf16.msra.mxu0 %v8275_v0  ;;  %v8396_v0 = vcombine.high %v426_v60, %v438_v61  ;;  %v296_v60 = vld [vmem:[%s13626_s3 + $0x378] sm:$0xff]  ;;  %v8277_v61 = vcombine.low %v307_v47, %v319_v48  ;;  %v535_v47 = vld [vmem:[%s13626_s3 + $0xaf0] sm:$0xff] }
  0x2c   :  { %2662 = vmatprep.subr.bf16.mxu0 %v8252_v6  ;;  %v414_v6 = vld [vmem:[%s13626_s3 + $0x728] sm:$0xff]  ;;  %v524_v48 = vld [vmem:[%s13626_s3 + $0xa98] sm:$0xff] }
  0x2d   :  { %2634 = vmatpush2.bf16.msra.mxu1 %v8489_v19  ;;  %v8371_v7 = vcombine.low %v402_v4, %v414_v6  ;;  %v367_v19 = vld [vmem:[%s13626_s3 + $0x5b0] sm:$0xff] }
  0x2e   :  { %2635 = vmatprep.subr.bf16.mxu1 %v8466_v23  ;;  %v8326_v21 = vcombine.high %v355_v18, %v367_v19  ;;  %v8325_v23 = vcombine.low %v355_v18, %v367_v19  ;;  %v223_v18 = vld [vmem:[%s13626_s3 + $0x130] sm:$0xff]  ;;  %v212_v19 = vld [vmem:[%s13626_s3 + $0xd8] sm:$0xff] }
  0x2f   :  { %2663 = vmatpush1.bf16.msra.mxu0 %v8251_v8  ;;  %v8372_v8 = vcombine.high %v402_v4, %v414_v6  ;;  %v272_v4 = vld [vmem:[%s13626_s3 + $0x2b8] sm:$0xff] }
  0x30   :  { %2664 = vmatprep.subr.bf16.mxu0 %v8228_v14  ;;  %v390_v14 = vld [vmem:[%s13626_s3 + $0x668] sm:$0xff] }
  0x31   :  { %2636 = vmatpush2.bf16.msra.mxu1 %v8465_v27  ;;  %v8347_v15 = vcombine.low %v378_v12, %v390_v14  ;;  %v10514_v27 = vshrl.u32 %v50_v26, 7  ;;  %v199_v26 = vld [vmem:[%s13626_s3 + $0x70] sm:$0xff] }
  0x32   :  { %2637 = vmatprep.subr.bf16.mxu1 %v8442_v31 }
  0x33   :  { %2665 = vmatpush1.bf16.msra.mxu0 %v8227_v16  ;;  %v8348_v16 = vcombine.high %v378_v12, %v390_v14  ;;  %v10520_v29 = vsub.s32 0, %v10514_v27  ;;  %v248_v12 = vld [vmem:[%s13626_s3 + $0x1f8] sm:$0xff]  ;;  %v8231_v14 = vcombine.low %v260_v3, %v272_v4 }
  0x34   :  { %2666 = vmatprep.subr.bf16.mxu0 %v8204_v22  ;;  %v368_v22 = vld [vmem:[%s13626_s3 + $0x5b8] sm:$0xff] }
  0x35   :  { %2638 = vmatpush2.bf16.msra.mxu1 %v8441_v35  ;;  %v8328_v25 = vcombine.high %v356_v20, %v368_v22  ;;  %v53_v31 = vrot.slane %v48_v28, %v10520_v29 }
  0x36   :  { %2639 = vmatprep.subr.bf16.mxu1 %v8418_v39  ;;  %v331_v39 = vld [vmem:[%s13626_s3 + $0x490] sm:$0xff] }
  0x37   :  { %2667 = vmatpush1.bf16.msra.mxu0 %v8203_v24  ;;  %v8327_v24 = vcombine.low %v356_v20, %v368_v22  ;;  %v224_v20 = vld [vmem:[%s13626_s3 + $0x138] sm:$0xff]  ;;  %v8207_v22 = vcombine.low %v236_v11, %v248_v12 }
  0x38   :  { %2668 = vmatprep.subr.bf16.mxu0 %v8180_v30  ;;  %v10523_v30 = vsub.s32 1, %v10514_v27 }
  0x39   :  { %2640 = vmatpush2.bf16.msra.mxu1 %v8417_v43  ;;  %v344_v43 = vld [vmem:[%s13626_s3 + $0x4f8] sm:$0xff] }
  0x3a   :  { %2641 = vmatprep.subr.bf16.mxu1 %v8394_v45 }
  0x3b   :  { %2669 = vmatpush1.bf16.msra.mxu0 %v8179_v32  ;;  %v57_v32 = vrot.slane %v48_v28, %v10523_v30  ;;  %v188_v28 = vld [vmem:[%s13626_s3 + $0x18] sm:$0xff] }
  0x3c   :  { %2670 = vmatprep.subr.bf16.mxu0 %v8156_v38 }
  0x3d   :  { %2642 = vmatpush2.bf16.msra.mxu1 %v8393_v49  ;;  %v308_v49 = vld [vmem:[%s13626_s3 + $0x3d8] sm:$0xff] }
  0x3e   :  { %2643 = vmatprep.subr.bf16.mxu1 %v8370_v5  ;;  %v8280_v57 = vcombine.high %v308_v49, %v320_v52 }
  0x3f   :  { %2671 = vmatpush1.bf16.msra.mxu0 %v8155_v40  ;;  %v343_v40 = vld [vmem:[%s13626_s3 + $0x4f0] sm:$0xff] }
  0x40   :  { %2672 = vmatprep.subr.bf16.mxu0 %v8516_v44  ;;  %v8301_v53 = vcombine.low %v331_v39, %v343_v40 }
  0x41   :  { %2644 = vmatpush2.bf16.msra.mxu1 %v8369_v9  ;;  %v235_v9 = vld [vmem:[%s13626_s3 + $0x190] sm:$0xff] }
  0x42   :  { %2645 = vmatprep.subr.bf16.mxu1 %v8346_v13 }
  0x43   :  { %2673 = vmatpush2.bf16.msra.mxu0 %v8515_v46 }
  0x44   :  { %2674 = vmatprep.subr.bf16.mxu0 %v8492_v50  ;;  %v8302_v50 = vcombine.high %v331_v39, %v343_v40  ;;  %v560_v39 = vld [vmem:[%s13626_s3 + $0xbb8] sm:$0xff] }
  0x45   :  { %2646 = vmatpush2.bf16.msra.mxu1 %v8345_v17  ;;  %v211_v17 = vld [vmem:[%s13626_s3 + $0xd0] sm:$0xff] }
  0x46   :  { %2697 = vmatprep.subr.bf16.mxu1 %v8326_v21  ;;  %v8205_v21 = vcombine.low %v235_v9, %v247_v10 }
  0x47   :  { %2675 = vmatpush2.bf16.msra.mxu0 %v8491_v51  ;;  %v8304_v51 = vcombine.high %v332_v41, %v344_v43 }
  0x48   :  { %2676 = vmatprep.subr.bf16.mxu0 %v8468_v54  ;;  %v8303_v54 = vcombine.low %v332_v41, %v344_v43 }
  0x4b   :  { %2677 = vmatpush2.bf16.msra.mxu0 %v8467_v55  ;;  %v283_v55 = vld [vmem:[%s13626_s3 + $0x310] sm:$0xff] }
  0x4c   :  { %2678 = vmatprep.subr.bf16.mxu0 %v8444_v58  ;;  %v295_v58 = vld [vmem:[%s13626_s3 + $0x370] sm:$0xff] }
  0x4d   :  { %v8253_v5 = vcombine.low %v283_v55, %v295_v58 }
  0x4f   :  { %2679 = vmatpush2.bf16.msra.mxu0 %v8443_v59  ;;  %v284_v59 = vld [vmem:[%s13626_s3 + $0x318] sm:$0xff] }
  0x50   :  { %2680 = vmatprep.subr.bf16.mxu0 %v8420_v62  ;;  %v8279_v62 = vcombine.low %v308_v49, %v320_v52  ;;  %v8255_v6 = vcombine.low %v284_v59, %v296_v60  ;;  %v536_v49 = vld [vmem:[%s13626_s3 + $0xaf8] sm:$0xff] }
  0x53   :  { %2681 = vmatpush2.bf16.msra.mxu0 %v8419_v63  ;;  %v8254_v63 = vcombine.high %v283_v55, %v295_v58  ;;  %v511_v55 = vld [vmem:[%s13626_s3 + $0xa30] sm:$0xff] }
  0x54   :  { %2682 = vmatprep.subr.bf16.mxu0 %v8396_v0  ;;  %v8256_v0 = vcombine.high %v284_v59, %v296_v60  ;;  %v8495_v59 = vcombine.low %v524_v48, %v536_v49 }
  0x57   :  { %2683 = vmatpush2.bf16.msra.mxu0 %v8395_v1  ;;  %v259_v1 = vld [vmem:[%s13626_s3 + $0x250] sm:$0xff] }
  0x58   :  { %2684 = vmatprep.subr.bf16.mxu0 %v8372_v8  ;;  %v8232_v8 = vcombine.high %v260_v3, %v272_v4  ;;  %v8229_v13 = vcombine.low %v259_v1, %v271_v2 }
  0x5b   :  { %2685 = vmatpush2.bf16.msra.mxu0 %v8371_v7  ;;  %v8230_v7 = vcombine.high %v259_v1, %v271_v2  ;;  %v488_v1 = vld [vmem:[%s13626_s3 + $0x978] sm:$0xff] }
  0x5c   :  { %2686 = vmatprep.subr.bf16.mxu0 %v8348_v16  ;;  %v8208_v16 = vcombine.high %v236_v11, %v248_v12 }
  0x5f   :  { %2687 = vmatpush2.bf16.msra.mxu0 %v8347_v15  ;;  %v8206_v15 = vcombine.high %v235_v9, %v247_v10  ;;  %v464_v9 = vld [vmem:[%s13626_s3 + $0x8b8] sm:$0xff] }
  0x60   :  { %2738 = vmatprep.subr.bf16.mxu0 %v8328_v25  ;;  %v187_v25 = vld [vmem:[%s13626_s3 + $0x10] sm:$0xff] }
  0x61   :  { %v8157_v40 = vcombine.low %v187_v25, %v199_v26 }
  0xe2   :  { %v174_v33 = vpop.f32.mrf.mxu0 }
  0xe3   :  { %v175_v34 = vadd.f32 %v174_v33, %v53_v31  ;;  %v200_v31 = vld [vmem:[%s13626_s3 + $0x78] sm:$0xff]  ;;  %v8183_v33 = vcombine.low %v212_v19, %v224_v20 }
  0xe4   :  { %v176_v35 = vpop.f32.mrf.mxu0  ;;  %v8159_v41 = vcombine.low %v188_v28, %v200_v31 }
  0xe5   :  { %v177_v36 = vadd.f32 %v176_v35, %v57_v32  ;;  %v181_v37 = vmax.f32 %v175_v34, 0.0  ;;  %v8181_v32 = vcombine.low %v211_v17, %v223_v18  ;;  %v8158_v34 = vcombine.high %v187_v25, %v199_v26  ;;  %v416_v25 = vld [vmem:[%s13626_s3 + $0x738] sm:$0xff] }
  0xe6   :  { %v178_v38 = vpop.f32.mrf.mxu0  ;;  %v8160_v35 = vcombine.high %v188_v28, %v200_v31 }
  0xe7   :  { %v182_v42 = vmax.f32 %v177_v36, 0.0  ;;  %v10541_v46 = vpack.c.bf16 %v181_v37, %v181_v37  ;;  %v547_v36 = vld [vmem:[%s13626_s3 + $0xb50] sm:$0xff]  ;;  %v548_v38 = vld [vmem:[%s13626_s3 + $0xb58] sm:$0xff] }
  0xe8   :  { %v179_v44 = vpop.f32.mrf.mxu0  ;;  %v559_v37 = vld [vmem:[%s13626_s3 + $0xbb0] sm:$0xff]  ;;  %v8520_v43 = vcombine.high %v548_v38, %v560_v39 }
  0xe9   :  { %v10539_v45 = vpack.c.bf16 %v182_v42, %v182_v42  ;;  %v8518_v42 = vcombine.high %v547_v36, %v559_v37  ;;  %v523_v44 = vld [vmem:[%s13626_s3 + $0xa90] sm:$0xff] }
  0xea   :  { %v8494_v52 = vcombine.high %v523_v44, %v535_v47  ;;  %v8493_v58 = vcombine.low %v523_v44, %v535_v47  ;;  %v370_v44 = vld [vmem:[%s13626_s3 + $0x5c8] sm:$0xff] }
  0xeb   :  { %2647 = vmatprep.mubr.bf16.mxu1 %v10539_v45  ;;  %2688 = vmatprep.mubr.bf16.mxu0 %v10539_v45 }
  0xec   :  { %2648 = vmatmul.mubr.bf16.vlgmr.msra.gmra.mxu1 %v10541_v46  ;;  %2689 = vmatmul.mubr.bf16.vlgmr.msra.gmra.mxu0 %v10541_v46 }
  0xed   :  { %2698 = vmatpush1.bf16.msra.mxu1 %v8325_v23  ;;  %2739 = vmatpush1.bf16.msra.mxu0 %v8327_v24  ;;  %v8182_v23 = vcombine.high %v211_v17, %v223_v18  ;;  %v8184_v24 = vcombine.high %v212_v19, %v224_v20  ;;  %v440_v17 = vld [vmem:[%s13626_s3 + $0x7f8] sm:$0xff] }
  0xee   :  { %2729 = vmatprep.mubr.bf16.mxu1 %v10539_v45  ;;  %2770 = vmatprep.mubr.bf16.mxu0 %v10539_v45 }
  0xef   :  { %2699 = vmatprep.subr.bf16.mxu1 %v8302_v50  ;;  %2740 = vmatprep.subr.bf16.mxu0 %v8304_v51  ;;  %v8517_v50 = vcombine.low %v547_v36, %v559_v37  ;;  %v8519_v51 = vcombine.low %v548_v38, %v560_v39  ;;  %v392_v36 = vld [vmem:[%s13626_s3 + $0x678] sm:$0xff] }
  0xf1   :  { %2700 = vmatpush1.bf16.msra.mxu1 %v8301_v53  ;;  %2741 = vmatpush1.bf16.msra.mxu0 %v8303_v54  ;;  %v8496_v53 = vcombine.high %v524_v48, %v536_v49  ;;  %v499_v54 = vld [vmem:[%s13626_s3 + $0x9d0] sm:$0xff] }
  0xf2   :  { %2701 = vmatprep.subr.bf16.mxu1 %v8278_v56  ;;  %2742 = vmatprep.subr.bf16.mxu0 %v8280_v57  ;;  %v500_v56 = vld [vmem:[%s13626_s3 + $0x9d8] sm:$0xff]  ;;  %v8470_v60 = vcombine.high %v499_v54, %v511_v55  ;;  %v8469_v2 = vcombine.low %v499_v54, %v511_v55  ;;  %v346_v54 = vld [vmem:[%s13626_s3 + $0x508] sm:$0xff] }
  0xf3   :  { %v512_v57 = vld [vmem:[%s13626_s3 + $0xa38] sm:$0xff] }
  0xf4   :  { %v8471_v3 = vcombine.low %v500_v56, %v512_v57 }
  0xf5   :  { %2702 = vmatpush1.bf16.msra.mxu1 %v8277_v61  ;;  %2743 = vmatpush1.bf16.msra.mxu0 %v8279_v62  ;;  %v8472_v61 = vcombine.high %v500_v56, %v512_v57  ;;  %v475_v62 = vld [vmem:[%s13626_s3 + $0x910] sm:$0xff] }
  0xf6   :  { %2703 = vmatprep.subr.bf16.mxu1 %v8254_v63  ;;  %2744 = vmatprep.subr.bf16.mxu0 %v8256_v0  ;;  %v487_v63 = vld [vmem:[%s13626_s3 + $0x970] sm:$0xff]  ;;  %v476_v0 = vld [vmem:[%s13626_s3 + $0x918] sm:$0xff] }
  0xf7   :  { %v8446_v4 = vcombine.high %v475_v62, %v487_v63  ;;  %v8445_v10 = vcombine.low %v475_v62, %v487_v63  ;;  %v8447_v11 = vcombine.low %v476_v0, %v488_v1  ;;  %v322_v62 = vld [vmem:[%s13626_s3 + $0x448] sm:$0xff] }
  0xf9   :  { %2704 = vmatpush1.bf16.msra.mxu1 %v8253_v5  ;;  %2745 = vmatpush1.bf16.msra.mxu0 %v8255_v6  ;;  %v8448_v5 = vcombine.high %v476_v0, %v488_v1  ;;  %v451_v6 = vld [vmem:[%s13626_s3 + $0x850] sm:$0xff] }
  0xfa   :  { %2705 = vmatprep.subr.bf16.mxu1 %v8230_v7  ;;  %2746 = vmatprep.subr.bf16.mxu0 %v8232_v8  ;;  %v463_v7 = vld [vmem:[%s13626_s3 + $0x8b0] sm:$0xff]  ;;  %v452_v8 = vld [vmem:[%s13626_s3 + $0x858] sm:$0xff] }
  0xfb   :  { %v8422_v12 = vcombine.high %v451_v6, %v463_v7  ;;  %v8421_v18 = vcombine.low %v451_v6, %v463_v7  ;;  %v8423_v19 = vcombine.low %v452_v8, %v464_v9  ;;  %v298_v6 = vld [vmem:[%s13626_s3 + $0x388] sm:$0xff] }
  0xfd   :  { %2706 = vmatpush1.bf16.msra.mxu1 %v8229_v13  ;;  %2747 = vmatpush1.bf16.msra.mxu0 %v8231_v14  ;;  %v8424_v13 = vcombine.high %v452_v8, %v464_v9  ;;  %v427_v14 = vld [vmem:[%s13626_s3 + $0x790] sm:$0xff] }
  0xfe   :  { %2707 = vmatprep.subr.bf16.mxu1 %v8206_v15  ;;  %2748 = vmatprep.subr.bf16.mxu0 %v8208_v16  ;;  %v439_v15 = vld [vmem:[%s13626_s3 + $0x7f0] sm:$0xff]  ;;  %v428_v16 = vld [vmem:[%s13626_s3 + $0x798] sm:$0xff] }
  0xff   :  { %v8398_v20 = vcombine.high %v427_v14, %v439_v15  ;;  %v8397_v26 = vcombine.low %v427_v14, %v439_v15  ;;  %v8399_v28 = vcombine.low %v428_v16, %v440_v17  ;;  %v274_v14 = vld [vmem:[%s13626_s3 + $0x2c8] sm:$0xff] }
 0x101   :  { %2708 = vmatpush1.bf16.msra.mxu1 %v8205_v21  ;;  %2749 = vmatpush1.bf16.msra.mxu0 %v8207_v22  ;;  %v8400_v21 = vcombine.high %v428_v16, %v440_v17  ;;  %v403_v22 = vld [vmem:[%s13626_s3 + $0x6d0] sm:$0xff] }
 0x102   :  { %2709 = vmatprep.subr.bf16.mxu1 %v8182_v23  ;;  %2750 = vmatprep.subr.bf16.mxu0 %v8184_v24  ;;  %v415_v23 = vld [vmem:[%s13626_s3 + $0x730] sm:$0xff]  ;;  %v404_v24 = vld [vmem:[%s13626_s3 + $0x6d8] sm:$0xff] }
 0x103   :  { %v8374_v31 = vcombine.high %v403_v22, %v415_v23  ;;  %v8373_v37 = vcombine.low %v403_v22, %v415_v23  ;;  %v8375_v38 = vcombine.low %v404_v24, %v416_v25  ;;  %v250_v22 = vld [vmem:[%s13626_s3 + $0x208] sm:$0xff] }
 0x105   :  { %2710 = vmatpush1.bf16.msra.mxu1 %v8181_v32  ;;  %2751 = vmatpush1.bf16.msra.mxu0 %v8183_v33  ;;  %v8376_v32 = vcombine.high %v404_v24, %v416_v25  ;;  %v379_v33 = vld [vmem:[%s13626_s3 + $0x610] sm:$0xff] }
 0x106   :  { %2711 = vmatprep.subr.bf16.mxu1 %v8158_v34  ;;  %2752 = vmatprep.subr.bf16.mxu0 %v8160_v35  ;;  %v391_v34 = vld [vmem:[%s13626_s3 + $0x670] sm:$0xff]  ;;  %v380_v35 = vld [vmem:[%s13626_s3 + $0x618] sm:$0xff] }
 0x107   :  { %v8350_v39 = vcombine.high %v379_v33, %v391_v34  ;;  %v8349_v47 = vcombine.low %v379_v33, %v391_v34  ;;  %v8351_v48 = vcombine.low %v380_v35, %v392_v36  ;;  %v226_v33 = vld [vmem:[%s13626_s3 + $0x148] sm:$0xff] }
 0x109   :  { %2712 = vmatpush1.bf16.msra.mxu1 %v8157_v40  ;;  %2753 = vmatpush1.bf16.msra.mxu0 %v8159_v41  ;;  %v8352_v40 = vcombine.high %v380_v35, %v392_v36  ;;  %v357_v41 = vld [vmem:[%s13626_s3 + $0x560] sm:$0xff] }
 0x10a   :  { %2713 = vmatprep.subr.bf16.mxu1 %v8518_v42  ;;  %2754 = vmatprep.subr.bf16.mxu0 %v8520_v43  ;;  %v369_v42 = vld [vmem:[%s13626_s3 + $0x5c0] sm:$0xff]  ;;  %v358_v43 = vld [vmem:[%s13626_s3 + $0x568] sm:$0xff] }
 0x10b   :  { %v8330_v49 = vcombine.high %v357_v41, %v369_v42  ;;  %v8329_v55 = vcombine.low %v357_v41, %v369_v42  ;;  %v8331_v56 = vcombine.low %v358_v43, %v370_v44  ;;  %v202_v41 = vld [vmem:[%s13626_s3 + $0x88] sm:$0xff] }
 0x10d   :  { %2714 = vmatpush2.bf16.msra.mxu1 %v8517_v50  ;;  %2755 = vmatpush2.bf16.msra.mxu0 %v8519_v51  ;;  %v8332_v50 = vcombine.high %v358_v43, %v370_v44  ;;  %v333_v51 = vld [vmem:[%s13626_s3 + $0x4a0] sm:$0xff] }
 0x10e   :  { %2715 = vmatprep.subr.bf16.mxu1 %v8494_v52  ;;  %2756 = vmatprep.subr.bf16.mxu0 %v8496_v53  ;;  %v345_v52 = vld [vmem:[%s13626_s3 + $0x500] sm:$0xff]  ;;  %v334_v53 = vld [vmem:[%s13626_s3 + $0x4a8] sm:$0xff] }
 0x10f   :  { %v8306_v57 = vcombine.high %v333_v51, %v345_v52  ;;  %v8305_v63 = vcombine.low %v333_v51, %v345_v52  ;;  %v8307_v0 = vcombine.low %v334_v53, %v346_v54  ;;  %v562_v51 = vld [vmem:[%s13626_s3 + $0xbc8] sm:$0xff] }
 0x111   :  { %2716 = vmatpush2.bf16.msra.mxu1 %v8493_v58  ;;  %2757 = vmatpush2.bf16.msra.mxu0 %v8495_v59  ;;  %v8308_v58 = vcombine.high %v334_v53, %v346_v54  ;;  %v309_v59 = vld [vmem:[%s13626_s3 + $0x3e0] sm:$0xff] }
 0x112   :  { %2717 = vmatprep.subr.bf16.mxu1 %v8470_v60  ;;  %2758 = vmatprep.subr.bf16.mxu0 %v8472_v61  ;;  %v321_v60 = vld [vmem:[%s13626_s3 + $0x440] sm:$0xff]  ;;  %v310_v61 = vld [vmem:[%s13626_s3 + $0x3e8] sm:$0xff] }
 0x113   :  { %v8282_v1 = vcombine.high %v309_v59, %v321_v60  ;;  %v8281_v7 = vcombine.low %v309_v59, %v321_v60  ;;  %v8283_v8 = vcombine.low %v310_v61, %v322_v62  ;;  %v538_v59 = vld [vmem:[%s13626_s3 + $0xb08] sm:$0xff] }
 0x115   :  { %2718 = vmatpush2.bf16.msra.mxu1 %v8469_v2  ;;  %2759 = vmatpush2.bf16.msra.mxu0 %v8471_v3  ;;  %v8284_v2 = vcombine.high %v310_v61, %v322_v62  ;;  %v285_v3 = vld [vmem:[%s13626_s3 + $0x320] sm:$0xff] }
 0x116   :  { %2719 = vmatprep.subr.bf16.mxu1 %v8446_v4  ;;  %2760 = vmatprep.subr.bf16.mxu0 %v8448_v5  ;;  %v297_v4 = vld [vmem:[%s13626_s3 + $0x380] sm:$0xff]  ;;  %v286_v5 = vld [vmem:[%s13626_s3 + $0x328] sm:$0xff] }
 0x117   :  { %v8258_v9 = vcombine.high %v285_v3, %v297_v4  ;;  %v8257_v15 = vcombine.low %v285_v3, %v297_v4  ;;  %v8259_v16 = vcombine.low %v286_v5, %v298_v6  ;;  %v514_v3 = vld [vmem:[%s13626_s3 + $0xa48] sm:$0xff] }
 0x119   :  { %2720 = vmatpush2.bf16.msra.mxu1 %v8445_v10  ;;  %2761 = vmatpush2.bf16.msra.mxu0 %v8447_v11  ;;  %v8260_v10 = vcombine.high %v286_v5, %v298_v6  ;;  %v261_v11 = vld [vmem:[%s13626_s3 + $0x260] sm:$0xff] }
 0x11a   :  { %2721 = vmatprep.subr.bf16.mxu1 %v8422_v12  ;;  %2762 = vmatprep.subr.bf16.mxu0 %v8424_v13  ;;  %v273_v12 = vld [vmem:[%s13626_s3 + $0x2c0] sm:$0xff]  ;;  %v262_v13 = vld [vmem:[%s13626_s3 + $0x268] sm:$0xff] }
 0x11b   :  { %v8234_v17 = vcombine.high %v261_v11, %v273_v12  ;;  %v8233_v23 = vcombine.low %v261_v11, %v273_v12  ;;  %v8235_v24 = vcombine.low %v262_v13, %v274_v14  ;;  %v490_v11 = vld [vmem:[%s13626_s3 + $0x988] sm:$0xff] }
 0x11d   :  { %2722 = vmatpush2.bf16.msra.mxu1 %v8421_v18  ;;  %2763 = vmatpush2.bf16.msra.mxu0 %v8423_v19  ;;  %v237_v18 = vld [vmem:[%s13626_s3 + $0x1a0] sm:$0xff] }
 0x11e   :  { %2723 = vmatprep.subr.bf16.mxu1 %v8398_v20  ;;  %2764 = vmatprep.subr.bf16.mxu0 %v8400_v21  ;;  %v249_v19 = vld [vmem:[%s13626_s3 + $0x200] sm:$0xff]  ;;  %v238_v20 = vld [vmem:[%s13626_s3 + $0x1a8] sm:$0xff]  ;;  %v8236_v21 = vcombine.high %v262_v13, %v274_v14 }
 0x11f   :  { %v8210_v25 = vcombine.high %v237_v18, %v249_v19  ;;  %v8209_v34 = vcombine.low %v237_v18, %v249_v19  ;;  %v8211_v35 = vcombine.low %v238_v20, %v250_v22  ;;  %v466_v19 = vld [vmem:[%s13626_s3 + $0x8c8] sm:$0xff] }
 0x121   :  { %2724 = vmatpush2.bf16.msra.mxu1 %v8397_v26  ;;  %2765 = vmatpush2.bf16.msra.mxu0 %v8399_v28  ;;  %v213_v26 = vld [vmem:[%s13626_s3 + $0xe0] sm:$0xff] }
 0x122   :  { %2725 = vmatprep.subr.bf16.mxu1 %v8374_v31  ;;  %2766 = vmatprep.subr.bf16.mxu0 %v8376_v32  ;;  %v225_v28 = vld [vmem:[%s13626_s3 + $0x140] sm:$0xff]  ;;  %v214_v31 = vld [vmem:[%s13626_s3 + $0xe8] sm:$0xff]  ;;  %v8212_v32 = vcombine.high %v238_v20, %v250_v22 }
 0x123   :  { %v8186_v36 = vcombine.high %v213_v26, %v225_v28  ;;  %v8185_v42 = vcombine.low %v213_v26, %v225_v28  ;;  %v8187_v43 = vcombine.low %v214_v31, %v226_v33  ;;  %v442_v28 = vld [vmem:[%s13626_s3 + $0x808] sm:$0xff] }
 0x125   :  { %2726 = vmatpush2.bf16.msra.mxu1 %v8373_v37  ;;  %2767 = vmatpush2.bf16.msra.mxu0 %v8375_v38  ;;  %v189_v37 = vld [vmem:[%s13626_s3 + $0x20] sm:$0xff] }
 0x126   :  { %2727 = vmatprep.subr.bf16.mxu1 %v8350_v39  ;;  %2768 = vmatprep.subr.bf16.mxu0 %v8352_v40  ;;  %v201_v38 = vld [vmem:[%s13626_s3 + $0x80] sm:$0xff]  ;;  %v190_v39 = vld [vmem:[%s13626_s3 + $0x28] sm:$0xff]  ;;  %v8188_v40 = vcombine.high %v214_v31, %v226_v33 }
 0x127   :  { %v8162_v44 = vcombine.high %v189_v37, %v201_v38  ;;  %v8161_v52 = vcombine.low %v189_v37, %v201_v38  ;;  %v8163_v53 = vcombine.low %v190_v39, %v202_v41  ;;  %v418_v38 = vld [vmem:[%s13626_s3 + $0x748] sm:$0xff] }
 0x129   :  { %2728 = vmatpush2.bf16.msra.mxu1 %v8349_v47  ;;  %2769 = vmatpush2.bf16.msra.mxu0 %v8351_v48  ;;  %v549_v47 = vld [vmem:[%s13626_s3 + $0xb60] sm:$0xff] }
 0x12a   :  { %2779 = vmatprep.subr.bf16.mxu1 %v8330_v49  ;;  %2820 = vmatprep.subr.bf16.mxu0 %v8332_v50  ;;  %v561_v48 = vld [vmem:[%s13626_s3 + $0xbc0] sm:$0xff]  ;;  %v550_v49 = vld [vmem:[%s13626_s3 + $0xb68] sm:$0xff]  ;;  %v8164_v50 = vcombine.high %v190_v39, %v202_v41 }
 0x12b   :  { %v8522_v54 = vcombine.high %v549_v47, %v561_v48  ;;  %v8521_v60 = vcombine.low %v549_v47, %v561_v48  ;;  %v8523_v61 = vcombine.low %v550_v49, %v562_v51  ;;  %v394_v48 = vld [vmem:[%s13626_s3 + $0x688] sm:$0xff] }
 0x12c   :  { %2730 = vmatmul.mubr.bf16.vlgmr.msra.gmra.mxu1 %v10541_v46  ;;  %2771 = vmatmul.mubr.bf16.vlgmr.msra.gmra.mxu0 %v10541_v46 }
 0x12d   :  { %2780 = vmatpush1.bf16.msra.mxu1 %v8329_v55  ;;  %2811 = vmatprep.mubr.bf16.mxu1 %v10539_v45  ;;  %v525_v55 = vld [vmem:[%s13626_s3 + $0xaa0] sm:$0xff] }
 0x12e   :  { %2821 = vmatpush1.bf16.msra.mxu0 %v8331_v56  ;;  %2852 = vmatprep.mubr.bf16.mxu0 %v10539_v45  ;;  %v537_v56 = vld [vmem:[%s13626_s3 + $0xb00] sm:$0xff] }
 0x12f   :  { %2781 = vmatprep.subr.bf16.mxu1 %v8306_v57  ;;  %2822 = vmatprep.subr.bf16.mxu0 %v8308_v58  ;;  %v526_v57 = vld [vmem:[%s13626_s3 + $0xaa8] sm:$0xff]  ;;  %v8524_v58 = vcombine.high %v550_v49, %v562_v51  ;;  %v8498_v62 = vcombine.high %v525_v55, %v537_v56  ;;  %v8497_v4 = vcombine.low %v525_v55, %v537_v56  ;;  %v372_v56 = vld [vmem:[%s13626_s3 + $0x5d8] sm:$0xff] }
 0x130   :  { %v8499_v5 = vcombine.low %v526_v57, %v538_v59 }
 0x131   :  { %2782 = vmatpush1.bf16.msra.mxu1 %v8305_v63  ;;  %v501_v63 = vld [vmem:[%s13626_s3 + $0x9e0] sm:$0xff] }
 0x132   :  { %2823 = vmatpush1.bf16.msra.mxu0 %v8307_v0  ;;  %2783 = vmatprep.subr.bf16.mxu1 %v8282_v1  ;;  %v513_v0 = vld [vmem:[%s13626_s3 + $0xa40] sm:$0xff]  ;;  %v502_v1 = vld [vmem:[%s13626_s3 + $0x9e8] sm:$0xff] }
 0x133   :  { %2824 = vmatprep.subr.bf16.mxu0 %v8284_v2  ;;  %v8500_v2 = vcombine.high %v526_v57, %v538_v59  ;;  %v8474_v6 = vcombine.high %v501_v63, %v513_v0  ;;  %v8473_v12 = vcombine.low %v501_v63, %v513_v0  ;;  %v8475_v13 = vcombine.low %v502_v1, %v514_v3  ;;  %v336_v63 = vld [vmem:[%s13626_s3 + $0x4b8] sm:$0xff] }
 0x134   :  { %v348_v0 = vld [vmem:[%s13626_s3 + $0x518] sm:$0xff] }
 0x135   :  { %2784 = vmatpush1.bf16.msra.mxu1 %v8281_v7  ;;  %v477_v7 = vld [vmem:[%s13626_s3 + $0x920] sm:$0xff] }
 0x136   :  { %2825 = vmatpush1.bf16.msra.mxu0 %v8283_v8  ;;  %2785 = vmatprep.subr.bf16.mxu1 %v8258_v9  ;;  %v489_v8 = vld [vmem:[%s13626_s3 + $0x980] sm:$0xff]  ;;  %v478_v9 = vld [vmem:[%s13626_s3 + $0x928] sm:$0xff] }
 0x137   :  { %2826 = vmatprep.subr.bf16.mxu0 %v8260_v10  ;;  %v8476_v10 = vcombine.high %v502_v1, %v514_v3  ;;  %v8450_v14 = vcombine.high %v477_v7, %v489_v8  ;;  %v8452_v18 = vcombine.high %v478_v9, %v490_v11  ;;  %v8449_v20 = vcombine.low %v477_v7, %v489_v8  ;;  %v324_v8 = vld [vmem:[%s13626_s3 + $0x458] sm:$0xff] }
 0x138   :  { %v8312_v7 = vcombine.high %v336_v63, %v348_v0 }
 0x139   :  { %2786 = vmatpush1.bf16.msra.mxu1 %v8257_v15  ;;  %v453_v15 = vld [vmem:[%s13626_s3 + $0x860] sm:$0xff] }
 0x13a   :  { %2827 = vmatpush1.bf16.msra.mxu0 %v8259_v16  ;;  %2787 = vmatprep.subr.bf16.mxu1 %v8234_v17  ;;  %v465_v16 = vld [vmem:[%s13626_s3 + $0x8c0] sm:$0xff]  ;;  %v454_v17 = vld [vmem:[%s13626_s3 + $0x868] sm:$0xff] }
 0x13b   :  { %2828 = vmatprep.subr.bf16.mxu0 %v8236_v21  ;;  %v8451_v21 = vcombine.low %v478_v9, %v490_v11  ;;  %v8426_v22 = vcombine.high %v453_v15, %v465_v16  ;;  %v8428_v26 = vcombine.high %v454_v17, %v466_v19  ;;  %v8425_v31 = vcombine.low %v453_v15, %v465_v16  ;;  %v288_v15 = vld [vmem:[%s13626_s3 + $0x338] sm:$0xff] }
 0x13c   :  { %v300_v16 = vld [vmem:[%s13626_s3 + $0x398] sm:$0xff] }
 0x13d   :  { %2788 = vmatpush1.bf16.msra.mxu1 %v8233_v23  ;;  %v429_v23 = vld [vmem:[%s13626_s3 + $0x7a0] sm:$0xff] }
 0x13e   :  { %2829 = vmatpush1.bf16.msra.mxu0 %v8235_v24  ;;  %2789 = vmatprep.subr.bf16.mxu1 %v8210_v25  ;;  %v441_v24 = vld [vmem:[%s13626_s3 + $0x800] sm:$0xff]  ;;  %v430_v25 = vld [vmem:[%s13626_s3 + $0x7a8] sm:$0xff] }
 0x13f   :  { %2830 = vmatprep.subr.bf16.mxu0 %v8212_v32  ;;  %v8427_v32 = vcombine.low %v454_v17, %v466_v19  ;;  %v8402_v33 = vcombine.high %v429_v23, %v441_v24  ;;  %v8404_v37 = vcombine.high %v430_v25, %v442_v28  ;;  %v8401_v39 = vcombine.low %v429_v23, %v441_v24  ;;  %v264_v23 = vld [vmem:[%s13626_s3 + $0x278] sm:$0xff] }
 0x140   :  { %v276_v24 = vld [vmem:[%s13626_s3 + $0x2d8] sm:$0xff] }
 0x141   :  { %2790 = vmatpush1.bf16.msra.mxu1 %v8209_v34  ;;  %v405_v34 = vld [vmem:[%s13626_s3 + $0x6e0] sm:$0xff] }
 0x142   :  { %2831 = vmatpush1.bf16.msra.mxu0 %v8211_v35  ;;  %2791 = vmatprep.subr.bf16.mxu1 %v8186_v36  ;;  %v417_v35 = vld [vmem:[%s13626_s3 + $0x740] sm:$0xff]  ;;  %v406_v36 = vld [vmem:[%s13626_s3 + $0x6e8] sm:$0xff] }
 0x143   :  { %2832 = vmatprep.subr.bf16.mxu0 %v8188_v40  ;;  %v8403_v40 = vcombine.low %v430_v25, %v442_v28  ;;  %v8378_v41 = vcombine.high %v405_v34, %v417_v35  ;;  %v8380_v47 = vcombine.high %v406_v36, %v418_v38  ;;  %v8377_v49 = vcombine.low %v405_v34, %v417_v35  ;;  %v252_v35 = vld [vmem:[%s13626_s3 + $0x218] sm:$0xff] }
 0x144   :  { %v8240_v34 = vcombine.high %v264_v23, %v276_v24 }
 0x145   :  { %2792 = vmatpush1.bf16.msra.mxu1 %v8185_v42  ;;  %v381_v42 = vld [vmem:[%s13626_s3 + $0x620] sm:$0xff] }
 0x146   :  { %2833 = vmatpush1.bf16.msra.mxu0 %v8187_v43  ;;  %2793 = vmatprep.subr.bf16.mxu1 %v8162_v44  ;;  %v393_v43 = vld [vmem:[%s13626_s3 + $0x680] sm:$0xff]  ;;  %v382_v44 = vld [vmem:[%s13626_s3 + $0x628] sm:$0xff] }
 0x147   :  { %2834 = vmatprep.subr.bf16.mxu0 %v8164_v50  ;;  %v8379_v50 = vcombine.low %v406_v36, %v418_v38  ;;  %v8354_v51 = vcombine.high %v381_v42, %v393_v43  ;;  %v8356_v55 = vcombine.high %v382_v44, %v394_v48  ;;  %v8353_v57 = vcombine.low %v381_v42, %v393_v43  ;;  %v228_v43 = vld [vmem:[%s13626_s3 + $0x158] sm:$0xff] }
 0x149   :  { %2794 = vmatpush1.bf16.msra.mxu1 %v8161_v52  ;;  %v359_v52 = vld [vmem:[%s13626_s3 + $0x570] sm:$0xff] }
 0x14a   :  { %2835 = vmatpush1.bf16.msra.mxu0 %v8163_v53  ;;  %2795 = vmatprep.subr.bf16.mxu1 %v8522_v54  ;;  %v371_v53 = vld [vmem:[%s13626_s3 + $0x5d0] sm:$0xff]  ;;  %v360_v54 = vld [vmem:[%s13626_s3 + $0x578] sm:$0xff] }
 0x14b   :  { %2836 = vmatprep.subr.bf16.mxu0 %v8524_v58  ;;  %v8355_v58 = vcombine.low %v382_v44, %v394_v48  ;;  %v8334_v59 = vcombine.high %v359_v52, %v371_v53  ;;  %v8333_v1 = vcombine.low %v359_v52, %v371_v53  ;;  %v192_v52 = vld [vmem:[%s13626_s3 + $0x38] sm:$0xff] }
 0x14c   :  { %v204_v53 = vld [vmem:[%s13626_s3 + $0x98] sm:$0xff] }
 0x14d   :  { %2796 = vmatpush2.bf16.msra.mxu1 %v8521_v60  ;;  %v335_v60 = vld [vmem:[%s13626_s3 + $0x4b0] sm:$0xff] }
 0x14e   :  { %2837 = vmatpush2.bf16.msra.mxu0 %v8523_v61  ;;  %2797 = vmatprep.subr.bf16.mxu1 %v8498_v62  ;;  %v347_v61 = vld [vmem:[%s13626_s3 + $0x510] sm:$0xff]  ;;  %v8336_v62 = vcombine.high %v360_v54, %v372_v56 }
 0x14f   :  { %2838 = vmatprep.subr.bf16.mxu0 %v8500_v2  ;;  %v8335_v2 = vcombine.low %v360_v54, %v372_v56  ;;  %v8310_v3 = vcombine.high %v335_v60, %v347_v61  ;;  %v8309_v9 = vcombine.low %v335_v60, %v347_v61 }
 0x151   :  { %2798 = vmatpush2.bf16.msra.mxu1 %v8497_v4  ;;  %v311_v4 = vld [vmem:[%s13626_s3 + $0x3f0] sm:$0xff] }
 0x152   :  { %2839 = vmatpush2.bf16.msra.mxu0 %v8499_v5  ;;  %2799 = vmatprep.subr.bf16.mxu1 %v8474_v6  ;;  %v323_v5 = vld [vmem:[%s13626_s3 + $0x450] sm:$0xff]  ;;  %v312_v6 = vld [vmem:[%s13626_s3 + $0x3f8] sm:$0xff] }
 0x153   :  { %2840 = vmatprep.subr.bf16.mxu0 %v8476_v10  ;;  %v8311_v10 = vcombine.low %v336_v63, %v348_v0  ;;  %v8286_v11 = vcombine.high %v311_v4, %v323_v5  ;;  %v8285_v17 = vcombine.low %v311_v4, %v323_v5 }
 0x155   :  { %2800 = vmatpush2.bf16.msra.mxu1 %v8473_v12  ;;  %v8288_v12 = vcombine.high %v312_v6, %v324_v8 }
 0x156   :  { %2841 = vmatpush2.bf16.msra.mxu0 %v8475_v13  ;;  %2801 = vmatprep.subr.bf16.mxu1 %v8450_v14  ;;  %v287_v13 = vld [vmem:[%s13626_s3 + $0x330] sm:$0xff] }
 0x157   :  { %2842 = vmatprep.subr.bf16.mxu0 %v8452_v18  ;;  %v299_v14 = vld [vmem:[%s13626_s3 + $0x390] sm:$0xff]  ;;  %v8287_v18 = vcombine.low %v312_v6, %v324_v8 }
 0x158   :  { %v8262_v19 = vcombine.high %v287_v13, %v299_v14  ;;  %v8261_v25 = vcombine.low %v287_v13, %v299_v14 }
 0x159   :  { %2802 = vmatpush2.bf16.msra.mxu1 %v8449_v20  ;;  %v8264_v20 = vcombine.high %v288_v15, %v300_v16 }
 0x15a   :  { %2843 = vmatpush2.bf16.msra.mxu0 %v8451_v21  ;;  %2803 = vmatprep.subr.bf16.mxu1 %v8426_v22  ;;  %v263_v21 = vld [vmem:[%s13626_s3 + $0x270] sm:$0xff] }
 0x15b   :  { %2844 = vmatprep.subr.bf16.mxu0 %v8428_v26  ;;  %v275_v22 = vld [vmem:[%s13626_s3 + $0x2d0] sm:$0xff]  ;;  %v8263_v26 = vcombine.low %v288_v15, %v300_v16 }
 0x15c   :  { %v8238_v28 = vcombine.high %v263_v21, %v275_v22  ;;  %v8237_v36 = vcombine.low %v263_v21, %v275_v22 }
 0x15d   :  { %2804 = vmatpush2.bf16.msra.mxu1 %v8425_v31  ;;  %v239_v31 = vld [vmem:[%s13626_s3 + $0x1b0] sm:$0xff] }
 0x15e   :  { %2845 = vmatpush2.bf16.msra.mxu0 %v8427_v32  ;;  %2805 = vmatprep.subr.bf16.mxu1 %v8402_v33  ;;  %v251_v32 = vld [vmem:[%s13626_s3 + $0x210] sm:$0xff]  ;;  %v240_v33 = vld [vmem:[%s13626_s3 + $0x1b8] sm:$0xff] }
 0x15f   :  { %2846 = vmatprep.subr.bf16.mxu0 %v8404_v37  ;;  %v8239_v37 = vcombine.low %v264_v23, %v276_v24  ;;  %v8214_v38 = vcombine.high %v239_v31, %v251_v32  ;;  %v8216_v42 = vcombine.high %v240_v33, %v252_v35  ;;  %v8213_v44 = vcombine.low %v239_v31, %v251_v32 }
 0x161   :  { %2806 = vmatpush2.bf16.msra.mxu1 %v8401_v39  ;;  %v215_v39 = vld [vmem:[%s13626_s3 + $0xf0] sm:$0xff] }
 0x162   :  { %2847 = vmatpush2.bf16.msra.mxu0 %v8403_v40  ;;  %2807 = vmatprep.subr.bf16.mxu1 %v8378_v41  ;;  %v227_v40 = vld [vmem:[%s13626_s3 + $0x150] sm:$0xff]  ;;  %v216_v41 = vld [vmem:[%s13626_s3 + $0xf8] sm:$0xff] }
 0x163   :  { %2848 = vmatprep.subr.bf16.mxu0 %v8380_v47  ;;  %v8215_v47 = vcombine.low %v240_v33, %v252_v35  ;;  %v8190_v48 = vcombine.high %v215_v39, %v227_v40 }
 0x165   :  { %2808 = vmatpush2.bf16.msra.mxu1 %v8377_v49  ;;  %v191_v49 = vld [vmem:[%s13626_s3 + $0x30] sm:$0xff] }
 0x166   :  { %2849 = vmatpush2.bf16.msra.mxu0 %v8379_v50  ;;  %2809 = vmatprep.subr.bf16.mxu1 %v8354_v51  ;;  %v8192_v50 = vcombine.high %v216_v41, %v228_v43  ;;  %v203_v51 = vld [vmem:[%s13626_s3 + $0x90] sm:$0xff] }
 0x167   :  { %2850 = vmatprep.subr.bf16.mxu0 %v8356_v55 }
 0x169   :  { %2810 = vmatpush2.bf16.msra.mxu1 %v8353_v57 }
 0x16a   :  { %2851 = vmatpush2.bf16.msra.mxu0 %v8355_v58  ;;  %2861 = vmatprep.subr.bf16.mxu1 %v8334_v59 }
 0x16b   :  { %2902 = vmatprep.subr.bf16.mxu0 %v8336_v62 }
 0x16c   :  { %2812 = vmatmul.mubr.bf16.vlgmr.msra.gmra.mxu1 %v10541_v46 }
 0x16d   :  { %2853 = vmatmul.mubr.bf16.vlgmr.msra.gmra.mxu0 %v10541_v46  ;;  %2862 = vmatpush1.bf16.msra.mxu1 %v8333_v1 }
 0x16e   :  { %2893 = vmatprep.mubr.bf16.mxu1 %v10539_v45  ;;  %2903 = vmatpush1.bf16.msra.mxu0 %v8335_v2 }
 0x16f   :  { %2934 = vmatprep.mubr.bf16.mxu0 %v10539_v45  ;;  %2863 = vmatprep.subr.bf16.mxu1 %v8310_v3 }
 0x170   :  { %2904 = vmatprep.subr.bf16.mxu0 %v8312_v7 }
 0x171   :  { %2864 = vmatpush1.bf16.msra.mxu1 %v8309_v9 }
 0x172   :  { %2905 = vmatpush1.bf16.msra.mxu0 %v8311_v10  ;;  %2865 = vmatprep.subr.bf16.mxu1 %v8286_v11 }
 0x173   :  { %2906 = vmatprep.subr.bf16.mxu0 %v8288_v12 }
 0x175   :  { %2866 = vmatpush1.bf16.msra.mxu1 %v8285_v17 }
 0x176   :  { %2907 = vmatpush1.bf16.msra.mxu0 %v8287_v18  ;;  %2867 = vmatprep.subr.bf16.mxu1 %v8262_v19 }
 0x177   :  { %2908 = vmatprep.subr.bf16.mxu0 %v8264_v20 }
 0x179   :  { %2868 = vmatpush1.bf16.msra.mxu1 %v8261_v25 }
 0x17a   :  { %2909 = vmatpush1.bf16.msra.mxu0 %v8263_v26  ;;  %2869 = vmatprep.subr.bf16.mxu1 %v8238_v28 }
 0x17b   :  { %2910 = vmatprep.subr.bf16.mxu0 %v8240_v34 }
 0x17d   :  { %2870 = vmatpush1.bf16.msra.mxu1 %v8237_v36 }
 0x17e   :  { %2911 = vmatpush1.bf16.msra.mxu0 %v8239_v37  ;;  %2871 = vmatprep.subr.bf16.mxu1 %v8214_v38 }
 0x17f   :  { %2912 = vmatprep.subr.bf16.mxu0 %v8216_v42 }
 0x180   :  { %13 = vsyncpa [#allocation3], 0  ;;  %v8189_v54 = vcombine.low %v215_v39, %v227_v40  ;;  %v8191_v55 = vcombine.low %v216_v41, %v228_v43  ;;  %v8166_v56 = vcombine.high %v191_v49, %v203_v51  ;;  %v8168_v57 = vcombine.high %v192_v52, %v204_v53  ;;  %v551_v58 = vld [vmem:[%s13626_s3 + $0xb70] sm:$0xff]  ;;  %v552_v60 = vld [vmem:[%s13626_s3 + $0xb78] sm:$0xff] }
 0x181   :  { %2872 = vmatpush1.bf16.msra.mxu1 %v8213_v44  ;;  %v563_v59 = vld [vmem:[%s13626_s3 + $0xbd0] sm:$0xff]  ;;  %v564_v61 = vld [vmem:[%s13626_s3 + $0xbd8] sm:$0xff]  ;;  %v8165_v62 = vcombine.low %v191_v49, %v203_v51  ;;  %v8167_v63 = vcombine.low %v192_v52, %v204_v53  ;;  %vm7967_vm0 = vcmask 195584   ;;  %vm8119_vm1 = vcmask 1043456  }
 0x182   :  { %2913 = vmatpush1.bf16.msra.mxu0 %v8215_v47  ;;  %2873 = vmatprep.subr.bf16.mxu1 %v8190_v48  ;;  %v8526_v0 = vcombine.high %v551_v58, %v563_v59  ;;  %v8528_v1 = vcombine.high %v552_v60, %v564_v61  ;;  %v527_v2 = vld [vmem:[%s13626_s3 + $0xab0] sm:$0xff]  ;;  %v528_v4 = vld [vmem:[%s13626_s3 + $0xab8] sm:$0xff]  ;;  %v8525_v6 = vcombine.low %v551_v58, %v563_v59  ;;  %vm8120_vm2 = vcmask 916484  }
 0x183   :  { %2914 = vmatprep.subr.bf16.mxu0 %v8192_v50  ;;  %v539_v3 = vld [vmem:[%s13626_s3 + $0xb10] sm:$0xff]  ;;  %v540_v5 = vld [vmem:[%s13626_s3 + $0xb18] sm:$0xff]  ;;  %v8527_v7 = vcombine.low %v552_v60, %v564_v61  ;;  %vm8121_vm3 = vmor %vm8120_vm2, %vm8119_vm1 }
 0x184   :  { %v8502_v8 = vcombine.high %v527_v2, %v539_v3  ;;  %v8504_v9 = vcombine.high %v528_v4, %v540_v5  ;;  %v503_v10 = vld [vmem:[%s13626_s3 + $0x9f0] sm:$0xff]  ;;  %v504_v12 = vld [vmem:[%s13626_s3 + $0x9f8] sm:$0xff]  ;;  %v8501_v14 = vcombine.low %v527_v2, %v539_v3  ;;  %v8503_v15 = vcombine.low %v528_v4, %v540_v5  ;;  %v374_v2 = vld [vmem:[%s13626_s3 + $0x5e8] sm:$0xff] }
 0x185   :  { %2874 = vmatpush1.bf16.msra.mxu1 %v8189_v54  ;;  %v515_v11 = vld [vmem:[%s13626_s3 + $0xa50] sm:$0xff]  ;;  %v516_v13 = vld [vmem:[%s13626_s3 + $0xa58] sm:$0xff] }
 0x186   :  { %2915 = vmatpush1.bf16.msra.mxu0 %v8191_v55  ;;  %2875 = vmatprep.subr.bf16.mxu1 %v8166_v56  ;;  %v8478_v16 = vcombine.high %v503_v10, %v515_v11  ;;  %v8480_v17 = vcombine.high %v504_v12, %v516_v13  ;;  %v479_v18 = vld [vmem:[%s13626_s3 + $0x930] sm:$0xff]  ;;  %v480_v20 = vld [vmem:[%s13626_s3 + $0x938] sm:$0xff]  ;;  %v8477_v22 = vcombine.low %v503_v10, %v515_v11  ;;  %v338_v10 = vld [vmem:[%s13626_s3 + $0x4c8] sm:$0xff] }
 0x187   :  { %2916 = vmatprep.subr.bf16.mxu0 %v8168_v57  ;;  %v491_v19 = vld [vmem:[%s13626_s3 + $0x990] sm:$0xff]  ;;  %v492_v21 = vld [vmem:[%s13626_s3 + $0x998] sm:$0xff]  ;;  %v8479_v23 = vcombine.low %v504_v12, %v516_v13  ;;  %v350_v11 = vld [vmem:[%s13626_s3 + $0x528] sm:$0xff] }
 0x188   :  { %v8454_v24 = vcombine.high %v479_v18, %v491_v19  ;;  %v8456_v25 = vcombine.high %v480_v20, %v492_v21  ;;  %v455_v26 = vld [vmem:[%s13626_s3 + $0x870] sm:$0xff]  ;;  %v456_v31 = vld [vmem:[%s13626_s3 + $0x878] sm:$0xff]  ;;  %v8453_v33 = vcombine.low %v479_v18, %v491_v19  ;;  %v8455_v34 = vcombine.low %v480_v20, %v492_v21  ;;  %v314_v19 = vld [vmem:[%s13626_s3 + $0x408] sm:$0xff] }
 0x189   :  { %2876 = vmatpush1.bf16.msra.mxu1 %v8165_v62  ;;  %v467_v28 = vld [vmem:[%s13626_s3 + $0x8d0] sm:$0xff]  ;;  %v468_v32 = vld [vmem:[%s13626_s3 + $0x8d8] sm:$0xff]  ;;  %v8316_v18 = vcombine.high %v338_v10, %v350_v11  ;;  %v326_v20 = vld [vmem:[%s13626_s3 + $0x468] sm:$0xff] }
 0x18a   :  { %2917 = vmatpush1.bf16.msra.mxu0 %v8167_v63  ;;  %2877 = vmatprep.subr.bf16.mxu1 %v8526_v0  ;;  %v8430_v35 = vcombine.high %v455_v26, %v467_v28  ;;  %v8432_v36 = vcombine.high %v456_v31, %v468_v32  ;;  %v431_v37 = vld [vmem:[%s13626_s3 + $0x7b0] sm:$0xff]  ;;  %v432_v39 = vld [vmem:[%s13626_s3 + $0x7b8] sm:$0xff]  ;;  %v8429_v41 = vcombine.low %v455_v26, %v467_v28  ;;  %v361_v63 = vld [vmem:[%s13626_s3 + $0x580] sm:$0xff] }
 0x18b   :  { %2918 = vmatprep.subr.bf16.mxu0 %v8528_v1  ;;  %v443_v38 = vld [vmem:[%s13626_s3 + $0x810] sm:$0xff]  ;;  %v444_v40 = vld [vmem:[%s13626_s3 + $0x818] sm:$0xff]  ;;  %v8431_v42 = vcombine.low %v456_v31, %v468_v32  ;;  %v373_v0 = vld [vmem:[%s13626_s3 + $0x5e0] sm:$0xff]  ;;  %v8292_v26 = vcombine.high %v314_v19, %v326_v20 }
 0x18c   :  { %v8406_v43 = vcombine.high %v431_v37, %v443_v38  ;;  %v8408_v44 = vcombine.high %v432_v39, %v444_v40  ;;  %v407_v47 = vld [vmem:[%s13626_s3 + $0x6f0] sm:$0xff]  ;;  %v408_v49 = vld [vmem:[%s13626_s3 + $0x6f8] sm:$0xff]  ;;  %v8405_v51 = vcombine.low %v431_v37, %v443_v38  ;;  %v8407_v52 = vcombine.low %v432_v39, %v444_v40  ;;  %v362_v1 = vld [vmem:[%s13626_s3 + $0x588] sm:$0xff] }
 0x18d   :  { %2878 = vmatpush2.bf16.msra.mxu1 %v8525_v6  ;;  %v419_v48 = vld [vmem:[%s13626_s3 + $0x750] sm:$0xff]  ;;  %v420_v50 = vld [vmem:[%s13626_s3 + $0x758] sm:$0xff]  ;;  %v8338_v5 = vcombine.high %v361_v63, %v373_v0  ;;  %v8340_v6 = vcombine.high %v362_v1, %v374_v2  ;;  %v8339_v12 = vcombine.low %v362_v1, %v374_v2  ;;  %v289_v28 = vld [vmem:[%s13626_s3 + $0x340] sm:$0xff]  ;;  %v8291_v39 = vcombine.low %v314_v19, %v326_v20 }
 0x18e   :  { %2919 = vmatpush2.bf16.msra.mxu0 %v8527_v7  ;;  %2879 = vmatprep.subr.bf16.mxu1 %v8502_v8  ;;  %v8382_v53 = vcombine.high %v407_v47, %v419_v48  ;;  %v8384_v54 = vcombine.high %v408_v49, %v420_v50  ;;  %v383_v55 = vld [vmem:[%s13626_s3 + $0x630] sm:$0xff]  ;;  %v384_v57 = vld [vmem:[%s13626_s3 + $0x638] sm:$0xff]  ;;  %v8381_v59 = vcombine.low %v407_v47, %v419_v48  ;;  %v337_v7 = vld [vmem:[%s13626_s3 + $0x4c0] sm:$0xff] }
 0x18f   :  { %2920 = vmatprep.subr.bf16.mxu0 %v8504_v9  ;;  %v395_v56 = vld [vmem:[%s13626_s3 + $0x690] sm:$0xff]  ;;  %v396_v58 = vld [vmem:[%s13626_s3 + $0x698] sm:$0xff]  ;;  %v8383_v60 = vcombine.low %v408_v49, %v420_v50  ;;  %v349_v8 = vld [vmem:[%s13626_s3 + $0x520] sm:$0xff]  ;;  %v8337_v9 = vcombine.low %v361_v63, %v373_v0 }
 0x190   :  { %v8358_v61 = vcombine.high %v383_v55, %v395_v56  ;;  %v8360_v62 = vcombine.high %v384_v57, %v396_v58  ;;  %v8357_v3 = vcombine.low %v383_v55, %v395_v56  ;;  %v8359_v4 = vcombine.low %v384_v57, %v396_v58  ;;  %v301_v31 = vld [vmem:[%s13626_s3 + $0x3a0] sm:$0xff]  ;;  %v278_v47 = vld [vmem:[%s13626_s3 + $0x2e8] sm:$0xff] }
 0x191   :  { %2880 = vmatpush2.bf16.msra.mxu1 %v8501_v14  ;;  %v8314_v13 = vcombine.high %v337_v7, %v349_v8  ;;  %v313_v14 = vld [vmem:[%s13626_s3 + $0x400] sm:$0xff]  ;;  %v8313_v21 = vcombine.low %v337_v7, %v349_v8  ;;  %v8266_v40 = vcombine.high %v289_v28, %v301_v31  ;;  %v8265_v48 = vcombine.low %v289_v28, %v301_v31  ;;  %v254_v55 = vld [vmem:[%s13626_s3 + $0x228] sm:$0xff] }
 0x192   :  { %2921 = vmatpush2.bf16.msra.mxu0 %v8503_v15  ;;  %2881 = vmatprep.subr.bf16.mxu1 %v8478_v16  ;;  %v325_v15 = vld [vmem:[%s13626_s3 + $0x460] sm:$0xff]  ;;  %v230_v63 = vld [vmem:[%s13626_s3 + $0x168] sm:$0xff] }
 0x193   :  { %2922 = vmatprep.subr.bf16.mxu0 %v8480_v17  ;;  %v206_v7 = vld [vmem:[%s13626_s3 + $0xa8] sm:$0xff] }
 0x194   :  { %v542_v28 = vld [vmem:[%s13626_s3 + $0xb28] sm:$0xff] }
 0x195   :  { %2882 = vmatpush2.bf16.msra.mxu1 %v8477_v22 }
 0x196   :  { %2923 = vmatpush2.bf16.msra.mxu0 %v8479_v23  ;;  %2883 = vmatprep.subr.bf16.mxu1 %v8454_v24  ;;  %v8315_v24 = vcombine.low %v338_v10, %v350_v11 }
 0x197   :  { %2924 = vmatprep.subr.bf16.mxu0 %v8456_v25  ;;  %v8290_v25 = vcombine.high %v313_v14, %v325_v15 }
 0x199   :  { %2884 = vmatpush2.bf16.msra.mxu1 %v8453_v33 }
 0x19a   :  { %2925 = vmatpush2.bf16.msra.mxu0 %v8455_v34  ;;  %2885 = vmatprep.subr.bf16.mxu1 %v8430_v35  ;;  %v290_v34 = vld [vmem:[%s13626_s3 + $0x348] sm:$0xff] }
 0x19b   :  { %2926 = vmatprep.subr.bf16.mxu0 %v8432_v36  ;;  %v302_v35 = vld [vmem:[%s13626_s3 + $0x3a8] sm:$0xff]  ;;  %v8289_v36 = vcombine.low %v313_v14, %v325_v15 }
 0x19c   :  { %v8267_v49 = vcombine.low %v290_v34, %v302_v35  ;;  %v554_v14 = vld [vmem:[%s13626_s3 + $0xb88] sm:$0xff] }
 0x19d   :  { %2886 = vmatpush2.bf16.msra.mxu1 %v8429_v41  ;;  %v8268_v41 = vcombine.high %v290_v34, %v302_v35  ;;  %v566_v15 = vld [vmem:[%s13626_s3 + $0xbe8] sm:$0xff]  ;;  %v505_v35 = vld [vmem:[%s13626_s3 + $0xa00] sm:$0xff] }
 0x19e   :  { %2927 = vmatpush2.bf16.msra.mxu0 %v8431_v42  ;;  %2887 = vmatprep.subr.bf16.mxu1 %v8406_v43  ;;  %v265_v42 = vld [vmem:[%s13626_s3 + $0x280] sm:$0xff] }
 0x19f   :  { %2928 = vmatprep.subr.bf16.mxu0 %v8408_v44  ;;  %v277_v43 = vld [vmem:[%s13626_s3 + $0x2e0] sm:$0xff]  ;;  %v266_v44 = vld [vmem:[%s13626_s3 + $0x288] sm:$0xff] }
 0x1a0   :  { %v8242_v50 = vcombine.high %v265_v42, %v277_v43  ;;  %v8241_v56 = vcombine.low %v265_v42, %v277_v43  ;;  %v8243_v57 = vcombine.low %v266_v44, %v278_v47  ;;  %v481_v43 = vld [vmem:[%s13626_s3 + $0x940] sm:$0xff] }
 0x1a1   :  { %2888 = vmatpush2.bf16.msra.mxu1 %v8405_v51  ;;  %v8244_v51 = vcombine.high %v266_v44, %v278_v47  ;;  %v493_v44 = vld [vmem:[%s13626_s3 + $0x9a0] sm:$0xff]  ;;  %v482_v47 = vld [vmem:[%s13626_s3 + $0x948] sm:$0xff] }
 0x1a2   :  { %2929 = vmatpush2.bf16.msra.mxu0 %v8407_v52  ;;  %2889 = vmatprep.subr.bf16.mxu1 %v8382_v53  ;;  %v241_v52 = vld [vmem:[%s13626_s3 + $0x1c0] sm:$0xff] }
 0x1a3   :  { %2930 = vmatprep.subr.bf16.mxu0 %v8384_v54  ;;  %v253_v53 = vld [vmem:[%s13626_s3 + $0x220] sm:$0xff]  ;;  %v242_v54 = vld [vmem:[%s13626_s3 + $0x1c8] sm:$0xff] }
 0x1a4   :  { %v8218_v58 = vcombine.high %v241_v52, %v253_v53  ;;  %v8217_v0 = vcombine.low %v241_v52, %v253_v53  ;;  %v8219_v1 = vcombine.low %v242_v54, %v254_v55  ;;  %v457_v53 = vld [vmem:[%s13626_s3 + $0x880] sm:$0xff] }
 0x1a5   :  { %2890 = vmatpush2.bf16.msra.mxu1 %v8381_v59  ;;  %v8220_v59 = vcombine.high %v242_v54, %v254_v55  ;;  %v469_v54 = vld [vmem:[%s13626_s3 + $0x8e0] sm:$0xff]  ;;  %v458_v55 = vld [vmem:[%s13626_s3 + $0x888] sm:$0xff] }
 0x1a6   :  { %2931 = vmatpush2.bf16.msra.mxu0 %v8383_v60  ;;  %2891 = vmatprep.subr.bf16.mxu1 %v8358_v61  ;;  %v217_v60 = vld [vmem:[%s13626_s3 + $0x100] sm:$0xff] }
 0x1a7   :  { %2932 = vmatprep.subr.bf16.mxu0 %v8360_v62  ;;  %v229_v61 = vld [vmem:[%s13626_s3 + $0x160] sm:$0xff]  ;;  %v218_v62 = vld [vmem:[%s13626_s3 + $0x108] sm:$0xff] }
 0x1a8   :  { %v8194_v2 = vcombine.high %v217_v60, %v229_v61  ;;  %v8193_v8 = vcombine.low %v217_v60, %v229_v61  ;;  %v433_v61 = vld [vmem:[%s13626_s3 + $0x7c0] sm:$0xff] }
 0x1a9   :  { %2892 = vmatpush2.bf16.msra.mxu1 %v8357_v3  ;;  %v8196_v3 = vcombine.high %v218_v62, %v230_v63 }
 0x1aa   :  { %2933 = vmatpush2.bf16.msra.mxu0 %v8359_v4  ;;  %2943 = vmatprep.subr.bf16.mxu1 %v8338_v5  ;;  %v193_v4 = vld [vmem:[%s13626_s3 + $0x40] sm:$0xff] }
 0x1ab   :  { %2984 = vmatprep.subr.bf16.mxu0 %v8340_v6  ;;  %v205_v5 = vld [vmem:[%s13626_s3 + $0xa0] sm:$0xff]  ;;  %v194_v6 = vld [vmem:[%s13626_s3 + $0x48] sm:$0xff] }
 0x1ac   :  { %2894 = vmatmul.mubr.bf16.vlgmr.msra.gmra.mxu1 %v10541_v46  ;;  %v11140_v16 = vpop.f32.mrf.mxu1  ;;  %v11142_v17 = vpop.f32.mrf.mxu0  ;;  %v8170_v10 = vcombine.high %v193_v4, %v205_v5  ;;  %v8172_v11 = vcombine.high %v194_v6, %v206_v7  ;;  %v8171_v19 = vcombine.low %v194_v6, %v206_v7  ;;  %v421_v6 = vld [vmem:[%s13626_s3 + $0x760] sm:$0xff]  ;;  %v410_v7 = vld [vmem:[%s13626_s3 + $0x708] sm:$0xff] }
 0x1ad   :  { %2935 = vmatmul.mubr.bf16.vlgmr.msra.gmra.mxu0 %v10541_v46  ;;  %2944 = vmatpush1.bf16.msra.mxu1 %v8337_v9  ;;  %v8195_v9 = vcombine.low %v218_v62, %v230_v63  ;;  %v445_v62 = vld [vmem:[%s13626_s3 + $0x820] sm:$0xff]  ;;  %v434_v63 = vld [vmem:[%s13626_s3 + $0x7c8] sm:$0xff] }
 0x1ae   :  { %2975 = vmatprep.mubr.bf16.mxu1 %v10539_v45  ;;  %2985 = vmatpush1.bf16.msra.mxu0 %v8339_v12  ;;  %v11152_v22 = vpop.f32.mrf.mxu1  ;;  %v11154_v23 = vpop.f32.mrf.mxu0  ;;  %v553_v12 = vld [vmem:[%s13626_s3 + $0xb80] sm:$0xff] }
 0x1af   :  { %3016 = vmatprep.mubr.bf16.mxu0 %v10539_v45  ;;  %2945 = vmatprep.subr.bf16.mxu1 %v8314_v13  ;;  %v565_v13 = vld [vmem:[%s13626_s3 + $0xbe0] sm:$0xff] }
 0x1b0   :  { %2986 = vmatprep.subr.bf16.mxu0 %v8316_v18  ;;  %v2653_v32 = vpop.f32.mrf.mxu1  ;;  %v2694_v33 = vpop.f32.mrf.mxu0  ;;  %v8169_v18 = vcombine.low %v193_v4, %v205_v5  ;;  %v8530_v20 = vcombine.high %v553_v12, %v565_v13  ;;  %v8529_v31 = vcombine.low %v553_v12, %v565_v13  ;;  %v409_v5 = vld [vmem:[%s13626_s3 + $0x700] sm:$0xff] }
 0x1b1   :  { %2946 = vmatpush1.bf16.msra.mxu1 %v8313_v21  ;;  %v8532_v21 = vcombine.high %v554_v14, %v566_v15  ;;  %v8531_v32 = vcombine.low %v554_v14, %v566_v15  ;;  %v385_v13 = vld [vmem:[%s13626_s3 + $0x640] sm:$0xff]  ;;  %v386_v15 = vld [vmem:[%s13626_s3 + $0x648] sm:$0xff] }
 0x1b2   :  { %2987 = vmatpush1.bf16.msra.mxu0 %v8315_v24  ;;  %v2654_v37 = vpop.f32.mrf.mxu1  ;;  %v2695_v38 = vpop.f32.mrf.mxu0  ;;  %2947 = vmatprep.subr.bf16.mxu1 %v8290_v25  ;;  %v529_v24 = vld [vmem:[%s13626_s3 + $0xac0] sm:$0xff] }
 0x1b3   :  { %2988 = vmatprep.subr.bf16.mxu0 %v8292_v26  ;;  %v541_v25 = vld [vmem:[%s13626_s3 + $0xb20] sm:$0xff]  ;;  %v530_v26 = vld [vmem:[%s13626_s3 + $0xac8] sm:$0xff] }
 0x1b4   :  { %v8506_v33 = vcombine.high %v529_v24, %v541_v25  ;;  %v8508_v34 = vcombine.high %v530_v26, %v542_v28  ;;  %v506_v37 = vld [vmem:[%s13626_s3 + $0xa08] sm:$0xff]  ;;  %v397_v14 = vld [vmem:[%s13626_s3 + $0x6a0] sm:$0xff] }
 0x1b5   :  { %2948 = vmatpush1.bf16.msra.mxu1 %v8289_v36  ;;  %v517_v36 = vld [vmem:[%s13626_s3 + $0xa60] sm:$0xff]  ;;  %v518_v38 = vld [vmem:[%s13626_s3 + $0xa68] sm:$0xff] }
 0x1b6   :  { %2989 = vmatpush1.bf16.msra.mxu0 %v8291_v39  ;;  %2949 = vmatprep.subr.bf16.mxu1 %v8266_v40  ;;  %v8505_v39 = vcombine.low %v529_v24, %v541_v25  ;;  %v8507_v40 = vcombine.low %v530_v26, %v542_v28  ;;  %v8484_v42 = vcombine.high %v506_v37, %v518_v38  ;;  %v363_v25 = vld [vmem:[%s13626_s3 + $0x590] sm:$0xff]  ;;  %v364_v28 = vld [vmem:[%s13626_s3 + $0x598] sm:$0xff] }
 0x1b7   :  { %2990 = vmatprep.subr.bf16.mxu0 %v8268_v41  ;;  %v8482_v41 = vcombine.high %v505_v35, %v517_v36  ;;  %v375_v26 = vld [vmem:[%s13626_s3 + $0x5f0] sm:$0xff] }
 0x1b9   :  { %2950 = vmatpush1.bf16.msra.mxu1 %v8265_v48  ;;  %v494_v48 = vld [vmem:[%s13626_s3 + $0x9a8] sm:$0xff] }
 0x1ba   :  { %2991 = vmatpush1.bf16.msra.mxu0 %v8267_v49  ;;  %2951 = vmatprep.subr.bf16.mxu1 %v8242_v50  ;;  %v8481_v49 = vcombine.low %v505_v35, %v517_v36  ;;  %v8483_v50 = vcombine.low %v506_v37, %v518_v38  ;;  %v8460_v52 = vcombine.high %v482_v47, %v494_v48  ;;  %v339_v36 = vld [vmem:[%s13626_s3 + $0x4d0] sm:$0xff] }
 0x1bb   :  { %2992 = vmatprep.subr.bf16.mxu0 %v8244_v51  ;;  %v8458_v51 = vcombine.high %v481_v43, %v493_v44  ;;  %v351_v37 = vld [vmem:[%s13626_s3 + $0x530] sm:$0xff]  ;;  %v8341_v38 = vcombine.low %v363_v25, %v375_v26 }
 0x1bd   :  { %2952 = vmatpush1.bf16.msra.mxu1 %v8241_v56  ;;  %v470_v56 = vld [vmem:[%s13626_s3 + $0x8e8] sm:$0xff] }
 0x1be   :  { %2993 = vmatpush1.bf16.msra.mxu0 %v8243_v57  ;;  %2953 = vmatprep.subr.bf16.mxu1 %v8218_v58  ;;  %v8457_v57 = vcombine.low %v481_v43, %v493_v44  ;;  %v8459_v58 = vcombine.low %v482_v47, %v494_v48  ;;  %v8436_v60 = vcombine.high %v458_v55, %v470_v56  ;;  %v315_v43 = vld [vmem:[%s13626_s3 + $0x410] sm:$0xff] }
 0x1bf   :  { %2994 = vmatprep.subr.bf16.mxu0 %v8220_v59  ;;  %v8434_v59 = vcombine.high %v457_v53, %v469_v54  ;;  %v327_v44 = vld [vmem:[%s13626_s3 + $0x470] sm:$0xff] }
 0x1c1   :  { %2954 = vmatpush1.bf16.msra.mxu1 %v8217_v0  ;;  %v446_v0 = vld [vmem:[%s13626_s3 + $0x828] sm:$0xff] }
 0x1c2   :  { %2995 = vmatpush1.bf16.msra.mxu0 %v8219_v1  ;;  %2955 = vmatprep.subr.bf16.mxu1 %v8194_v2  ;;  %v8433_v1 = vcombine.low %v457_v53, %v469_v54  ;;  %v8435_v2 = vcombine.low %v458_v55, %v470_v56  ;;  %v8412_v4 = vcombine.high %v434_v63, %v446_v0 }
 0x1c3   :  { %2996 = vmatprep.subr.bf16.mxu0 %v8196_v3  ;;  %v8410_v3 = vcombine.high %v433_v61, %v445_v62  ;;  %v8294_v56 = vcombine.high %v315_v43, %v327_v44 }
 0x1c5   :  { %2956 = vmatpush1.bf16.msra.mxu1 %v8193_v8  ;;  %v422_v8 = vld [vmem:[%s13626_s3 + $0x768] sm:$0xff] }
 0x1c6   :  { %2997 = vmatpush1.bf16.msra.mxu0 %v8195_v9  ;;  %2957 = vmatprep.subr.bf16.mxu1 %v8170_v10  ;;  %v8409_v9 = vcombine.low %v433_v61, %v445_v62  ;;  %v8411_v10 = vcombine.low %v434_v63, %v446_v0  ;;  %v8388_v12 = vcombine.high %v410_v7, %v422_v8  ;;  %v292_v62 = vld [vmem:[%s13626_s3 + $0x358] sm:$0xff] }
 0x1c7   :  { %2998 = vmatprep.subr.bf16.mxu0 %v8172_v11  ;;  %v8386_v11 = vcombine.high %v409_v5, %v421_v6  ;;  %v8293_v63 = vcombine.low %v315_v43, %v327_v44  ;;  %v555_v44 = vld [vmem:[%s13626_s3 + $0xb90] sm:$0xff] }
 0x1c9   :  { %2958 = vmatpush1.bf16.msra.mxu1 %v8169_v18  ;;  %v398_v18 = vld [vmem:[%s13626_s3 + $0x6a8] sm:$0xff] }
 0x1ca   :  { %2999 = vmatpush1.bf16.msra.mxu0 %v8171_v19  ;;  %2959 = vmatprep.subr.bf16.mxu1 %v8530_v20  ;;  %v8385_v19 = vcombine.low %v409_v5, %v421_v6  ;;  %v8387_v20 = vcombine.low %v410_v7, %v422_v8  ;;  %v8364_v24 = vcombine.high %v386_v15, %v398_v18  ;;  %v267_v5 = vld [vmem:[%s13626_s3 + $0x290] sm:$0xff]  ;;  %v268_v7 = vld [vmem:[%s13626_s3 + $0x298] sm:$0xff] }
 0x1cb   :  { %3000 = vmatprep.subr.bf16.mxu0 %v8532_v21  ;;  %v8362_v21 = vcombine.high %v385_v13, %v397_v14  ;;  %v279_v6 = vld [vmem:[%s13626_s3 + $0x2f0] sm:$0xff]  ;;  %v280_v8 = vld [vmem:[%s13626_s3 + $0x2f8] sm:$0xff] }
 0x1cd   :  { %2960 = vmatpush2.bf16.msra.mxu1 %v8529_v31  ;;  %v376_v31 = vld [vmem:[%s13626_s3 + $0x5f8] sm:$0xff] }
 0x1ce   :  { %3001 = vmatpush2.bf16.msra.mxu0 %v8531_v32  ;;  %2961 = vmatprep.subr.bf16.mxu1 %v8506_v33  ;;  %v8361_v32 = vcombine.low %v385_v13, %v397_v14  ;;  %v8363_v33 = vcombine.low %v386_v15, %v398_v18  ;;  %v8344_v35 = vcombine.high %v364_v28, %v376_v31  ;;  %v243_v13 = vld [vmem:[%s13626_s3 + $0x1d0] sm:$0xff]  ;;  %v244_v15 = vld [vmem:[%s13626_s3 + $0x1d8] sm:$0xff] }
 0x1cf   :  { %3002 = vmatprep.subr.bf16.mxu0 %v8508_v34  ;;  %v8342_v34 = vcombine.high %v363_v25, %v375_v26  ;;  %v255_v14 = vld [vmem:[%s13626_s3 + $0x230] sm:$0xff]  ;;  %v256_v18 = vld [vmem:[%s13626_s3 + $0x238] sm:$0xff] }
 0x1d0   :  { %v219_v25 = vld [vmem:[%s13626_s3 + $0x110] sm:$0xff] }
 0x1d1   :  { %2962 = vmatpush2.bf16.msra.mxu1 %v8505_v39  ;;  %v340_v39 = vld [vmem:[%s13626_s3 + $0x4d8] sm:$0xff]  ;;  %v231_v26 = vld [vmem:[%s13626_s3 + $0x170] sm:$0xff] }
 0x1d2   :  { %3003 = vmatpush2.bf16.msra.mxu0 %v8507_v40  ;;  %2963 = vmatprep.subr.bf16.mxu1 %v8482_v41  ;;  %v352_v40 = vld [vmem:[%s13626_s3 + $0x538] sm:$0xff]  ;;  %v8343_v41 = vcombine.low %v364_v28, %v376_v31 }
 0x1d3   :  { %3004 = vmatprep.subr.bf16.mxu0 %v8484_v42  ;;  %v8318_v42 = vcombine.high %v339_v36, %v351_v37  ;;  %v8319_v55 = vcombine.low %v340_v39, %v352_v40  ;;  %v220_v28 = vld [vmem:[%s13626_s3 + $0x118] sm:$0xff] }
 0x1d4   :  { %v232_v31 = vld [vmem:[%s13626_s3 + $0x178] sm:$0xff] }
 0x1d5   :  { %2964 = vmatpush2.bf16.msra.mxu1 %v8481_v49  ;;  %v8320_v49 = vcombine.high %v340_v39, %v352_v40  ;;  %v208_v39 = vld [vmem:[%s13626_s3 + $0xb8] sm:$0xff]  ;;  %v8197_v40 = vcombine.low %v219_v25, %v231_v26 }
 0x1d6   :  { %3005 = vmatpush2.bf16.msra.mxu0 %v8483_v50  ;;  %2965 = vmatprep.subr.bf16.mxu1 %v8458_v51  ;;  %v316_v50 = vld [vmem:[%s13626_s3 + $0x418] sm:$0xff] }
 0x1d7   :  { %3006 = vmatprep.subr.bf16.mxu0 %v8460_v52  ;;  %v328_v51 = vld [vmem:[%s13626_s3 + $0x478] sm:$0xff]  ;;  %v8317_v52 = vcombine.low %v339_v36, %v351_v37  ;;  %v195_v36 = vld [vmem:[%s13626_s3 + $0x50] sm:$0xff] }
 0x1d8   :  { %v207_v37 = vld [vmem:[%s13626_s3 + $0xb0] sm:$0xff] }
 0x1d9   :  { %2966 = vmatpush2.bf16.msra.mxu1 %v8457_v57  ;;  %v8296_v57 = vcombine.high %v316_v50, %v328_v51 }
 0x1da   :  { %3007 = vmatpush2.bf16.msra.mxu0 %v8459_v58  ;;  %2967 = vmatprep.subr.bf16.mxu1 %v8434_v59  ;;  %v291_v58 = vld [vmem:[%s13626_s3 + $0x350] sm:$0xff] }
 0x1db   :  { %3008 = vmatprep.subr.bf16.mxu0 %v8436_v60  ;;  %v303_v59 = vld [vmem:[%s13626_s3 + $0x3b0] sm:$0xff] }
 0x1dd   :  { %2968 = vmatpush2.bf16.msra.mxu1 %v8433_v1 }
 0x1de   :  { %3009 = vmatpush2.bf16.msra.mxu0 %v8435_v2  ;;  %2969 = vmatprep.subr.bf16.mxu1 %v8410_v3  ;;  %v8295_v2 = vcombine.low %v316_v50, %v328_v51  ;;  %v8270_v3 = vcombine.high %v291_v58, %v303_v59  ;;  %v556_v50 = vld [vmem:[%s13626_s3 + $0xb98] sm:$0xff] }
 0x1df   :  { %3010 = vmatprep.subr.bf16.mxu0 %v8412_v4  ;;  %v568_v51 = vld [vmem:[%s13626_s3 + $0xbf8] sm:$0xff] }
 0x1e1   :  { %2970 = vmatpush2.bf16.msra.mxu1 %v8409_v9  ;;  %v8269_v9 = vcombine.low %v291_v58, %v303_v59  ;;  %v531_v58 = vld [vmem:[%s13626_s3 + $0xad0] sm:$0xff] }
 0x1e2   :  { %3011 = vmatpush2.bf16.msra.mxu0 %v8411_v10  ;;  %2971 = vmatprep.subr.bf16.mxu1 %v8386_v11  ;;  %v8246_v11 = vcombine.high %v267_v5, %v279_v6  ;;  %v543_v59 = vld [vmem:[%s13626_s3 + $0xb30] sm:$0xff] }
 0x1e3   :  { %3012 = vmatprep.subr.bf16.mxu0 %v8388_v12  ;;  %v8248_v12 = vcombine.high %v268_v7, %v280_v8 }
 0x1e5   :  { %2972 = vmatpush2.bf16.msra.mxu1 %v8385_v19  ;;  %v8245_v19 = vcombine.low %v267_v5, %v279_v6  ;;  %v8509_v5 = vcombine.low %v531_v58, %v543_v59 }
 0x1e6   :  { %3013 = vmatpush2.bf16.msra.mxu0 %v8387_v20  ;;  %2973 = vmatprep.subr.bf16.mxu1 %v8362_v21  ;;  %v8247_v20 = vcombine.low %v268_v7, %v280_v8  ;;  %v8222_v21 = vcombine.high %v243_v13, %v255_v14 }
 0x1e7   :  { %3014 = vmatprep.subr.bf16.mxu0 %v8364_v24  ;;  %v8224_v24 = vcombine.high %v244_v15, %v256_v18 }
 0x1e9   :  { %2974 = vmatpush2.bf16.msra.mxu1 %v8361_v32  ;;  %v8221_v32 = vcombine.low %v243_v13, %v255_v14 }
 0x1ea   :  { %3015 = vmatpush2.bf16.msra.mxu0 %v8363_v33  ;;  %3025 = vmatprep.subr.bf16.mxu1 %v8342_v34  ;;  %v8223_v33 = vcombine.low %v244_v15, %v256_v18  ;;  %v8198_v34 = vcombine.high %v219_v25, %v231_v26 }
 0x1eb   :  { %3066 = vmatprep.subr.bf16.mxu0 %v8344_v35  ;;  %v8200_v35 = vcombine.high %v220_v28, %v232_v31 }
 0x1ec   :  { %v11343_v47 = vpop.f32.mrf.mxu1  ;;  %v11345_v48 = vpop.f32.mrf.mxu0  ;;  %2976 = vmatmul.mubr.bf16.vlgmr.msra.gmra.mxu1 %v10541_v46 }
 0x1ed   :  { %3017 = vmatmul.mubr.bf16.vlgmr.msra.gmra.mxu0 %v10541_v46  ;;  %3026 = vmatpush1.bf16.msra.mxu1 %v8341_v38  ;;  %v196_v38 = vld [vmem:[%s13626_s3 + $0x58] sm:$0xff] }
 0x1ee   :  { %3057 = vmatprep.mubr.bf16.mxu1 %v10539_v45  ;;  %3067 = vmatpush1.bf16.msra.mxu0 %v8343_v41  ;;  %v11356_v53 = vpop.f32.mrf.mxu1  ;;  %v11358_v54 = vpop.f32.mrf.mxu0  ;;  %v8199_v41 = vcombine.low %v220_v28, %v232_v31  ;;  %v8176_v43 = vcombine.high %v196_v38, %v208_v39 }
 0x1ef   :  { %3098 = vmatprep.mubr.bf16.mxu0 %v10539_v45  ;;  %3027 = vmatprep.subr.bf16.mxu1 %v8318_v42  ;;  %v304_v45 = vld [vmem:[%s13626_s3 + $0x3b8] sm:$0xff]  ;;  %v8174_v42 = vcombine.high %v195_v36, %v207_v37 }
 0x1f0   :  { %v2735_v60 = vpop.f32.mrf.mxu1  ;;  %v2776_v61 = vpop.f32.mrf.mxu0  ;;  %3068 = vmatprep.subr.bf16.mxu0 %v8320_v49  ;;  %v8272_v4 = vcombine.high %v292_v62, %v304_v45  ;;  %v8271_v10 = vcombine.low %v292_v62, %v304_v45  ;;  %v567_v49 = vld [vmem:[%s13626_s3 + $0xbf0] sm:$0xff]  ;;  %v8535_v45 = vcombine.low %v556_v50, %v568_v51 }
 0x1f1   :  { %3028 = vmatpush1.bf16.msra.mxu1 %v8317_v52  ;;  %v8173_v52 = vcombine.low %v195_v36, %v207_v37  ;;  %v532_v60 = vld [vmem:[%s13626_s3 + $0xad8] sm:$0xff]  ;;  %v8533_v62 = vcombine.low %v555_v44, %v567_v49 }
 0x1f2   :  { %3069 = vmatpush1.bf16.msra.mxu0 %v8319_v55  ;;  %v2736_v0 = vpop.f32.mrf.mxu1  ;;  %v2777_v1 = vpop.f32.mrf.mxu0  ;;  %3029 = vmatprep.subr.bf16.mxu1 %v8294_v56  ;;  %v8175_v55 = vcombine.low %v196_v38, %v208_v39  ;;  %v8534_v56 = vcombine.high %v555_v44, %v567_v49  ;;  %v544_v61 = vld [vmem:[%s13626_s3 + $0xb38] sm:$0xff]  ;;  %v11506_v44 = vsub.s32 3, %v10514_v27 }
 0x1f3   :  { %3070 = vmatprep.subr.bf16.mxu0 %v8296_v57  ;;  %v8536_v57 = vcombine.high %v556_v50, %v568_v51  ;;  %v8512_v0 = vcombine.high %v532_v60, %v544_v61  ;;  %v507_v1 = vld [vmem:[%s13626_s3 + $0xa10] sm:$0xff]  ;;  %v8511_v6 = vcombine.low %v532_v60, %v544_v61  ;;  %v400_v60 = vld [vmem:[%s13626_s3 + $0x6b8] sm:$0xff] }
 0x1f5   :  { %3030 = vmatpush1.bf16.msra.mxu1 %v8293_v63  ;;  %v8510_v63 = vcombine.high %v531_v58, %v543_v59  ;;  %v388_v59 = vld [vmem:[%s13626_s3 + $0x658] sm:$0xff] }
 0x1f6   :  { %3071 = vmatpush1.bf16.msra.mxu0 %v8295_v2  ;;  %3031 = vmatprep.subr.bf16.mxu1 %v8270_v3  ;;  %v519_v2 = vld [vmem:[%s13626_s3 + $0xa70] sm:$0xff]  ;;  %v508_v3 = vld [vmem:[%s13626_s3 + $0xa18] sm:$0xff] }
 0x1f7   :  { %3072 = vmatprep.subr.bf16.mxu0 %v8272_v4  ;;  %v520_v4 = vld [vmem:[%s13626_s3 + $0xa78] sm:$0xff]  ;;  %v8486_v7 = vcombine.high %v507_v1, %v519_v2  ;;  %v8485_v13 = vcombine.low %v507_v1, %v519_v2 }
 0x1f8   :  { %v8488_v8 = vcombine.high %v508_v3, %v520_v4  ;;  %v8487_v14 = vcombine.low %v508_v3, %v520_v4  ;;  %v8367_v4 = vcombine.low %v388_v59, %v400_v60 }
 0x1f9   :  { %3032 = vmatpush1.bf16.msra.mxu1 %v8269_v9  ;;  %v483_v9 = vld [vmem:[%s13626_s3 + $0x950] sm:$0xff] }
 0x1fa   :  { %3073 = vmatpush1.bf16.msra.mxu0 %v8271_v10  ;;  %3033 = vmatprep.subr.bf16.mxu1 %v8246_v11  ;;  %v495_v10 = vld [vmem:[%s13626_s3 + $0x9b0] sm:$0xff]  ;;  %v484_v11 = vld [vmem:[%s13626_s3 + $0x958] sm:$0xff] }
 0x1fb   :  { %3074 = vmatprep.subr.bf16.mxu0 %v8248_v12  ;;  %v496_v12 = vld [vmem:[%s13626_s3 + $0x9b8] sm:$0xff]  ;;  %v8462_v15 = vcombine.high %v483_v9, %v495_v10  ;;  %v8461_v25 = vcombine.low %v483_v9, %v495_v10  ;;  %v9417_v9 = vld [vmem:[%s13628_s5 + $0x94] ss:$12 sps:$4 sm:$0xff]  }
 0x1fc   :  { %v8464_v18 = vcombine.high %v484_v11, %v496_v12  ;;  %v8463_v26 = vcombine.low %v484_v11, %v496_v12  ;;  %v9420_v12 = vld [vmem:[%s13628_s5 + $0x214] ss:$12 sps:$4 sm:$0xff]  }
 0x1fd   :  { %3034 = vmatpush1.bf16.msra.mxu1 %v8245_v19  ;;  %v459_v19 = vld [vmem:[%s13626_s3 + $0x890] sm:$0xff] }
 0x1fe   :  { %3075 = vmatpush1.bf16.msra.mxu0 %v8247_v20  ;;  %3035 = vmatprep.subr.bf16.mxu1 %v8222_v21  ;;  %v471_v20 = vld [vmem:[%s13626_s3 + $0x8f0] sm:$0xff]  ;;  %v460_v21 = vld [vmem:[%s13626_s3 + $0x898] sm:$0xff] }
 0x1ff   :  { %3076 = vmatprep.subr.bf16.mxu0 %v8224_v24  ;;  %v472_v24 = vld [vmem:[%s13626_s3 + $0x8f8] sm:$0xff]  ;;  %v8438_v28 = vcombine.high %v459_v19, %v471_v20  ;;  %v8437_v36 = vcombine.low %v459_v19, %v471_v20 }
 0x200   :  { %v8440_v31 = vcombine.high %v460_v21, %v472_v24  ;;  %v8439_v37 = vcombine.low %v460_v21, %v472_v24  ;;  %v9418_v19 = vld [vmem:[%s13628_s5 + $0x210] ss:$12 sps:$4 sm:$0xff]  }
 0x201   :  { %3036 = vmatpush1.bf16.msra.mxu1 %v8221_v32  ;;  %v435_v32 = vld [vmem:[%s13626_s3 + $0x7d0] sm:$0xff]  ;;  %v9423_v20 = vld [vmem:[%s13628_s5 + $0x7c] ss:$12 sps:$4 sm:$0xff]  }
 0x202   :  { %3077 = vmatpush1.bf16.msra.mxu0 %v8223_v33  ;;  %3037 = vmatprep.subr.bf16.mxu1 %v8198_v34  ;;  %v447_v33 = vld [vmem:[%s13626_s3 + $0x830] sm:$0xff]  ;;  %v436_v34 = vld [vmem:[%s13626_s3 + $0x7d8] sm:$0xff] }
 0x203   :  { %3078 = vmatprep.subr.bf16.mxu0 %v8200_v35  ;;  %v448_v35 = vld [vmem:[%s13626_s3 + $0x838] sm:$0xff]  ;;  %v8414_v38 = vcombine.high %v435_v32, %v447_v33  ;;  %v8413_v49 = vcombine.low %v435_v32, %v447_v33  ;;  %v9429_v32 = vld [vmem:[%s13628_s5 + $0x64] ss:$12 sps:$4 sm:$0xff]  }
 0x204   :  { %v8416_v39 = vcombine.high %v436_v34, %v448_v35  ;;  %v8415_v50 = vcombine.low %v436_v34, %v448_v35  ;;  %v9426_v21 = vld [vmem:[%s13628_s5 + $0x1fc] ss:$12 sps:$4 sm:$0xff]   ;;  %v9432_v34 = vld [vmem:[%s13628_s5 + $0x1e4] ss:$12 sps:$4 sm:$0xff]   ;;  %v9427_v35 = vld [vmem:[%s13628_s5 + $0x60] ss:$12 sps:$4 sm:$0xff]  }
 0x205   :  { %3038 = vmatpush1.bf16.msra.mxu1 %v8197_v40  ;;  %v411_v40 = vld [vmem:[%s13626_s3 + $0x710] sm:$0xff] }
 0x206   :  { %3079 = vmatpush1.bf16.msra.mxu0 %v8199_v41  ;;  %3039 = vmatprep.subr.bf16.mxu1 %v8174_v42  ;;  %v423_v41 = vld [vmem:[%s13626_s3 + $0x770] sm:$0xff]  ;;  %v412_v42 = vld [vmem:[%s13626_s3 + $0x718] sm:$0xff] }
 0x207   :  { %3080 = vmatprep.subr.bf16.mxu0 %v8176_v43  ;;  %v424_v43 = vld [vmem:[%s13626_s3 + $0x778] sm:$0xff]  ;;  %v8390_v51 = vcombine.high %v411_v40, %v423_v41 }
 0x209   :  { %3040 = vmatpush1.bf16.msra.mxu1 %v8173_v52  ;;  %v11511_v52 = vld [vmem:[%s13627_s4] sm:$0xff] }
 0x20a   :  { %3081 = vmatpush1.bf16.msra.mxu0 %v8175_v55  ;;  %3041 = vmatprep.subr.bf16.mxu1 %v8534_v56  ;;  %v8392_v55 = vcombine.high %v412_v42, %v424_v43  ;;  %v387_v56 = vld [vmem:[%s13626_s3 + $0x650] sm:$0xff]  ;;  %v582_v58 = vrot.slane %v11511_v52, %v10523_v30  ;;  %v590_v61 = vrot.slane %v11511_v52, %v11506_v44 }
 0x20b   :  { %3082 = vmatprep.subr.bf16.mxu0 %v8536_v57  ;;  %v399_v57 = vld [vmem:[%s13626_s3 + $0x6b0] sm:$0xff] }
 0x20c   :  { %v2652_v1 = vadd.f32 %v11152_v22, %v582_v58  ;;  %v2693_v2 = vadd.f32 %v11154_v23, %v590_v61  ;;  %v8365_v3 = vcombine.low %v387_v56, %v399_v57  ;;  %v9409_v22 = vld [vmem:[%s13628_s5 + $0xa8] ss:$12 sps:$4 sm:$0xff]   ;;  %v9456_v58 = vld [vmem:[%s13628_s5 + $0x184] ss:$12 sps:$4 sm:$0xff]   ;;  %v9459_v61 = vld [vmem:[%s13628_s5 + $0x16c] ss:$12 sps:$4 sm:$0xff]  }
 0x20d   :  { %3042 = vmatpush2.bf16.msra.mxu1 %v8533_v62  ;;  %v8389_v62 = vcombine.low %v411_v40, %v423_v41  ;;  %v9412_v23 = vld [vmem:[%s13628_s5 + $0x228] ss:$12 sps:$4 sm:$0xff]  }
 0x20e   :  { %3083 = vmatpush2.bf16.msra.mxu0 %v8535_v45  ;;  %3043 = vmatprep.subr.bf16.mxu1 %v8510_v63  ;;  %v8391_v45 = vcombine.low %v412_v42, %v424_v43  ;;  %v8366_v63 = vcombine.high %v387_v56, %v399_v57  ;;  %v9436_v40 = vld [vmem:[%s13628_s5 + $0x1c8] ss:$12 sps:$4 sm:$0xff]   ;;  %v9439_v43 = vld [vmem:[%s13628_s5 + $0x30] ss:$12 sps:$4 sm:$0xff]   ;;  %v9448_v56 = vld [vmem:[%s13628_s5 + $0x198] ss:$12 sps:$4 sm:$0xff]  }
 0x20f   :  { %3084 = vmatprep.subr.bf16.mxu0 %v8512_v0  ;;  %v8368_v0 = vcombine.high %v388_v59, %v400_v60  ;;  %v9441_v41 = vld [vmem:[%s13628_s5 + $0x34] ss:$12 sps:$4 sm:$0xff]   ;;  %v9453_v57 = vld [vmem:[%s13628_s5 + $0x4] ss:$12 sps:$4 sm:$0xff]  }
 0x210   :  { %v9444_v42 = vld [vmem:[%s13628_s5 + $0x1b4] ss:$12 sps:$4 sm:$0xff]  }
 0x211   :  { %3044 = vmatpush2.bf16.msra.mxu1 %v8509_v5  ;;  %v9411_v5 = vld [vmem:[%s13628_s5 + $0xac] ss:$12 sps:$4 sm:$0xff]  }
 0x212   :  { %3085 = vmatpush2.bf16.msra.mxu0 %v8511_v6  ;;  %3045 = vmatprep.subr.bf16.mxu1 %v8486_v7  ;;  %v9414_v6 = vld [vmem:[%s13628_s5 + $0x22c] ss:$12 sps:$4 sm:$0xff]   ;;  %v3108_v7 = vmax.f32 %v2652_v1, 0.0  ;;  %v9468_v1 = vld [vmem:[%s13628_s5 + $0x2d4] ss:$12 sps:$4 sm:$0xff]  }
 0x213   :  { %3086 = vmatprep.subr.bf16.mxu0 %v8488_v8  ;;  %v3110_v8 = vmax.f32 %v2693_v2, 0.0  ;;  %v9451_v59 = vld [vmem:[%s13628_s5] ss:$12 sps:$4 sm:$0xff]   ;;  %v9463_v2 = vld [vmem:[%s13628_s5 + $0x150] ss:$12 sps:$4 sm:$0xff]  }
 0x214   :  { %v11546_v10 = vpack.c.bf16 %v3108_v7, %v3108_v7  ;;  %v9454_v60 = vld [vmem:[%s13628_s5 + $0x180] ss:$12 sps:$4 sm:$0xff]   ;;  %v9472_v7 = vld [vmem:[%s13628_s5 + $0x2b8] ss:$12 sps:$4 sm:$0xff]  }
 0x215   :  { %3046 = vmatpush2.bf16.msra.mxu1 %v8485_v13  ;;  %v11554_v13 = vpack.c.bf16 %v3110_v8, %v3110_v8  ;;  %v9477_v8 = vld [vmem:[%s13628_s5 + $0x124] ss:$12 sps:$4 sm:$0xff]  }
 0x216   :  { %3087 = vmatpush2.bf16.msra.mxu0 %v8487_v14  ;;  %3047 = vmatprep.subr.bf16.mxu1 %v8462_v15  ;;  %v9415_v15 = vld [vmem:[%s13628_s5 + $0x90] ss:$12 sps:$4 sm:$0xff]  }
 0x217   :  { %3088 = vmatprep.subr.bf16.mxu0 %v8464_v18 }
 0x219   :  { %3048 = vmatpush2.bf16.msra.mxu1 %v8461_v25 }
 0x21a   :  { %3089 = vmatpush2.bf16.msra.mxu0 %v8463_v26  ;;  %3049 = vmatprep.subr.bf16.mxu1 %v8438_v28  ;;  %v9421_v26 = vld [vmem:[%s13628_s5 + $0x78] ss:$12 sps:$4 sm:$0xff]  }
 0x21b   :  { %3090 = vmatprep.subr.bf16.mxu0 %v8440_v31  ;;  %v9424_v31 = vld [vmem:[%s13628_s5 + $0x1f8] ss:$12 sps:$4 sm:$0xff]  }
 0x21d   :  { %3050 = vmatpush2.bf16.msra.mxu1 %v8437_v36  ;;  %v9430_v36 = vld [vmem:[%s13628_s5 + $0x1e0] ss:$12 sps:$4 sm:$0xff]  }
 0x21e   :  { %3091 = vmatpush2.bf16.msra.mxu0 %v8439_v37  ;;  %3051 = vmatprep.subr.bf16.mxu1 %v8414_v38  ;;  %v9435_v37 = vld [vmem:[%s13628_s5 + $0x4c] ss:$12 sps:$4 sm:$0xff]  }
 0x21f   :  { %3092 = vmatprep.subr.bf16.mxu0 %v8416_v39  ;;  %v9438_v38 = vld [vmem:[%s13628_s5 + $0x1cc] ss:$12 sps:$4 sm:$0xff]   ;;  %v9433_v39 = vld [vmem:[%s13628_s5 + $0x48] ss:$12 sps:$4 sm:$0xff]  }
 0x221   :  { %3052 = vmatpush2.bf16.msra.mxu1 %v8413_v49  ;;  %v9442_v49 = vld [vmem:[%s13628_s5 + $0x1b0] ss:$12 sps:$4 sm:$0xff]  }
 0x222   :  { %3093 = vmatpush2.bf16.msra.mxu0 %v8415_v50  ;;  %3053 = vmatprep.subr.bf16.mxu1 %v8390_v51  ;;  %v9447_v50 = vld [vmem:[%s13628_s5 + $0x1c] ss:$12 sps:$4 sm:$0xff]  }
 0x223   :  { %3094 = vmatprep.subr.bf16.mxu0 %v8392_v55  ;;  %v9450_v51 = vld [vmem:[%s13628_s5 + $0x19c] ss:$12 sps:$4 sm:$0xff]   ;;  %v9445_v55 = vld [vmem:[%s13628_s5 + $0x18] ss:$12 sps:$4 sm:$0xff]  }
 0x225   :  { %3054 = vmatpush2.bf16.msra.mxu1 %v8389_v62  ;;  %v9462_v62 = vld [vmem:[%s13628_s5 + $0x2ec] ss:$12 sps:$4 sm:$0xff]  }
 0x226   :  { %3095 = vmatpush2.bf16.msra.mxu0 %v8391_v45  ;;  %3055 = vmatprep.subr.bf16.mxu1 %v8366_v63  ;;  %v9457_v45 = vld [vmem:[%s13628_s5 + $0x168] ss:$12 sps:$4 sm:$0xff]  }
 0x227   :  { %3096 = vmatprep.subr.bf16.mxu0 %v8368_v0  ;;  %v9460_v63 = vld [vmem:[%s13628_s5 + $0x2e8] ss:$12 sps:$4 sm:$0xff]  }
 0x228   :  { %v9465_v0 = vld [vmem:[%s13628_s5 + $0x154] ss:$12 sps:$4 sm:$0xff]  }
 0x229   :  { %3056 = vmatpush2.bf16.msra.mxu1 %v8365_v3  ;;  %v9466_v3 = vld [vmem:[%s13628_s5 + $0x2d0] ss:$12 sps:$4 sm:$0xff]  }
 0x22a   :  { %3097 = vmatpush2.bf16.msra.mxu0 %v8367_v4  ;;  %6995 = vmatprep.subr.bf16.mxu1 %v9411_v5  ;;  %v9471_v4 = vld [vmem:[%s13628_s5 + $0x13c] ss:$12 sps:$4 sm:$0xff]  }
 0x22b   :  { %7036 = vmatprep.subr.bf16.mxu0 %v9414_v6  ;;  %v9474_v5 = vld [vmem:[%s13628_s5 + $0x2bc] ss:$12 sps:$4 sm:$0xff]   ;;  %v9469_v6 = vld [vmem:[%s13628_s5 + $0x138] ss:$12 sps:$4 sm:$0xff]  }
 0x22c   :  { %v11548_v11 = vpop.f32.mrf.mxu1  ;;  %3058 = vmatmul.mubr.bf16.vlgmr.msra.gmra.mxu1 %v10541_v46 }
 0x22d   :  { %v11556_v14 = vpop.f32.mrf.mxu0  ;;  %3099 = vmatmul.mubr.bf16.vlgmr.msra.gmra.mxu0 %v10541_v46  ;;  %6996 = vmatpush1.bf16.msra.mxu1 %v9409_v22  ;;  %v9480_v22 = vld [vmem:[%s13628_s5 + $0x2a4] ss:$12 sps:$4 sm:$0xff]  }
 0x22e   :  { %7027 = vmatprep.mubr.bf16.mxu1 %v11546_v10  ;;  %7037 = vmatpush1.bf16.msra.mxu0 %v9412_v23  ;;  %v11563_v18 = vpop.f32.mrf.mxu1  ;;  %v9475_v23 = vld [vmem:[%s13628_s5 + $0x120] ss:$12 sps:$4 sm:$0xff]  }
 0x22f   :  { %7068 = vmatprep.mubr.bf16.mxu0 %v11554_v13  ;;  %v11572_v46 = vpop.f32.mrf.mxu0  ;;  %6997 = vmatprep.subr.bf16.mxu1 %v9417_v9  ;;  %v9478_v9 = vld [vmem:[%s13628_s5 + $0x2a0] ss:$12 sps:$4 sm:$0xff]  }
 0x230   :  { %v2817_v24 = vpop.f32.mrf.mxu1  ;;  %7038 = vmatprep.subr.bf16.mxu0 %v9420_v12  ;;  %v9483_v12 = vld [vmem:[%s13628_s5 + $0x10c] ss:$12 sps:$4 sm:$0xff]  }
 0x231   :  { %v2858_v25 = vpop.f32.mrf.mxu0  ;;  %6998 = vmatpush1.bf16.msra.mxu1 %v9415_v15  ;;  %v9486_v15 = vld [vmem:[%s13628_s5 + $0x28c] ss:$12 sps:$4 sm:$0xff]   ;;  %v11707_v24 = vsub.s32 2, %v10514_v27 }
 0x232   :  { %7039 = vmatpush1.bf16.msra.mxu0 %v9418_v19  ;;  %v2818_v28 = vpop.f32.mrf.mxu1  ;;  %6999 = vmatprep.subr.bf16.mxu1 %v9423_v20  ;;  %v9481_v19 = vld [vmem:[%s13628_s5 + $0x108] ss:$12 sps:$4 sm:$0xff]  }
 0x233   :  { %v2859_v33 = vpop.f32.mrf.mxu0  ;;  %7040 = vmatprep.subr.bf16.mxu0 %v9426_v21  ;;  %v9484_v20 = vld [vmem:[%s13628_s5 + $0x288] ss:$12 sps:$4 sm:$0xff]   ;;  %v11716_v28 = vsub.s32 7, %v10514_v27 }
 0x234   :  { %v9489_v21 = vld [vmem:[%s13628_s5 + $0xf4] ss:$12 sps:$4 sm:$0xff]   ;;  %v9490_v33 = vld [vmem:[%s13628_s5 + $0x270] ss:$12 sps:$4 sm:$0xff]  }
 0x235   :  { %7000 = vmatpush1.bf16.msra.mxu1 %v9421_v26  ;;  %v9492_v25 = vld [vmem:[%s13628_s5 + $0x274] ss:$12 sps:$4 sm:$0xff]   ;;  %v11713_v26 = vsub.s32 5, %v10514_v27 }
 0x236   :  { %7041 = vmatpush1.bf16.msra.mxu0 %v9424_v31  ;;  %7001 = vmatprep.subr.bf16.mxu1 %v9429_v32  ;;  %v9487_v31 = vld [vmem:[%s13628_s5 + $0xf0] ss:$12 sps:$4 sm:$0xff]   ;;  %v578_v32 = vrot.slane %v11511_v52, %v10520_v29 }
 0x237   :  { %7042 = vmatprep.subr.bf16.mxu0 %v9432_v34  ;;  %v9495_v34 = vld [vmem:[%s13628_s5 + $0xdc] ss:$12 sps:$4 sm:$0xff]  }
 0x239   :  { %7002 = vmatpush1.bf16.msra.mxu1 %v9427_v35  ;;  %v586_v35 = vrot.slane %v11511_v52, %v11707_v24 }
 0x23a   :  { %7043 = vmatpush1.bf16.msra.mxu0 %v9430_v36  ;;  %7003 = vmatprep.subr.bf16.mxu1 %v9435_v37  ;;  %v9498_v36 = vld [vmem:[%s13628_s5 + $0x25c] ss:$12 sps:$4 sm:$0xff]   ;;  %v598_v37 = vrot.slane %v11511_v52, %v11713_v26 }
 0x23b   :  { %7044 = vmatprep.subr.bf16.mxu0 %v9438_v38  ;;  %v606_v38 = vrot.slane %v11511_v52, %v11716_v28 }
 0x23d   :  { %7004 = vmatpush1.bf16.msra.mxu1 %v9433_v39  ;;  %v9493_v39 = vld [vmem:[%s13628_s5 + $0xd8] ss:$12 sps:$4 sm:$0xff]  }
 0x23e   :  { %7045 = vmatpush1.bf16.msra.mxu0 %v9436_v40  ;;  %7005 = vmatprep.subr.bf16.mxu1 %v9441_v41  ;;  %v2650_v40 = vadd.f32 %v11140_v16, %v578_v32  ;;  %v9496_v41 = vld [vmem:[%s13628_s5 + $0x258] ss:$12 sps:$4 sm:$0xff]   ;;  %v2775_v16 = vadd.f32 %v11358_v54, %v606_v38  ;;  %v9526_v32 = vld [vmem:[%s13628_s5 + $0x4e0] ss:$12 sps:$4 sm:$0xff]  }
 0x23f   :  { %7046 = vmatprep.subr.bf16.mxu0 %v9444_v42  ;;  %v9501_v42 = vld [vmem:[%s13628_s5 + $0xc4] ss:$12 sps:$4 sm:$0xff]   ;;  %v9540_v38 = vld [vmem:[%s13628_s5 + $0x4b4] ss:$12 sps:$4 sm:$0xff]  }
 0x241   :  { %7006 = vmatpush1.bf16.msra.mxu1 %v9439_v43  ;;  %v2691_v43 = vadd.f32 %v11142_v17, %v586_v35  ;;  %v9502_v17 = vld [vmem:[%s13628_s5 + $0x240] ss:$12 sps:$4 sm:$0xff]   ;;  %v9529_v35 = vld [vmem:[%s13628_s5 + $0x348] ss:$12 sps:$4 sm:$0xff]  }
 0x242   :  { %7047 = vmatpush1.bf16.msra.mxu0 %v9442_v49  ;;  %7007 = vmatprep.subr.bf16.mxu1 %v9447_v50  ;;  %v9504_v49 = vld [vmem:[%s13628_s5 + $0x244] ss:$12 sps:$4 sm:$0xff]   ;;  %v2734_v50 = vadd.f32 %v11356_v53, %v598_v37  ;;  %v9510_v53 = vld [vmem:[%s13628_s5 + $0x52c] ss:$12 sps:$4 sm:$0xff]   ;;  %v9537_v37 = vld [vmem:[%s13628_s5 + $0x334] ss:$12 sps:$4 sm:$0xff]  }
 0x243   :  { %7048 = vmatprep.subr.bf16.mxu0 %v9450_v51  ;;  %v9499_v51 = vld [vmem:[%s13628_s5 + $0xc0] ss:$12 sps:$4 sm:$0xff]  }
 0x244   :  { %v3112_v54 = vmax.f32 %v2734_v50, 0.0  ;;  %v9549_v50 = vld [vmem:[%s13628_s5 + $0x304] ss:$12 sps:$4 sm:$0xff]  }
 0x245   :  { %7008 = vmatpush1.bf16.msra.mxu1 %v9445_v55  ;;  %v3107_v55 = vmax.f32 %v2650_v40, 0.0  ;;  %v9538_v40 = vld [vmem:[%s13628_s5 + $0x4b0] ss:$12 sps:$4 sm:$0xff]  }
 0x246   :  { %7049 = vmatpush1.bf16.msra.mxu0 %v9448_v56  ;;  %7009 = vmatprep.subr.bf16.mxu1 %v9453_v57  ;;  %v9507_v56 = vld [vmem:[%s13628_s5 + $0x3ac] ss:$12 sps:$4 sm:$0xff]   ;;  %v3109_v57 = vmax.f32 %v2691_v43, 0.0 }
 0x247   :  { %7050 = vmatprep.subr.bf16.mxu0 %v9456_v58  ;;  %v3114_v58 = vmax.f32 %v2775_v16, 0.0  ;;  %v9541_v43 = vld [vmem:[%s13628_s5 + $0x318] ss:$12 sps:$4 sm:$0xff]  }
 0x248   :  { %v9552_v16 = vld [vmem:[%s13628_s5 + $0x484] ss:$12 sps:$4 sm:$0xff]  }
 0x249   :  { %7010 = vmatpush1.bf16.msra.mxu1 %v9451_v59  ;;  %v9505_v59 = vld [vmem:[%s13628_s5 + $0x3a8] ss:$12 sps:$4 sm:$0xff]  }
 0x24a   :  { %7051 = vmatpush1.bf16.msra.mxu0 %v9454_v60  ;;  %7011 = vmatprep.subr.bf16.mxu1 %v9459_v61  ;;  %v11769_v60 = vpack.c.bf16 %v3107_v55, %v3107_v55  ;;  %v9508_v61 = vld [vmem:[%s13628_s5 + $0x528] ss:$12 sps:$4 sm:$0xff]   ;;  %v9550_v55 = vld [vmem:[%s13628_s5 + $0x480] ss:$12 sps:$4 sm:$0xff]  }
 0x24b   :  { %7052 = vmatprep.subr.bf16.mxu0 %v9462_v62  ;;  %v11774_v62 = vpack.c.bf16 %v3109_v57, %v3109_v57  ;;  %v9553_v57 = vld [vmem:[%s13628_s5 + $0x468] ss:$12 sps:$4 sm:$0xff]  }
 0x24d   :  { %7012 = vmatpush2.bf16.msra.mxu1 %v9457_v45  ;;  %v9513_v45 = vld [vmem:[%s13628_s5 + $0x394] ss:$12 sps:$4 sm:$0xff]  }
 0x24e   :  { %7053 = vmatpush2.bf16.msra.mxu0 %v9460_v63  ;;  %7013 = vmatprep.subr.bf16.mxu1 %v9465_v0  ;;  %v11779_v63 = vpack.c.bf16 %v3112_v54, %v3112_v54  ;;  %v9561_v54 = vld [vmem:[%s13628_s5 + $0x454] ss:$12 sps:$4 sm:$0xff]  }
 0x24f   :  { %7054 = vmatprep.subr.bf16.mxu0 %v9468_v1  ;;  %v9516_v1 = vld [vmem:[%s13628_s5 + $0x514] ss:$12 sps:$4 sm:$0xff]  }
 0x251   :  { %7014 = vmatpush2.bf16.msra.mxu1 %v9463_v2  ;;  %v11787_v2 = vpack.c.bf16 %v3114_v58, %v3114_v58  ;;  %v9564_v58 = vld [vmem:[%s13628_s5 + $0x5d4] ss:$12 sps:$4 sm:$0xff]  }
 0x252   :  { %7055 = vmatpush2.bf16.msra.mxu0 %v9466_v3  ;;  %7015 = vmatprep.subr.bf16.mxu1 %v9471_v4  ;;  %v9511_v4 = vld [vmem:[%s13628_s5 + $0x390] ss:$12 sps:$4 sm:$0xff]  }
 0x253   :  { %7056 = vmatprep.subr.bf16.mxu0 %v9474_v5 }
 0x255   :  { %7016 = vmatpush2.bf16.msra.mxu1 %v9469_v6  ;;  %v9514_v6 = vld [vmem:[%s13628_s5 + $0x510] ss:$12 sps:$4 sm:$0xff]  }
 0x256   :  { %7057 = vmatpush2.bf16.msra.mxu0 %v9472_v7  ;;  %7017 = vmatprep.subr.bf16.mxu1 %v9477_v8  ;;  %v9519_v7 = vld [vmem:[%s13628_s5 + $0x37c] ss:$12 sps:$4 sm:$0xff]  }
 0x257   :  { %7058 = vmatprep.subr.bf16.mxu0 %v9480_v22  ;;  %v9522_v22 = vld [vmem:[%s13628_s5 + $0x4fc] ss:$12 sps:$4 sm:$0xff]  }
 0x259   :  { %7018 = vmatpush2.bf16.msra.mxu1 %v9475_v23 }
 0x25a   :  { %7059 = vmatpush2.bf16.msra.mxu0 %v9478_v9  ;;  %7019 = vmatprep.subr.bf16.mxu1 %v9483_v12  ;;  %v9517_v12 = vld [vmem:[%s13628_s5 + $0x378] ss:$12 sps:$4 sm:$0xff]  }
 0x25b   :  { %7060 = vmatprep.subr.bf16.mxu0 %v9486_v15 }
 0x25d   :  { %7020 = vmatpush2.bf16.msra.mxu1 %v9481_v19  ;;  %v9520_v19 = vld [vmem:[%s13628_s5 + $0x4f8] ss:$12 sps:$4 sm:$0xff]  }
 0x25e   :  { %7061 = vmatpush2.bf16.msra.mxu0 %v9484_v20  ;;  %7021 = vmatprep.subr.bf16.mxu1 %v9489_v21  ;;  %v9525_v20 = vld [vmem:[%s13628_s5 + $0x364] ss:$12 sps:$4 sm:$0xff]  }
 0x25f   :  { %7062 = vmatprep.subr.bf16.mxu0 %v9492_v25  ;;  %v9528_v25 = vld [vmem:[%s13628_s5 + $0x4e4] ss:$12 sps:$4 sm:$0xff]  }
 0x261   :  { %7022 = vmatpush2.bf16.msra.mxu1 %v9487_v31  ;;  %v9523_v31 = vld [vmem:[%s13628_s5 + $0x360] ss:$12 sps:$4 sm:$0xff]  }
 0x262   :  { %7063 = vmatpush2.bf16.msra.mxu0 %v9490_v33  ;;  %7023 = vmatprep.subr.bf16.mxu1 %v9495_v34  ;;  %v9531_v33 = vld [vmem:[%s13628_s5 + $0x34c] ss:$12 sps:$4 sm:$0xff]  }
 0x263   :  { %7064 = vmatprep.subr.bf16.mxu0 %v9498_v36  ;;  %v9534_v34 = vld [vmem:[%s13628_s5 + $0x4cc] ss:$12 sps:$4 sm:$0xff]   ;;  %v9532_v36 = vld [vmem:[%s13628_s5 + $0x4c8] ss:$12 sps:$4 sm:$0xff]  }
 0x265   :  { %7024 = vmatpush2.bf16.msra.mxu1 %v9493_v39  ;;  %v9535_v39 = vld [vmem:[%s13628_s5 + $0x330] ss:$12 sps:$4 sm:$0xff]  }
 0x266   :  { %7065 = vmatpush2.bf16.msra.mxu0 %v9496_v41  ;;  %7025 = vmatprep.subr.bf16.mxu1 %v9501_v42  ;;  %v9543_v41 = vld [vmem:[%s13628_s5 + $0x31c] ss:$12 sps:$4 sm:$0xff]  }
 0x267   :  { %7066 = vmatprep.subr.bf16.mxu0 %v9504_v49  ;;  %v9546_v42 = vld [vmem:[%s13628_s5 + $0x49c] ss:$12 sps:$4 sm:$0xff]   ;;  %v9544_v49 = vld [vmem:[%s13628_s5 + $0x498] ss:$12 sps:$4 sm:$0xff]  }
 0x269   :  { %7026 = vmatpush2.bf16.msra.mxu1 %v9499_v51  ;;  %v9547_v51 = vld [vmem:[%s13628_s5 + $0x300] ss:$12 sps:$4 sm:$0xff]  }
 0x26a   :  { %7067 = vmatpush2.bf16.msra.mxu0 %v9502_v17  ;;  %7077 = vmatprep.subr.bf16.mxu1 %v9507_v56  ;;  %v9555_v17 = vld [vmem:[%s13628_s5 + $0x46c] ss:$12 sps:$4 sm:$0xff]  }
 0x26b   :  { %7118 = vmatprep.subr.bf16.mxu0 %v9510_v53  ;;  %v9558_v56 = vld [vmem:[%s13628_s5 + $0x5ec] ss:$12 sps:$4 sm:$0xff]   ;;  %v9556_v53 = vld [vmem:[%s13628_s5 + $0x5e8] ss:$12 sps:$4 sm:$0xff]  }
 0x26c   :  { %v11781_v0 = vpop.f32.mrf.mxu1  ;;  %7028 = vmatmul.mubr.bf16.vlgmr.msra.gmra.mxu1 %v11769_v60 }
 0x26d   :  { %v11789_v3 = vpop.f32.mrf.mxu0  ;;  %7069 = vmatmul.mubr.bf16.vlgmr.msra.gmra.mxu0 %v11774_v62  ;;  %7078 = vmatpush1.bf16.msra.mxu1 %v9505_v59  ;;  %v9559_v59 = vld [vmem:[%s13628_s5 + $0x450] ss:$12 sps:$4 sm:$0xff]  }
 0x26e   :  { %7109 = vmatprep.mubr.bf16.mxu1 %v11779_v63  ;;  %7119 = vmatpush1.bf16.msra.mxu0 %v9508_v61  ;;  %v11796_v5 = vpop.f32.mrf.mxu1  ;;  %v9562_v61 = vld [vmem:[%s13628_s5 + $0x5d0] ss:$12 sps:$4 sm:$0xff]  }
 0x26f   :  { %7150 = vmatprep.mubr.bf16.mxu0 %v11787_v2  ;;  %v11805_v8 = vpop.f32.mrf.mxu0  ;;  %7079 = vmatprep.subr.bf16.mxu1 %v9513_v45  ;;  %v9567_v45 = vld [vmem:[%s13628_s5 + $0x43c] ss:$12 sps:$4 sm:$0xff]  }
 0x270   :  { %v2899_v23 = vpop.f32.mrf.mxu1  ;;  %7120 = vmatprep.subr.bf16.mxu0 %v9516_v1  ;;  %v9570_v1 = vld [vmem:[%s13628_s5 + $0x5bc] ss:$12 sps:$4 sm:$0xff]  }
 0x271   :  { %v2940_v9 = vpop.f32.mrf.mxu0  ;;  %7080 = vmatpush1.bf16.msra.mxu1 %v9511_v4  ;;  %v9565_v4 = vld [vmem:[%s13628_s5 + $0x438] ss:$12 sps:$4 sm:$0xff]   ;;  %v9571_v23 = vld [vmem:[%s13628_s5 + $0x420] ss:$12 sps:$4 sm:$0xff]  }
 0x272   :  { %7121 = vmatpush1.bf16.msra.mxu0 %v9514_v6  ;;  %v2900_v15 = vpop.f32.mrf.mxu1  ;;  %7081 = vmatprep.subr.bf16.mxu1 %v9519_v7  ;;  %v9568_v6 = vld [vmem:[%s13628_s5 + $0x5b8] ss:$12 sps:$4 sm:$0xff]   ;;  %v9574_v9 = vld [vmem:[%s13628_s5 + $0x5a0] ss:$12 sps:$4 sm:$0xff]  }
 0x273   :  { %v2941_v21 = vpop.f32.mrf.mxu0  ;;  %7122 = vmatprep.subr.bf16.mxu0 %v9522_v22  ;;  %v9573_v7 = vld [vmem:[%s13628_s5 + $0x424] ss:$12 sps:$4 sm:$0xff]   ;;  %v9582_v15 = vld [vmem:[%s13628_s5 + $0x58c] ss:$12 sps:$4 sm:$0xff]  }
 0x274   :  { %v9576_v22 = vld [vmem:[%s13628_s5 + $0x5a4] ss:$12 sps:$4 sm:$0xff]   ;;  %v9580_v21 = vld [vmem:[%s13628_s5 + $0x588] ss:$12 sps:$4 sm:$0xff]  }
 0x275   :  { %7082 = vmatpush1.bf16.msra.mxu1 %v9517_v12  ;;  %v9579_v12 = vld [vmem:[%s13628_s5 + $0x40c] ss:$12 sps:$4 sm:$0xff]  }
 0x276   :  { %7123 = vmatpush1.bf16.msra.mxu0 %v9520_v19  ;;  %7083 = vmatprep.subr.bf16.mxu1 %v9525_v20  ;;  %v9577_v19 = vld [vmem:[%s13628_s5 + $0x408] ss:$12 sps:$4 sm:$0xff]   ;;  %v11934_v20 = vsub.s32 4, %v10514_v27 }
 0x277   :  { %7124 = vmatprep.subr.bf16.mxu0 %v9528_v25  ;;  %v9585_v25 = vld [vmem:[%s13628_s5 + $0x3f4] ss:$12 sps:$4 sm:$0xff]  }
 0x279   :  { %7084 = vmatpush1.bf16.msra.mxu1 %v9523_v31  ;;  %v11943_v31 = vsub.s32 6, %v10514_v27  ;;  %v9586_v27 = vld [vmem:[%s13628_s5 + $0x570] ss:$12 sps:$4 sm:$0xff]  }
 0x27a   :  { %7125 = vmatpush1.bf16.msra.mxu0 %v9526_v32  ;;  %7085 = vmatprep.subr.bf16.mxu1 %v9531_v33  ;;  %v9588_v32 = vld [vmem:[%s13628_s5 + $0x574] ss:$12 sps:$4 sm:$0xff]   ;;  %v9583_v33 = vld [vmem:[%s13628_s5 + $0x3f0] ss:$12 sps:$4 sm:$0xff]  }
 0x27b   :  { %7126 = vmatprep.subr.bf16.mxu0 %v9534_v34  ;;  %v594_v34 = vrot.slane %v11511_v52, %v11934_v20 }
 0x27d   :  { %7086 = vmatpush1.bf16.msra.mxu1 %v9529_v35  ;;  %v9591_v35 = vld [vmem:[%s13628_s5 + $0x3dc] ss:$12 sps:$4 sm:$0xff]  }
 0x27e   :  { %7127 = vmatpush1.bf16.msra.mxu0 %v9532_v36  ;;  %7087 = vmatprep.subr.bf16.mxu1 %v9537_v37  ;;  %v602_v36 = vrot.slane %v11511_v52, %v11943_v31  ;;  %v11964_v37 = vld [vmem:[%s13627_s4 + $0x8] sm:$0xff]  ;;  %v9589_v52 = vld [vmem:[%s13628_s5 + $0x3d8] ss:$12 sps:$4 sm:$0xff]  }
 0x27f   :  { %7128 = vmatprep.subr.bf16.mxu0 %v9540_v38  ;;  %v9594_v38 = vld [vmem:[%s13628_s5 + $0x55c] ss:$12 sps:$4 sm:$0xff]  }
 0x281   :  { %7088 = vmatpush1.bf16.msra.mxu1 %v9535_v39  ;;  %v614_v39 = vrot.slane %v11964_v37, %v10523_v30 }
 0x282   :  { %7129 = vmatpush1.bf16.msra.mxu0 %v9538_v40  ;;  %7089 = vmatprep.subr.bf16.mxu1 %v9543_v41  ;;  %v622_v40 = vrot.slane %v11964_v37, %v11506_v44  ;;  %v2732_v41 = vadd.f32 %v11343_v47, %v594_v34  ;;  %v9616_v34 = vld [vmem:[%s13628_s5 + $0x7f8] ss:$12 sps:$4 sm:$0xff]  }
 0x283   :  { %7130 = vmatprep.subr.bf16.mxu0 %v9546_v42  ;;  %v9592_v42 = vld [vmem:[%s13628_s5 + $0x558] ss:$12 sps:$4 sm:$0xff]  }
 0x284   :  { %v2857_v47 = vadd.f32 %v11572_v46, %v622_v40  ;;  %v9627_v40 = vld [vmem:[%s13628_s5 + $0x64c] ss:$12 sps:$4 sm:$0xff]  }
 0x285   :  { %7090 = vmatpush1.bf16.msra.mxu1 %v9541_v43  ;;  %v9597_v43 = vld [vmem:[%s13628_s5 + $0x3c4] ss:$12 sps:$4 sm:$0xff]  }
 0x286   :  { %7131 = vmatpush1.bf16.msra.mxu0 %v9544_v49  ;;  %7091 = vmatprep.subr.bf16.mxu1 %v9549_v50  ;;  %v2773_v49 = vadd.f32 %v11345_v48, %v602_v36  ;;  %v9600_v50 = vld [vmem:[%s13628_s5 + $0x544] ss:$12 sps:$4 sm:$0xff]   ;;  %v9598_v48 = vld [vmem:[%s13628_s5 + $0x540] ss:$12 sps:$4 sm:$0xff]  }
 0x287   :  { %7132 = vmatprep.subr.bf16.mxu0 %v9552_v16  ;;  %v2816_v16 = vadd.f32 %v11563_v18, %v614_v39  ;;  %v9606_v18 = vld [vmem:[%s13628_s5 + $0x82c] ss:$12 sps:$4 sm:$0xff]   ;;  %v9624_v36 = vld [vmem:[%s13628_s5 + $0x7e4] ss:$12 sps:$4 sm:$0xff]  }
 0x288   :  { %v9622_v39 = vld [vmem:[%s13628_s5 + $0x7e0] ss:$12 sps:$4 sm:$0xff]  }
 0x289   :  { %7092 = vmatpush1.bf16.msra.mxu1 %v9547_v51  ;;  %v9595_v51 = vld [vmem:[%s13628_s5 + $0x3c0] ss:$12 sps:$4 sm:$0xff]   ;;  %v3116_v46 = vmax.f32 %v2816_v16, 0.0  ;;  %v9634_v16 = vld [vmem:[%s13628_s5 + $0x7b0] ss:$12 sps:$4 sm:$0xff]  }
 0x28a   :  { %7133 = vmatpush1.bf16.msra.mxu0 %v9550_v55  ;;  %7093 = vmatprep.subr.bf16.mxu1 %v9555_v17  ;;  %v3111_v55 = vmax.f32 %v2732_v41, 0.0  ;;  %v9603_v17 = vld [vmem:[%s13628_s5 + $0x6ac] ss:$12 sps:$4 sm:$0xff]   ;;  %v9625_v41 = vld [vmem:[%s13628_s5 + $0x648] ss:$12 sps:$4 sm:$0xff]  }
 0x28b   :  { %7134 = vmatprep.subr.bf16.mxu0 %v9558_v56  ;;  %v3113_v56 = vmax.f32 %v2773_v49, 0.0  ;;  %v9636_v49 = vld [vmem:[%s13628_s5 + $0x7b4] ss:$12 sps:$4 sm:$0xff]  }
 0x28d   :  { %7094 = vmatpush2.bf16.msra.mxu1 %v9553_v57  ;;  %v3118_v57 = vmax.f32 %v2857_v47, 0.0  ;;  %v9639_v47 = vld [vmem:[%s13628_s5 + $0x61c] ss:$12 sps:$4 sm:$0xff]  }
 0x28e   :  { %7135 = vmatpush2.bf16.msra.mxu0 %v9556_v53  ;;  %7095 = vmatprep.subr.bf16.mxu1 %v9561_v54  ;;  %v9601_v53 = vld [vmem:[%s13628_s5 + $0x6a8] ss:$12 sps:$4 sm:$0xff]   ;;  %v12004_v54 = vpack.c.bf16 %v3111_v55, %v3111_v55  ;;  %v9637_v55 = vld [vmem:[%s13628_s5 + $0x618] ss:$12 sps:$4 sm:$0xff]  }
 0x28f   :  { %7136 = vmatprep.subr.bf16.mxu0 %v9564_v58  ;;  %v9604_v58 = vld [vmem:[%s13628_s5 + $0x828] ss:$12 sps:$4 sm:$0xff]  }
 0x291   :  { %7096 = vmatpush2.bf16.msra.mxu1 %v9559_v59  ;;  %v12009_v59 = vpack.c.bf16 %v3113_v56, %v3113_v56  ;;  %v9648_v56 = vld [vmem:[%s13628_s5 + $0x784] ss:$12 sps:$4 sm:$0xff]  }
 0x292   :  { %7137 = vmatpush2.bf16.msra.mxu0 %v9562_v61  ;;  %7097 = vmatprep.subr.bf16.mxu1 %v9567_v45  ;;  %v9609_v61 = vld [vmem:[%s13628_s5 + $0x694] ss:$12 sps:$4 sm:$0xff]   ;;  %v12014_v45 = vpack.c.bf16 %v3116_v46, %v3116_v46 }
 0x293   :  { %7138 = vmatprep.subr.bf16.mxu0 %v9570_v1  ;;  %v9646_v46 = vld [vmem:[%s13628_s5 + $0x780] ss:$12 sps:$4 sm:$0xff]  }
 0x295   :  { %7098 = vmatpush2.bf16.msra.mxu1 %v9565_v4  ;;  %v9612_v4 = vld [vmem:[%s13628_s5 + $0x814] ss:$12 sps:$4 sm:$0xff]  }
 0x296   :  { %7139 = vmatpush2.bf16.msra.mxu0 %v9568_v6  ;;  %7099 = vmatprep.subr.bf16.mxu1 %v9573_v7  ;;  %v12022_v6 = vpack.c.bf16 %v3118_v57, %v3118_v57  ;;  %v9651_v57 = vld [vmem:[%s13628_s5 + $0x76c] ss:$12 sps:$4 sm:$0xff]  }
 0x297   :  { %7140 = vmatprep.subr.bf16.mxu0 %v9576_v22  ;;  %v9607_v22 = vld [vmem:[%s13628_s5 + $0x690] ss:$12 sps:$4 sm:$0xff]  }
 0x299   :  { %7100 = vmatpush2.bf16.msra.mxu1 %v9571_v23 }
 0x29a   :  { %7141 = vmatpush2.bf16.msra.mxu0 %v9574_v9  ;;  %7101 = vmatprep.subr.bf16.mxu1 %v9579_v12  ;;  %v9610_v9 = vld [vmem:[%s13628_s5 + $0x810] ss:$12 sps:$4 sm:$0xff]  }
 0x29b   :  { %7142 = vmatprep.subr.bf16.mxu0 %v9582_v15  ;;  %v9615_v12 = vld [vmem:[%s13628_s5 + $0x67c] ss:$12 sps:$4 sm:$0xff]  }
 0x29d   :  { %7102 = vmatpush2.bf16.msra.mxu1 %v9577_v19  ;;  %v9618_v19 = vld [vmem:[%s13628_s5 + $0x7fc] ss:$12 sps:$4 sm:$0xff]  }
 0x29e   :  { %7143 = vmatpush2.bf16.msra.mxu0 %v9580_v21  ;;  %7103 = vmatprep.subr.bf16.mxu1 %v9585_v25 }
 0x29f   :  { %7144 = vmatprep.subr.bf16.mxu0 %v9588_v32  ;;  %v9613_v32 = vld [vmem:[%s13628_s5 + $0x678] ss:$12 sps:$4 sm:$0xff]  }
 0x2a1   :  { %7104 = vmatpush2.bf16.msra.mxu1 %v9583_v33 }
 0x2a2   :  { %7145 = vmatpush2.bf16.msra.mxu0 %v9586_v27  ;;  %7105 = vmatprep.subr.bf16.mxu1 %v9591_v35  ;;  %v9621_v27 = vld [vmem:[%s13628_s5 + $0x664] ss:$12 sps:$4 sm:$0xff]  }
 0x2a3   :  { %7146 = vmatprep.subr.bf16.mxu0 %v9594_v38  ;;  %v9619_v38 = vld [vmem:[%s13628_s5 + $0x660] ss:$12 sps:$4 sm:$0xff]  }
 0x2a5   :  { %7106 = vmatpush2.bf16.msra.mxu1 %v9589_v52  ;;  %v9630_v52 = vld [vmem:[%s13628_s5 + $0x7cc] ss:$12 sps:$4 sm:$0xff]  }
 0x2a6   :  { %7147 = vmatpush2.bf16.msra.mxu0 %v9592_v42  ;;  %7107 = vmatprep.subr.bf16.mxu1 %v9597_v43  ;;  %v9628_v42 = vld [vmem:[%s13628_s5 + $0x7c8] ss:$12 sps:$4 sm:$0xff]  }
 0x2a7   :  { %7148 = vmatprep.subr.bf16.mxu0 %v9600_v50  ;;  %v9633_v43 = vld [vmem:[%s13628_s5 + $0x634] ss:$12 sps:$4 sm:$0xff]   ;;  %v9631_v50 = vld [vmem:[%s13628_s5 + $0x630] ss:$12 sps:$4 sm:$0xff]  }
 0x2a9   :  { %7108 = vmatpush2.bf16.msra.mxu1 %v9595_v51  ;;  %v9642_v51 = vld [vmem:[%s13628_s5 + $0x79c] ss:$12 sps:$4 sm:$0xff]  }
 0x2aa   :  { %7149 = vmatpush2.bf16.msra.mxu0 %v9598_v48  ;;  %7159 = vmatprep.subr.bf16.mxu1 %v9603_v17  ;;  %v9640_v48 = vld [vmem:[%s13628_s5 + $0x798] ss:$12 sps:$4 sm:$0xff]  }
 0x2ab   :  { %7200 = vmatprep.subr.bf16.mxu0 %v9606_v18  ;;  %v9645_v17 = vld [vmem:[%s13628_s5 + $0x604] ss:$12 sps:$4 sm:$0xff]   ;;  %v9643_v18 = vld [vmem:[%s13628_s5 + $0x600] ss:$12 sps:$4 sm:$0xff]  }
 0x2ac   :  { %v12016_v1 = vpop.f32.mrf.mxu1  ;;  %7110 = vmatmul.mubr.bf16.vlgmr.msra.gmra.mxu1 %v12004_v54 }
 0x2ad   :  { %v12024_v7 = vpop.f32.mrf.mxu0  ;;  %7151 = vmatmul.mubr.bf16.vlgmr.msra.gmra.mxu0 %v12009_v59  ;;  %7160 = vmatpush1.bf16.msra.mxu1 %v9601_v53  ;;  %v9654_v53 = vld [vmem:[%s13628_s5 + $0x8ec] ss:$12 sps:$4 sm:$0xff]  }
 0x2ae   :  { %7191 = vmatprep.mubr.bf16.mxu1 %v12014_v45  ;;  %7201 = vmatpush1.bf16.msra.mxu0 %v9604_v58  ;;  %v12031_v23 = vpop.f32.mrf.mxu1  ;;  %v9649_v58 = vld [vmem:[%s13628_s5 + $0x768] ss:$12 sps:$4 sm:$0xff]  }
 0x2af   :  { %7232 = vmatprep.mubr.bf16.mxu0 %v12022_v6  ;;  %v12040_v15 = vpop.f32.mrf.mxu0  ;;  %7161 = vmatprep.subr.bf16.mxu1 %v9609_v61  ;;  %v9652_v61 = vld [vmem:[%s13628_s5 + $0x8e8] ss:$12 sps:$4 sm:$0xff]  }
 0x2b0   :  { %v2981_v21 = vpop.f32.mrf.mxu1  ;;  %7202 = vmatprep.subr.bf16.mxu0 %v9612_v4  ;;  %v9657_v4 = vld [vmem:[%s13628_s5 + $0x754] ss:$12 sps:$4 sm:$0xff]  }
 0x2b1   :  { %v3022_v25 = vpop.f32.mrf.mxu0  ;;  %7162 = vmatpush1.bf16.msra.mxu1 %v9607_v22  ;;  %v9660_v22 = vld [vmem:[%s13628_s5 + $0x8d4] ss:$12 sps:$4 sm:$0xff]   ;;  %v9666_v21 = vld [vmem:[%s13628_s5 + $0x8bc] ss:$12 sps:$4 sm:$0xff]  }
 0x2b2   :  { %7203 = vmatpush1.bf16.msra.mxu0 %v9610_v9  ;;  %v2982_v33 = vpop.f32.mrf.mxu1  ;;  %7163 = vmatprep.subr.bf16.mxu1 %v9615_v12  ;;  %v9655_v9 = vld [vmem:[%s13628_s5 + $0x750] ss:$12 sps:$4 sm:$0xff]   ;;  %v9661_v25 = vld [vmem:[%s13628_s5 + $0x738] ss:$12 sps:$4 sm:$0xff]  }
 0x2b3   :  { %v3023_v35 = vpop.f32.mrf.mxu0  ;;  %7204 = vmatprep.subr.bf16.mxu0 %v9618_v19  ;;  %v9658_v12 = vld [vmem:[%s13628_s5 + $0x8d0] ss:$12 sps:$4 sm:$0xff]  }
 0x2b4   :  { %v9663_v19 = vld [vmem:[%s13628_s5 + $0x73c] ss:$12 sps:$4 sm:$0xff]   ;;  %v9669_v33 = vld [vmem:[%s13628_s5 + $0x724] ss:$12 sps:$4 sm:$0xff]   ;;  %v9670_v35 = vld [vmem:[%s13628_s5 + $0x8a0] ss:$12 sps:$4 sm:$0xff]  }
 0x2b5   :  { %7164 = vmatpush1.bf16.msra.mxu1 %v9613_v32  ;;  %v9664_v32 = vld [vmem:[%s13628_s5 + $0x8b8] ss:$12 sps:$4 sm:$0xff]  }
 0x2b6   :  { %7205 = vmatpush1.bf16.msra.mxu0 %v9616_v34  ;;  %7165 = vmatprep.subr.bf16.mxu1 %v9621_v27  ;;  %v9672_v34 = vld [vmem:[%s13628_s5 + $0x8a4] ss:$12 sps:$4 sm:$0xff]   ;;  %v9667_v27 = vld [vmem:[%s13628_s5 + $0x720] ss:$12 sps:$4 sm:$0xff]  }
 0x2b7   :  { %7206 = vmatprep.subr.bf16.mxu0 %v9624_v36  ;;  %v9675_v36 = vld [vmem:[%s13628_s5 + $0x70c] ss:$12 sps:$4 sm:$0xff]  }
 0x2b9   :  { %7166 = vmatpush1.bf16.msra.mxu1 %v9619_v38  ;;  %v9678_v38 = vld [vmem:[%s13628_s5 + $0x88c] ss:$12 sps:$4 sm:$0xff]  }
 0x2ba   :  { %7207 = vmatpush1.bf16.msra.mxu0 %v9622_v39  ;;  %7167 = vmatprep.subr.bf16.mxu1 %v9627_v40  ;;  %v9673_v39 = vld [vmem:[%s13628_s5 + $0x708] ss:$12 sps:$4 sm:$0xff]  }
 0x2bb   :  { %7208 = vmatprep.subr.bf16.mxu0 %v9630_v52  ;;  %v9676_v40 = vld [vmem:[%s13628_s5 + $0x888] ss:$12 sps:$4 sm:$0xff]  }
 0x2bc   :  { %v9681_v52 = vld [vmem:[%s13628_s5 + $0x6f4] ss:$12 sps:$4 sm:$0xff]  }
 0x2bd   :  { %7168 = vmatpush1.bf16.msra.mxu1 %v9625_v41  ;;  %v9684_v41 = vld [vmem:[%s13628_s5 + $0x874] ss:$12 sps:$4 sm:$0xff]  }
 0x2be   :  { %7209 = vmatpush1.bf16.msra.mxu0 %v9628_v42  ;;  %7169 = vmatprep.subr.bf16.mxu1 %v9633_v43  ;;  %v9679_v42 = vld [vmem:[%s13628_s5 + $0x6f0] ss:$12 sps:$4 sm:$0xff]   ;;  %v610_v43 = vrot.slane %v11964_v37, %v10520_v29 }
 0x2bf   :  { %7210 = vmatprep.subr.bf16.mxu0 %v9636_v49  ;;  %v9682_v49 = vld [vmem:[%s13628_s5 + $0x870] ss:$12 sps:$4 sm:$0xff]  }
 0x2c1   :  { %7170 = vmatpush1.bf16.msra.mxu1 %v9631_v50  ;;  %v9687_v50 = vld [vmem:[%s13628_s5 + $0x6dc] ss:$12 sps:$4 sm:$0xff]  }
 0x2c2   :  { %7211 = vmatpush1.bf16.msra.mxu0 %v9634_v16  ;;  %7171 = vmatprep.subr.bf16.mxu1 %v9639_v47  ;;  %v618_v16 = vrot.slane %v11964_v37, %v11707_v24  ;;  %v9690_v47 = vld [vmem:[%s13628_s5 + $0x85c] ss:$12 sps:$4 sm:$0xff]  }
 0x2c3   :  { %7212 = vmatprep.subr.bf16.mxu0 %v9642_v51  ;;  %v630_v51 = vrot.slane %v11964_v37, %v11713_v26 }
 0x2c5   :  { %7172 = vmatpush1.bf16.msra.mxu1 %v9637_v55  ;;  %v638_v55 = vrot.slane %v11964_v37, %v11716_v28 }
 0x2c6   :  { %7213 = vmatpush1.bf16.msra.mxu0 %v9640_v48  ;;  %7173 = vmatprep.subr.bf16.mxu1 %v9645_v17  ;;  %v9685_v48 = vld [vmem:[%s13628_s5 + $0x6d8] ss:$12 sps:$4 sm:$0xff]   ;;  %v2814_v17 = vadd.f32 %v11548_v11, %v610_v43 }
 0x2c7   :  { %7214 = vmatprep.subr.bf16.mxu0 %v9648_v56  ;;  %v9688_v56 = vld [vmem:[%s13628_s5 + $0x858] ss:$12 sps:$4 sm:$0xff]   ;;  %v2939_v11 = vadd.f32 %v11805_v8, %v638_v55 }
 0x2c9   :  { %7174 = vmatpush1.bf16.msra.mxu1 %v9643_v18  ;;  %v9693_v18 = vld [vmem:[%s13628_s5 + $0x6c4] ss:$12 sps:$4 sm:$0xff]  }
 0x2ca   :  { %7215 = vmatpush1.bf16.msra.mxu0 %v9646_v46  ;;  %7175 = vmatprep.subr.bf16.mxu1 %v9651_v57  ;;  %v2855_v46 = vadd.f32 %v11556_v14, %v618_v16  ;;  %v9696_v57 = vld [vmem:[%s13628_s5 + $0x844] ss:$12 sps:$4 sm:$0xff]   ;;  %v9694_v14 = vld [vmem:[%s13628_s5 + $0x840] ss:$12 sps:$4 sm:$0xff]  }
 0x2cb   :  { %7216 = vmatprep.subr.bf16.mxu0 %v9654_v53  ;;  %v2898_v53 = vadd.f32 %v11796_v5, %v630_v51  ;;  %v9702_v5 = vld [vmem:[%s13628_s5 + $0xb2c] ss:$12 sps:$4 sm:$0xff]   ;;  %v9717_v51 = vld [vmem:[%s13628_s5 + $0x964] ss:$12 sps:$4 sm:$0xff]  }
 0x2cd   :  { %7176 = vmatpush2.bf16.msra.mxu1 %v9649_v58  ;;  %v9691_v58 = vld [vmem:[%s13628_s5 + $0x6c0] ss:$12 sps:$4 sm:$0xff]   ;;  %v3120_v8 = vmax.f32 %v2898_v53, 0.0  ;;  %v9724_v53 = vld [vmem:[%s13628_s5 + $0xac8] ss:$12 sps:$4 sm:$0xff]  }
 0x2ce   :  { %7217 = vmatpush2.bf16.msra.mxu0 %v9652_v61  ;;  %7177 = vmatprep.subr.bf16.mxu1 %v9657_v4  ;;  %v3115_v61 = vmax.f32 %v2814_v17, 0.0  ;;  %v9699_v4 = vld [vmem:[%s13628_s5 + $0x9ac] ss:$12 sps:$4 sm:$0xff]  }
 0x2cf   :  { %7218 = vmatprep.subr.bf16.mxu0 %v9660_v22  ;;  %v3117_v22 = vmax.f32 %v2855_v46, 0.0  ;;  %v9715_v17 = vld [vmem:[%s13628_s5 + $0x960] ss:$12 sps:$4 sm:$0xff]  }
 0x2d0   :  { %v9726_v46 = vld [vmem:[%s13628_s5 + $0xacc] ss:$12 sps:$4 sm:$0xff]  }
 0x2d1   :  { %7178 = vmatpush2.bf16.msra.mxu1 %v9655_v9  ;;  %v3122_v9 = vmax.f32 %v2939_v11, 0.0  ;;  %v9729_v11 = vld [vmem:[%s13628_s5 + $0x934] ss:$12 sps:$4 sm:$0xff]  }
 0x2d2   :  { %7219 = vmatpush2.bf16.msra.mxu0 %v9658_v12  ;;  %7179 = vmatprep.subr.bf16.mxu1 %v9663_v19  ;;  %v9697_v12 = vld [vmem:[%s13628_s5 + $0x9a8] ss:$12 sps:$4 sm:$0xff]   ;;  %v12228_v19 = vpack.c.bf16 %v3115_v61, %v3115_v61  ;;  %v9727_v61 = vld [vmem:[%s13628_s5 + $0x930] ss:$12 sps:$4 sm:$0xff]  }
 0x2d3   :  { %7220 = vmatprep.subr.bf16.mxu0 %v9666_v21  ;;  %v9700_v21 = vld [vmem:[%s13628_s5 + $0xb28] ss:$12 sps:$4 sm:$0xff]  }
 0x2d5   :  { %7180 = vmatpush2.bf16.msra.mxu1 %v9661_v25  ;;  %v12233_v25 = vpack.c.bf16 %v3117_v22, %v3117_v22  ;;  %v9738_v22 = vld [vmem:[%s13628_s5 + $0xa9c] ss:$12 sps:$4 sm:$0xff]  }
 0x2d6   :  { %7221 = vmatpush2.bf16.msra.mxu0 %v9664_v32  ;;  %7181 = vmatprep.subr.bf16.mxu1 %v9669_v33  ;;  %v9705_v32 = vld [vmem:[%s13628_s5 + $0x994] ss:$12 sps:$4 sm:$0xff]   ;;  %v12238_v33 = vpack.c.bf16 %v3120_v8, %v3120_v8  ;;  %v9736_v8 = vld [vmem:[%s13628_s5 + $0xa98] ss:$12 sps:$4 sm:$0xff]  }
 0x2d7   :  { %7222 = vmatprep.subr.bf16.mxu0 %v9672_v34 }
 0x2d9   :  { %7182 = vmatpush2.bf16.msra.mxu1 %v9667_v27  ;;  %v9708_v27 = vld [vmem:[%s13628_s5 + $0xb14] ss:$12 sps:$4 sm:$0xff]  }
 0x2da   :  { %7223 = vmatpush2.bf16.msra.mxu0 %v9670_v35  ;;  %7183 = vmatprep.subr.bf16.mxu1 %v9675_v36  ;;  %v12246_v35 = vpack.c.bf16 %v3122_v9, %v3122_v9  ;;  %v9741_v9 = vld [vmem:[%s13628_s5 + $0x904] ss:$12 sps:$4 sm:$0xff]  }
 0x2db   :  { %7224 = vmatprep.subr.bf16.mxu0 %v9678_v38  ;;  %v9703_v38 = vld [vmem:[%s13628_s5 + $0x990] ss:$12 sps:$4 sm:$0xff]  }
 0x2dd   :  { %7184 = vmatpush2.bf16.msra.mxu1 %v9673_v39 }
 0x2de   :  { %7225 = vmatpush2.bf16.msra.mxu0 %v9676_v40  ;;  %7185 = vmatprep.subr.bf16.mxu1 %v9681_v52  ;;  %v9706_v40 = vld [vmem:[%s13628_s5 + $0xb10] ss:$12 sps:$4 sm:$0xff]  }
 0x2df   :  { %7226 = vmatprep.subr.bf16.mxu0 %v9684_v41  ;;  %v9711_v52 = vld [vmem:[%s13628_s5 + $0x97c] ss:$12 sps:$4 sm:$0xff]  }
 0x2e1   :  { %7186 = vmatpush2.bf16.msra.mxu1 %v9679_v42  ;;  %v9714_v42 = vld [vmem:[%s13628_s5 + $0xafc] ss:$12 sps:$4 sm:$0xff]  }
 0x2e2   :  { %7227 = vmatpush2.bf16.msra.mxu0 %v9682_v49  ;;  %7187 = vmatprep.subr.bf16.mxu1 %v9687_v50  ;;  %v9709_v50 = vld [vmem:[%s13628_s5 + $0x978] ss:$12 sps:$4 sm:$0xff]  }
 0x2e3   :  { %7228 = vmatprep.subr.bf16.mxu0 %v9690_v47  ;;  %v9712_v47 = vld [vmem:[%s13628_s5 + $0xaf8] ss:$12 sps:$4 sm:$0xff]  }
 0x2e5   :  { %7188 = vmatpush2.bf16.msra.mxu1 %v9685_v48  ;;  %v9720_v48 = vld [vmem:[%s13628_s5 + $0xae4] ss:$12 sps:$4 sm:$0xff]  }
 0x2e6   :  { %7229 = vmatpush2.bf16.msra.mxu0 %v9688_v56  ;;  %7189 = vmatprep.subr.bf16.mxu1 %v9693_v18  ;;  %v9718_v56 = vld [vmem:[%s13628_s5 + $0xae0] ss:$12 sps:$4 sm:$0xff]  }
 0x2e7   :  { %7230 = vmatprep.subr.bf16.mxu0 %v9696_v57  ;;  %v9723_v18 = vld [vmem:[%s13628_s5 + $0x94c] ss:$12 sps:$4 sm:$0xff]   ;;  %v9721_v57 = vld [vmem:[%s13628_s5 + $0x948] ss:$12 sps:$4 sm:$0xff]  }
 0x2e9   :  { %7190 = vmatpush2.bf16.msra.mxu1 %v9691_v58  ;;  %v9732_v58 = vld [vmem:[%s13628_s5 + $0xab4] ss:$12 sps:$4 sm:$0xff]  }
 0x2ea   :  { %7231 = vmatpush2.bf16.msra.mxu0 %v9694_v14  ;;  %7241 = vmatprep.subr.bf16.mxu1 %v9699_v4  ;;  %v9730_v14 = vld [vmem:[%s13628_s5 + $0xab0] ss:$12 sps:$4 sm:$0xff]  }
 0x2eb   :  { %7282 = vmatprep.subr.bf16.mxu0 %v9702_v5  ;;  %v9735_v4 = vld [vmem:[%s13628_s5 + $0x91c] ss:$12 sps:$4 sm:$0xff]   ;;  %v9733_v5 = vld [vmem:[%s13628_s5 + $0x918] ss:$12 sps:$4 sm:$0xff]  }
 0x2ec   :  { %v12240_v34 = vpop.f32.mrf.mxu1  ;;  %7192 = vmatmul.mubr.bf16.vlgmr.msra.gmra.mxu1 %v12228_v19 }
 0x2ed   :  { %v12248_v36 = vpop.f32.mrf.mxu0  ;;  %7233 = vmatmul.mubr.bf16.vlgmr.msra.gmra.mxu0 %v12233_v25  ;;  %7242 = vmatpush1.bf16.msra.mxu1 %v9697_v12  ;;  %v9744_v12 = vld [vmem:[%s13628_s5 + $0xa84] ss:$12 sps:$4 sm:$0xff]  }
 0x2ee   :  { %7273 = vmatprep.mubr.bf16.mxu1 %v12238_v33  ;;  %7283 = vmatpush1.bf16.msra.mxu0 %v9700_v21  ;;  %v12255_v39 = vpop.f32.mrf.mxu1  ;;  %v9739_v21 = vld [vmem:[%s13628_s5 + $0x900] ss:$12 sps:$4 sm:$0xff]  }
 0x2ef   :  { %7314 = vmatprep.mubr.bf16.mxu0 %v12246_v35  ;;  %v12264_v41 = vpop.f32.mrf.mxu0  ;;  %7243 = vmatprep.subr.bf16.mxu1 %v9705_v32  ;;  %v9742_v32 = vld [vmem:[%s13628_s5 + $0xa80] ss:$12 sps:$4 sm:$0xff]  }
 0x2f0   :  { %v3063_v43 = vpop.f32.mrf.mxu1  ;;  %7284 = vmatprep.subr.bf16.mxu0 %v9708_v27  ;;  %v9747_v27 = vld [vmem:[%s13628_s5 + $0xa6c] ss:$12 sps:$4 sm:$0xff]  }
 0x2f1   :  { %v3104_v49 = vpop.f32.mrf.mxu0  ;;  %7244 = vmatpush1.bf16.msra.mxu1 %v9703_v38  ;;  %v9750_v38 = vld [vmem:[%s13628_s5 + $0xbec] ss:$12 sps:$4 sm:$0xff]   ;;  %v9756_v43 = vld [vmem:[%s13628_s5 + $0xbd4] ss:$12 sps:$4 sm:$0xff]  }
 0x2f2   :  { %7285 = vmatpush1.bf16.msra.mxu0 %v9706_v40  ;;  %v3064_v16 = vpop.f32.mrf.mxu1  ;;  %7245 = vmatprep.subr.bf16.mxu1 %v9711_v52  ;;  %v9745_v40 = vld [vmem:[%s13628_s5 + $0xa68] ss:$12 sps:$4 sm:$0xff]   ;;  %v9751_v49 = vld [vmem:[%s13628_s5 + $0xa50] ss:$12 sps:$4 sm:$0xff]  }
 0x2f3   :  { %v3105_v55 = vpop.f32.mrf.mxu0  ;;  %7286 = vmatprep.subr.bf16.mxu0 %v9714_v42  ;;  %v9748_v52 = vld [vmem:[%s13628_s5 + $0xbe8] ss:$12 sps:$4 sm:$0xff]  }
 0x2f4   :  { %v9753_v42 = vld [vmem:[%s13628_s5 + $0xa54] ss:$12 sps:$4 sm:$0xff]   ;;  %v9759_v16 = vld [vmem:[%s13628_s5 + $0xa3c] ss:$12 sps:$4 sm:$0xff]   ;;  %v9760_v55 = vld [vmem:[%s13628_s5 + $0xbb8] ss:$12 sps:$4 sm:$0xff]  }
 0x2f5   :  { %7246 = vmatpush1.bf16.msra.mxu1 %v9709_v50  ;;  %v9754_v50 = vld [vmem:[%s13628_s5 + $0xbd0] ss:$12 sps:$4 sm:$0xff]  }
 0x2f6   :  { %7287 = vmatpush1.bf16.msra.mxu0 %v9712_v47  ;;  %7247 = vmatprep.subr.bf16.mxu1 %v9717_v51  ;;  %v9762_v47 = vld [vmem:[%s13628_s5 + $0xbbc] ss:$12 sps:$4 sm:$0xff]   ;;  %v9757_v51 = vld [vmem:[%s13628_s5 + $0xa38] ss:$12 sps:$4 sm:$0xff]  }
 0x2f7   :  { %7288 = vmatprep.subr.bf16.mxu0 %v9720_v48  ;;  %v9765_v48 = vld [vmem:[%s13628_s5 + $0xa24] ss:$12 sps:$4 sm:$0xff]  }
 0x2f9   :  { %7248 = vmatpush1.bf16.msra.mxu1 %v9715_v17  ;;  %v9768_v17 = vld [vmem:[%s13628_s5 + $0xba4] ss:$12 sps:$4 sm:$0xff]  }
 0x2fa   :  { %7289 = vmatpush1.bf16.msra.mxu0 %v9718_v56  ;;  %7249 = vmatprep.subr.bf16.mxu1 %v9723_v18  ;;  %v9763_v56 = vld [vmem:[%s13628_s5 + $0xa20] ss:$12 sps:$4 sm:$0xff]  }
 0x2fb   :  { %7290 = vmatprep.subr.bf16.mxu0 %v9726_v46  ;;  %v9766_v18 = vld [vmem:[%s13628_s5 + $0xba0] ss:$12 sps:$4 sm:$0xff]  }
 0x2fc   :  { %v9771_v46 = vld [vmem:[%s13628_s5 + $0xa0c] ss:$12 sps:$4 sm:$0xff]  }
 0x2fd   :  { %7250 = vmatpush1.bf16.msra.mxu1 %v9721_v57  ;;  %v9774_v57 = vld [vmem:[%s13628_s5 + $0xb8c] ss:$12 sps:$4 sm:$0xff]  }
 0x2fe   :  { %7291 = vmatpush1.bf16.msra.mxu0 %v9724_v53  ;;  %7251 = vmatprep.subr.bf16.mxu1 %v9729_v11  ;;  %v9769_v53 = vld [vmem:[%s13628_s5 + $0xa08] ss:$12 sps:$4 sm:$0xff]  }
 0x2ff   :  { %7292 = vmatprep.subr.bf16.mxu0 %v9732_v58  ;;  %v9772_v11 = vld [vmem:[%s13628_s5 + $0xb88] ss:$12 sps:$4 sm:$0xff]  }
 0x300   :  { %v9777_v58 = vld [vmem:[%s13628_s5 + $0x9f4] ss:$12 sps:$4 sm:$0xff]  }
 0x301   :  { %7252 = vmatpush1.bf16.msra.mxu1 %v9727_v61  ;;  %v9780_v61 = vld [vmem:[%s13628_s5 + $0xb74] ss:$12 sps:$4 sm:$0xff]  }
 0x302   :  { %7293 = vmatpush1.bf16.msra.mxu0 %v9730_v14  ;;  %7253 = vmatprep.subr.bf16.mxu1 %v9735_v4  ;;  %v9775_v14 = vld [vmem:[%s13628_s5 + $0x9f0] ss:$12 sps:$4 sm:$0xff]   ;;  %v626_v4 = vrot.slane %v11964_v37, %v11934_v20 }
 0x303   :  { %7294 = vmatprep.subr.bf16.mxu0 %v9738_v22  ;;  %v9778_v22 = vld [vmem:[%s13628_s5 + $0xb70] ss:$12 sps:$4 sm:$0xff]  }
 0x305   :  { %7254 = vmatpush1.bf16.msra.mxu1 %v9733_v5  ;;  %v9783_v5 = vld [vmem:[%s13628_s5 + $0x9dc] ss:$12 sps:$4 sm:$0xff]  }
 0x306   :  { %7295 = vmatpush1.bf16.msra.mxu0 %v9736_v8  ;;  %7255 = vmatprep.subr.bf16.mxu1 %v9741_v9  ;;  %v634_v8 = vrot.slane %v11964_v37, %v11943_v31  ;;  %v12417_v9 = vld [vmem:[%s13627_s4 + $0x10] sm:$0xff]  ;;  %v9781_v37 = vld [vmem:[%s13628_s5 + $0x9d8] ss:$12 sps:$4 sm:$0xff]  }
 0x307   :  { %7296 = vmatprep.subr.bf16.mxu0 %v9744_v12  ;;  %v9786_v12 = vld [vmem:[%s13628_s5 + $0xb5c] ss:$12 sps:$4 sm:$0xff]  }
 0x309   :  { %7256 = vmatpush1.bf16.msra.mxu1 %v9739_v21  ;;  %v646_v21 = vrot.slane %v12417_v9, %v10523_v30 }
 0x30a   :  { %7297 = vmatpush1.bf16.msra.mxu0 %v9742_v32  ;;  %7257 = vmatprep.subr.bf16.mxu1 %v9747_v27  ;;  %v654_v32 = vrot.slane %v12417_v9, %v11506_v44  ;;  %v2896_v27 = vadd.f32 %v11781_v0, %v626_v4  ;;  %v9792_v44 = vld [vmem:[%s13628_s5 + $0xb44] ss:$12 sps:$4 sm:$0xff]  }
 0x30b   :  { %7298 = vmatprep.subr.bf16.mxu0 %v9750_v38  ;;  %v9784_v38 = vld [vmem:[%s13628_s5 + $0xb58] ss:$12 sps:$4 sm:$0xff]   ;;  %v9802_v4 = vld [vmem:[%s13628_s5 + $0xe10] ss:$12 sps:$4 sm:$0xff]  }
 0x30c   :  { %v3021_v0 = vadd.f32 %v12040_v15, %v654_v32 }
 0x30d   :  { %7258 = vmatpush2.bf16.msra.mxu1 %v9745_v40  ;;  %v9789_v40 = vld [vmem:[%s13628_s5 + $0x9c4] ss:$12 sps:$4 sm:$0xff]  }
 0x30e   :  { %7299 = vmatpush2.bf16.msra.mxu0 %v9748_v52  ;;  %7259 = vmatprep.subr.bf16.mxu1 %v9753_v42  ;;  %v2937_v52 = vadd.f32 %v11789_v3, %v634_v8  ;;  %v2980_v42 = vadd.f32 %v12031_v23, %v646_v21  ;;  %v9790_v3 = vld [vmem:[%s13628_s5 + $0xb40] ss:$12 sps:$4 sm:$0xff]   ;;  %v9810_v8 = vld [vmem:[%s13628_s5 + $0xdfc] ss:$12 sps:$4 sm:$0xff]  }
 0x30f   :  { %7300 = vmatprep.subr.bf16.mxu0 %v9756_v43  ;;  %v9787_v43 = vld [vmem:[%s13628_s5 + $0x9c0] ss:$12 sps:$4 sm:$0xff]  }
 0x310   :  { %v9798_v23 = vld [vmem:[%s13628_s5 + $0xe2c] ss:$12 sps:$4 sm:$0xff]   ;;  %v3124_v15 = vmax.f32 %v2980_v42, 0.0 }
 0x311   :  { %7260 = vmatpush2.bf16.msra.mxu1 %v9751_v49  ;;  %v3119_v49 = vmax.f32 %v2896_v27, 0.0  ;;  %v9811_v42 = vld [vmem:[%s13628_s5 + $0xc60] ss:$12 sps:$4 sm:$0xff]  }
 0x312   :  { %7301 = vmatpush2.bf16.msra.mxu0 %v9754_v50  ;;  %7261 = vmatprep.subr.bf16.mxu1 %v9759_v16  ;;  %v9795_v50 = vld [vmem:[%s13628_s5 + $0xcac] ss:$12 sps:$4 sm:$0xff]   ;;  %v3121_v16 = vmax.f32 %v2937_v52, 0.0 }
 0x313   :  { %7302 = vmatprep.subr.bf16.mxu0 %v9762_v47  ;;  %v3126_v47 = vmax.f32 %v3021_v0, 0.0  ;;  %v9814_v0 = vld [vmem:[%s13628_s5 + $0xde0] ss:$12 sps:$4 sm:$0xff]  }
 0x315   :  { %7262 = vmatpush2.bf16.msra.mxu1 %v9757_v51  ;;  %v9793_v51 = vld [vmem:[%s13628_s5 + $0xca8] ss:$12 sps:$4 sm:$0xff]  }
 0x316   :  { %7303 = vmatpush2.bf16.msra.mxu0 %v9760_v55  ;;  %7263 = vmatprep.subr.bf16.mxu1 %v9765_v48  ;;  %v12457_v55 = vpack.c.bf16 %v3119_v49, %v3119_v49  ;;  %v9796_v48 = vld [vmem:[%s13628_s5 + $0xe28] ss:$12 sps:$4 sm:$0xff]   ;;  %v9822_v49 = vld [vmem:[%s13628_s5 + $0xdcc] ss:$12 sps:$4 sm:$0xff]  }
 0x317   :  { %7304 = vmatprep.subr.bf16.mxu0 %v9768_v17  ;;  %v12462_v17 = vpack.c.bf16 %v3121_v16, %v3121_v16  ;;  %v9825_v16 = vld [vmem:[%s13628_s5 + $0xc34] ss:$12 sps:$4 sm:$0xff]  }
 0x319   :  { %7264 = vmatpush2.bf16.msra.mxu1 %v9763_v56  ;;  %v9801_v56 = vld [vmem:[%s13628_s5 + $0xc94] ss:$12 sps:$4 sm:$0xff]  }
 0x31a   :  { %7305 = vmatpush2.bf16.msra.mxu0 %v9766_v18  ;;  %7265 = vmatprep.subr.bf16.mxu1 %v9771_v46  ;;  %v12467_v18 = vpack.c.bf16 %v3124_v15, %v3124_v15  ;;  %v9823_v15 = vld [vmem:[%s13628_s5 + $0xc30] ss:$12 sps:$4 sm:$0xff]  }
 0x31b   :  { %7306 = vmatprep.subr.bf16.mxu0 %v9774_v57  ;;  %v9804_v57 = vld [vmem:[%s13628_s5 + $0xe14] ss:$12 sps:$4 sm:$0xff]  }
 0x31d   :  { %7266 = vmatpush2.bf16.msra.mxu1 %v9769_v53  ;;  %v12473_v53 = vpack.c.bf16 %v3126_v47, %v3126_v47  ;;  %v9826_v47 = vld [vmem:[%s13628_s5 + $0xdb0] ss:$12 sps:$4 sm:$0xff]  }
 0x31e   :  { %7307 = vmatpush2.bf16.msra.mxu0 %v9772_v11  ;;  %7267 = vmatprep.subr.bf16.mxu1 %v9777_v58  ;;  %v9799_v58 = vld [vmem:[%s13628_s5 + $0xc90] ss:$12 sps:$4 sm:$0xff]  }
 0x31f   :  { %7308 = vmatprep.subr.bf16.mxu0 %v9780_v61 }
 0x321   :  { %7268 = vmatpush2.bf16.msra.mxu1 %v9775_v14 }
 0x322   :  { %7309 = vmatpush2.bf16.msra.mxu0 %v9778_v22  ;;  %7269 = vmatprep.subr.bf16.mxu1 %v9783_v5  ;;  %v9807_v22 = vld [vmem:[%s13628_s5 + $0xc7c] ss:$12 sps:$4 sm:$0xff]  }
 0x323   :  { %7310 = vmatprep.subr.bf16.mxu0 %v9786_v12 }
 0x325   :  { %7270 = vmatpush2.bf16.msra.mxu1 %v9781_v37  ;;  %v9805_v37 = vld [vmem:[%s13628_s5 + $0xc78] ss:$12 sps:$4 sm:$0xff]  }
 0x326   :  { %7311 = vmatpush2.bf16.msra.mxu0 %v9784_v38  ;;  %7271 = vmatprep.subr.bf16.mxu1 %v9789_v40  ;;  %v9808_v38 = vld [vmem:[%s13628_s5 + $0xdf8] ss:$12 sps:$4 sm:$0xff]  }
 0x327   :  { %7312 = vmatprep.subr.bf16.mxu0 %v9792_v44  ;;  %v9813_v40 = vld [vmem:[%s13628_s5 + $0xc64] ss:$12 sps:$4 sm:$0xff]  }
 0x328   :  { %v9816_v44 = vld [vmem:[%s13628_s5 + $0xde4] ss:$12 sps:$4 sm:$0xff]  }
 0x329   :  { %7272 = vmatpush2.bf16.msra.mxu1 %v9787_v43  ;;  %v9819_v43 = vld [vmem:[%s13628_s5 + $0xc4c] ss:$12 sps:$4 sm:$0xff]  }
 0x32a   :  { %7313 = vmatpush2.bf16.msra.mxu0 %v9790_v3  ;;  %7323 = vmatprep.subr.bf16.mxu1 %v9795_v50  ;;  %v9817_v3 = vld [vmem:[%s13628_s5 + $0xc48] ss:$12 sps:$4 sm:$0xff]  }
 0x32b   :  { %7364 = vmatprep.subr.bf16.mxu0 %v9798_v23  ;;  %v9820_v50 = vld [vmem:[%s13628_s5 + $0xdc8] ss:$12 sps:$4 sm:$0xff]  }
 0x32c   :  { %v7029_v46 = vpop.f32.mrf.mxu1  ;;  %7274 = vmatmul.mubr.bf16.vlgmr.msra.gmra.mxu1 %v12457_v55  ;;  %v9828_v23 = vld [vmem:[%s13628_s5 + $0xdb4] ss:$12 sps:$4 sm:$0xff]  }
 0x32d   :  { %v7070_v11 = vpop.f32.mrf.mxu0  ;;  %7315 = vmatmul.mubr.bf16.vlgmr.msra.gmra.mxu0 %v12462_v17  ;;  %7324 = vmatpush1.bf16.msra.mxu1 %v9793_v51  ;;  %v9831_v51 = vld [vmem:[%s13628_s5 + $0xc1c] ss:$12 sps:$4 sm:$0xff]  }
 0x32e   :  { %v12479_v61 = vadd.f32 %v7070_v11, %v7029_v46  ;;  %7355 = vmatprep.mubr.bf16.mxu1 %v12467_v18  ;;  %7365 = vmatpush1.bf16.msra.mxu0 %v9796_v48  ;;  %v7031_v14 = vpop.f32.mrf.mxu1  ;;  %v9834_v48 = vld [vmem:[%s13628_s5 + $0xd9c] ss:$12 sps:$4 sm:$0xff]   ;;  %v9832_v46 = vld [vmem:[%s13628_s5 + $0xd98] ss:$12 sps:$4 sm:$0xff]  }
 0x32f   :  { %7396 = vmatprep.mubr.bf16.mxu0 %v12473_v53  ;;  %v7072_v5 = vpop.f32.mrf.mxu0  ;;  %7325 = vmatprep.subr.bf16.mxu1 %v9801_v56  ;;  %v9829_v56 = vld [vmem:[%s13628_s5 + $0xc18] ss:$12 sps:$4 sm:$0xff]  }
 0x330   :  { %v12492_v12 = vadd.f32 %v7072_v5, %v7031_v14  ;;  %v7033_v21 = vpop.f32.mrf.mxu1  ;;  %7366 = vmatprep.subr.bf16.mxu0 %v9804_v57  ;;  %v9837_v57 = vld [vmem:[%s13628_s5 + $0xc04] ss:$12 sps:$4 sm:$0xff]   ;;  %v9838_v14 = vld [vmem:[%s13628_s5 + $0xd80] ss:$12 sps:$4 sm:$0xff]   ;;  %v9841_v5 = vld [vmem:[%s13628_s5 + $0xd68] ss:$12 sps:$4 sm:$0xff]  }
 0x331   :  { %v7074_v32 = vpop.f32.mrf.mxu0  ;;  %7326 = vmatpush1.bf16.msra.mxu1 %v9799_v58  ;;  %v9840_v11 = vld [vmem:[%s13628_s5 + $0xd84] ss:$12 sps:$4 sm:$0xff]   ;;  %v9835_v58 = vld [vmem:[%s13628_s5 + $0xc00] ss:$12 sps:$4 sm:$0xff]  }
 0x332   :  { %7367 = vmatpush1.bf16.msra.mxu0 %v9802_v4  ;;  %v7034_v27 = vpop.f32.mrf.mxu1  ;;  %7327 = vmatprep.subr.bf16.mxu1 %v9807_v22  ;;  %v9843_v4 = vld [vmem:[%s13628_s5 + $0xd6c] ss:$12 sps:$4 sm:$0xff]   ;;  %v9849_v21 = vld [vmem:[%s13628_s5 + $0xd54] ss:$12 sps:$4 sm:$0xff]  }
 0x333   :  { %v7075_v52 = vpop.f32.mrf.mxu0  ;;  %7368 = vmatprep.subr.bf16.mxu0 %v9810_v8  ;;  %v9846_v22 = vld [vmem:[%s13628_s5 + $0xeec] ss:$12 sps:$4 sm:$0xff]   ;;  %v9844_v8 = vld [vmem:[%s13628_s5 + $0xee8] ss:$12 sps:$4 sm:$0xff]   ;;  %v9850_v27 = vld [vmem:[%s13628_s5 + $0xed0] ss:$12 sps:$4 sm:$0xff]  }
 0x334   :  { %v9852_v32 = vld [vmem:[%s13628_s5 + $0xed4] ss:$12 sps:$4 sm:$0xff]   ;;  %v9853_v52 = vld [vmem:[%s13628_s5 + $0xd38] ss:$12 sps:$4 sm:$0xff]  }
 0x335   :  { %7328 = vmatpush1.bf16.msra.mxu1 %v9805_v37  ;;  %v9847_v37 = vld [vmem:[%s13628_s5 + $0xd50] ss:$12 sps:$4 sm:$0xff]  }
 0x336   :  { %7369 = vmatpush1.bf16.msra.mxu0 %v9808_v38  ;;  %7329 = vmatprep.subr.bf16.mxu1 %v9813_v40  ;;  %v9855_v38 = vld [vmem:[%s13628_s5 + $0xd3c] ss:$12 sps:$4 sm:$0xff]  }
 0x337   :  { %7370 = vmatprep.subr.bf16.mxu0 %v9816_v44  ;;  %v9858_v40 = vld [vmem:[%s13628_s5 + $0xebc] ss:$12 sps:$4 sm:$0xff]   ;;  %v9856_v44 = vld [vmem:[%s13628_s5 + $0xeb8] ss:$12 sps:$4 sm:$0xff]  }
 0x339   :  { %7330 = vmatpush1.bf16.msra.mxu1 %v9811_v42  ;;  %v9861_v42 = vld [vmem:[%s13628_s5 + $0xd24] ss:$12 sps:$4 sm:$0xff]  }
 0x33a   :  { %7371 = vmatpush1.bf16.msra.mxu0 %v9814_v0  ;;  %7331 = vmatprep.subr.bf16.mxu1 %v9819_v43  ;;  %v9864_v0 = vld [vmem:[%s13628_s5 + $0xea4] ss:$12 sps:$4 sm:$0xff]   ;;  %v9859_v43 = vld [vmem:[%s13628_s5 + $0xd20] ss:$12 sps:$4 sm:$0xff]  }
 0x33b   :  { %7372 = vmatprep.subr.bf16.mxu0 %v9822_v49  ;;  %v9862_v49 = vld [vmem:[%s13628_s5 + $0xea0] ss:$12 sps:$4 sm:$0xff]  }
 0x33d   :  { %7332 = vmatpush1.bf16.msra.mxu1 %v9817_v3  ;;  %v9867_v3 = vld [vmem:[%s13628_s5 + $0xd0c] ss:$12 sps:$4 sm:$0xff]  }
 0x33e   :  { %7373 = vmatpush1.bf16.msra.mxu0 %v9820_v50  ;;  %7333 = vmatprep.subr.bf16.mxu1 %v9825_v16  ;;  %v9870_v50 = vld [vmem:[%s13628_s5 + $0xe8c] ss:$12 sps:$4 sm:$0xff]   ;;  %v9865_v16 = vld [vmem:[%s13628_s5 + $0xd08] ss:$12 sps:$4 sm:$0xff]  }
 0x33f   :  { %7374 = vmatprep.subr.bf16.mxu0 %v9828_v23  ;;  %v9868_v23 = vld [vmem:[%s13628_s5 + $0xe88] ss:$12 sps:$4 sm:$0xff]  }
 0x341   :  { %7334 = vmatpush1.bf16.msra.mxu1 %v9823_v15  ;;  %v9873_v15 = vld [vmem:[%s13628_s5 + $0xcf4] ss:$12 sps:$4 sm:$0xff]  }
 0x342   :  { %7375 = vmatpush1.bf16.msra.mxu0 %v9826_v47  ;;  %7335 = vmatprep.subr.bf16.mxu1 %v9831_v51  ;;  %v9876_v47 = vld [vmem:[%s13628_s5 + $0xe74] ss:$12 sps:$4 sm:$0xff]   ;;  %v9871_v51 = vld [vmem:[%s13628_s5 + $0xcf0] ss:$12 sps:$4 sm:$0xff]  }
 0x343   :  { %7376 = vmatprep.subr.bf16.mxu0 %v9834_v48  ;;  %v642_v48 = vrot.slane %v12417_v9, %v10520_v29 }
 0x345   :  { %7336 = vmatpush1.bf16.msra.mxu1 %v9829_v56  ;;  %v9874_v56 = vld [vmem:[%s13628_s5 + $0xe70] ss:$12 sps:$4 sm:$0xff]  }
 0x346   :  { %7377 = vmatpush1.bf16.msra.mxu0 %v9832_v46  ;;  %7337 = vmatprep.subr.bf16.mxu1 %v9837_v57  ;;  %v9879_v46 = vld [vmem:[%s13628_s5 + $0xcdc] ss:$12 sps:$4 sm:$0xff]   ;;  %v650_v57 = vrot.slane %v12417_v9, %v11707_v24  ;;  %v9880_v24 = vld [vmem:[%s13628_s5 + $0xe58] ss:$12 sps:$4 sm:$0xff]  }
 0x347   :  { %7378 = vmatprep.subr.bf16.mxu0 %v9840_v11  ;;  %v9882_v11 = vld [vmem:[%s13628_s5 + $0xe5c] ss:$12 sps:$4 sm:$0xff]  }
 0x349   :  { %7338 = vmatpush1.bf16.msra.mxu1 %v9835_v58  ;;  %v662_v58 = vrot.slane %v12417_v9, %v11713_v26  ;;  %v9885_v26 = vld [vmem:[%s13628_s5 + $0xcc4] ss:$12 sps:$4 sm:$0xff]  }
 0x34a   :  { %7379 = vmatpush1.bf16.msra.mxu0 %v9838_v14  ;;  %7339 = vmatprep.subr.bf16.mxu1 %v9843_v4  ;;  %v670_v14 = vrot.slane %v12417_v9, %v11716_v28  ;;  %v9877_v4 = vld [vmem:[%s13628_s5 + $0xcd8] ss:$12 sps:$4 sm:$0xff]  }
 0x34b   :  { %7380 = vmatprep.subr.bf16.mxu0 %v9846_v22  ;;  %v2978_v22 = vadd.f32 %v12016_v1, %v642_v48  ;;  %v9888_v28 = vld [vmem:[%s13628_s5 + $0xe44] ss:$12 sps:$4 sm:$0xff]  }
 0x34c   :  { %v3103_v1 = vadd.f32 %v12264_v41, %v670_v14 }
 0x34d   :  { %7340 = vmatpush2.bf16.msra.mxu1 %v9841_v5  ;;  %v3019_v5 = vadd.f32 %v12024_v7, %v650_v57  ;;  %v9886_v7 = vld [vmem:[%s13628_s5 + $0xe40] ss:$12 sps:$4 sm:$0xff]   ;;  %v9906_v57 = vld [vmem:[%s13628_s5 + $0x10fc] ss:$12 sps:$4 sm:$0xff]  }
 0x34e   :  { %7381 = vmatpush2.bf16.msra.mxu0 %v9844_v8  ;;  %7341 = vmatprep.subr.bf16.mxu1 %v9849_v21  ;;  %v3062_v8 = vadd.f32 %v12255_v39, %v662_v58  ;;  %v9883_v21 = vld [vmem:[%s13628_s5 + $0xcc0] ss:$12 sps:$4 sm:$0xff]  }
 0x34f   :  { %7382 = vmatprep.subr.bf16.mxu0 %v9852_v32  ;;  %v3123_v32 = vmax.f32 %v2978_v22, 0.0  ;;  %v9894_v39 = vld [vmem:[%s13628_s5 + $0x112c] ss:$12 sps:$4 sm:$0xff]  }
 0x350   :  { %v3128_v41 = vmax.f32 %v3062_v8, 0.0  ;;  %v9910_v8 = vld [vmem:[%s13628_s5 + $0x10e0] ss:$12 sps:$4 sm:$0xff]  }
 0x351   :  { %7342 = vmatpush2.bf16.msra.mxu1 %v9847_v37  ;;  %v9891_v37 = vld [vmem:[%s13628_s5 + $0xfac] ss:$12 sps:$4 sm:$0xff]  }
 0x352   :  { %7383 = vmatpush2.bf16.msra.mxu0 %v9850_v27  ;;  %7343 = vmatprep.subr.bf16.mxu1 %v9855_v38  ;;  %v3125_v27 = vmax.f32 %v3019_v5, 0.0  ;;  %v3130_v38 = vmax.f32 %v3103_v1, 0.0  ;;  %v9912_v5 = vld [vmem:[%s13628_s5 + $0x10e4] ss:$12 sps:$4 sm:$0xff]   ;;  %v9915_v1 = vld [vmem:[%s13628_s5 + $0xf4c] ss:$12 sps:$4 sm:$0xff]  }
 0x353   :  { %7384 = vmatprep.subr.bf16.mxu0 %v9858_v40  ;;  %v9889_v40 = vld [vmem:[%s13628_s5 + $0xfa8] ss:$12 sps:$4 sm:$0xff]  }
 0x355   :  { %7344 = vmatpush2.bf16.msra.mxu1 %v9853_v52  ;;  %v12677_v52 = vpack.c.bf16 %v3123_v32, %v3123_v32  ;;  %v9913_v32 = vld [vmem:[%s13628_s5 + $0xf48] ss:$12 sps:$4 sm:$0xff]  }
 0x356   :  { %7385 = vmatpush2.bf16.msra.mxu0 %v9856_v44  ;;  %7345 = vmatprep.subr.bf16.mxu1 %v9861_v42  ;;  %v9892_v44 = vld [vmem:[%s13628_s5 + $0x1128] ss:$12 sps:$4 sm:$0xff]   ;;  %v12682_v42 = vpack.c.bf16 %v3125_v27, %v3125_v27 }
 0x357   :  { %7386 = vmatprep.subr.bf16.mxu0 %v9864_v0  ;;  %v9897_v0 = vld [vmem:[%s13628_s5 + $0xf94] ss:$12 sps:$4 sm:$0xff]  }
 0x358   :  { %v9924_v27 = vld [vmem:[%s13628_s5 + $0x10b4] ss:$12 sps:$4 sm:$0xff]  }
 0x359   :  { %7346 = vmatpush2.bf16.msra.mxu1 %v9859_v43  ;;  %v12687_v43 = vpack.c.bf16 %v3128_v41, %v3128_v41  ;;  %v9922_v41 = vld [vmem:[%s13628_s5 + $0x10b0] ss:$12 sps:$4 sm:$0xff]  }
 0x35a   :  { %7387 = vmatpush2.bf16.msra.mxu0 %v9862_v49  ;;  %7347 = vmatprep.subr.bf16.mxu1 %v9867_v3  ;;  %v9900_v3 = vld [vmem:[%s13628_s5 + $0x1114] ss:$12 sps:$4 sm:$0xff]  }
 0x35b   :  { %7388 = vmatprep.subr.bf16.mxu0 %v9870_v50  ;;  %v12693_v50 = vpack.c.bf16 %v3130_v38, %v3130_v38  ;;  %v9927_v38 = vld [vmem:[%s13628_s5 + $0xf1c] ss:$12 sps:$4 sm:$0xff]  }
 0x35d   :  { %7348 = vmatpush2.bf16.msra.mxu1 %v9865_v16 }
 0x35e   :  { %7389 = vmatpush2.bf16.msra.mxu0 %v9868_v23  ;;  %7349 = vmatprep.subr.bf16.mxu1 %v9873_v15  ;;  %v9895_v15 = vld [vmem:[%s13628_s5 + $0xf90] ss:$12 sps:$4 sm:$0xff]  }
 0x35f   :  { %7390 = vmatprep.subr.bf16.mxu0 %v9876_v47 }
 0x361   :  { %7350 = vmatpush2.bf16.msra.mxu1 %v9871_v51  ;;  %v9898_v51 = vld [vmem:[%s13628_s5 + $0x1110] ss:$12 sps:$4 sm:$0xff]  }
 0x362   :  { %7391 = vmatpush2.bf16.msra.mxu0 %v9874_v56  ;;  %7351 = vmatprep.subr.bf16.mxu1 %v9879_v46 }
 0x363   :  { %7392 = vmatprep.subr.bf16.mxu0 %v9882_v11 }
 0x365   :  { %7352 = vmatpush2.bf16.msra.mxu1 %v9877_v4  ;;  %v9901_v4 = vld [vmem:[%s13628_s5 + $0xf78] ss:$12 sps:$4 sm:$0xff]  }
 0x366   :  { %7393 = vmatpush2.bf16.msra.mxu0 %v9880_v24  ;;  %7353 = vmatprep.subr.bf16.mxu1 %v9885_v26  ;;  %v9909_v24 = vld [vmem:[%s13628_s5 + $0xf64] ss:$12 sps:$4 sm:$0xff]  }
 0x367   :  { %7394 = vmatprep.subr.bf16.mxu0 %v9888_v28  ;;  %v9907_v28 = vld [vmem:[%s13628_s5 + $0xf60] ss:$12 sps:$4 sm:$0xff]  }
 0x369   :  { %7354 = vmatpush2.bf16.msra.mxu1 %v9883_v21  ;;  %v9918_v21 = vld [vmem:[%s13628_s5 + $0x10cc] ss:$12 sps:$4 sm:$0xff]  }
 0x36a   :  { %7395 = vmatpush2.bf16.msra.mxu0 %v9886_v7  ;;  %7405 = vmatprep.subr.bf16.mxu1 %v9891_v37  ;;  %v9916_v7 = vld [vmem:[%s13628_s5 + $0x10c8] ss:$12 sps:$4 sm:$0xff]  }
 0x36b   :  { %7446 = vmatprep.subr.bf16.mxu0 %v9894_v39  ;;  %v9921_v37 = vld [vmem:[%s13628_s5 + $0xf34] ss:$12 sps:$4 sm:$0xff]   ;;  %v9919_v39 = vld [vmem:[%s13628_s5 + $0xf30] ss:$12 sps:$4 sm:$0xff]  }
 0x36c   :  { %v7111_v49 = vpop.f32.mrf.mxu1  ;;  %7356 = vmatmul.mubr.bf16.vlgmr.msra.gmra.mxu1 %v12677_v52 }
 0x36d   :  { %v7112_v16 = vadd.f32 %v7111_v49, %v12479_v61  ;;  %v7152_v23 = vpop.f32.mrf.mxu0  ;;  %7397 = vmatmul.mubr.bf16.vlgmr.msra.gmra.mxu0 %v12682_v42  ;;  %7406 = vmatpush1.bf16.msra.mxu1 %v9889_v40  ;;  %v9903_v61 = vld [vmem:[%s13628_s5 + $0xf7c] ss:$12 sps:$4 sm:$0xff]   ;;  %v9933_v49 = vld [vmem:[%s13628_s5 + $0xf04] ss:$12 sps:$4 sm:$0xff]  }
 0x36e   :  { %7437 = vmatprep.mubr.bf16.mxu1 %v12687_v43  ;;  %7447 = vmatpush1.bf16.msra.mxu0 %v9892_v44  ;;  %v7113_v47 = vpop.f32.mrf.mxu1  ;;  %v9930_v40 = vld [vmem:[%s13628_s5 + $0x109c] ss:$12 sps:$4 sm:$0xff]   ;;  %v9925_v44 = vld [vmem:[%s13628_s5 + $0xf18] ss:$12 sps:$4 sm:$0xff]  }
 0x36f   :  { %v12707_v48 = vadd.f32 %v7152_v23, %v7112_v16  ;;  %7478 = vmatprep.mubr.bf16.mxu0 %v12693_v50  ;;  %v7114_v56 = vadd.f32 %v7113_v47, %v12492_v12  ;;  %v7154_v46 = vpop.f32.mrf.mxu0  ;;  %7407 = vmatprep.subr.bf16.mxu1 %v9897_v0  ;;  %v9904_v12 = vld [vmem:[%s13628_s5 + $0x10f8] ss:$12 sps:$4 sm:$0xff]   ;;  %v9931_v16 = vld [vmem:[%s13628_s5 + $0xf00] ss:$12 sps:$4 sm:$0xff]  }
 0x370   :  { %v7115_v11 = vpop.f32.mrf.mxu1  ;;  %7448 = vmatprep.subr.bf16.mxu0 %v9900_v3  ;;  %v9928_v0 = vld [vmem:[%s13628_s5 + $0x1098] ss:$12 sps:$4 sm:$0xff]   ;;  %v9934_v23 = vld [vmem:[%s13628_s5 + $0x1080] ss:$12 sps:$4 sm:$0xff]  }
 0x371   :  { %v12714_v58 = vadd.f32 %v7154_v46, %v7114_v56  ;;  %v7156_v14 = vpop.f32.mrf.mxu0  ;;  %7408 = vmatpush1.bf16.msra.mxu1 %v9895_v15  ;;  %v9936_v3 = vld [vmem:[%s13628_s5 + $0x1084] ss:$12 sps:$4 sm:$0xff]   ;;  %v9939_v15 = vld [vmem:[%s13628_s5 + $0x106c] ss:$12 sps:$4 sm:$0xff]   ;;  %v9945_v56 = vld [vmem:[%s13628_s5 + $0x1054] ss:$12 sps:$4 sm:$0xff]  }
 0x372   :  { %7449 = vmatpush1.bf16.msra.mxu0 %v9898_v51  ;;  %v7116_v22 = vpop.f32.mrf.mxu1  ;;  %7409 = vmatprep.subr.bf16.mxu1 %v9903_v61  ;;  %v9942_v47 = vld [vmem:[%s13628_s5 + $0x11ec] ss:$12 sps:$4 sm:$0xff]   ;;  %v9937_v51 = vld [vmem:[%s13628_s5 + $0x1068] ss:$12 sps:$4 sm:$0xff]   ;;  %v9946_v11 = vld [vmem:[%s13628_s5 + $0x11d0] ss:$12 sps:$4 sm:$0xff]  }
 0x373   :  { %v7157_v26 = vpop.f32.mrf.mxu0  ;;  %7450 = vmatprep.subr.bf16.mxu0 %v9906_v57  ;;  %v9940_v61 = vld [vmem:[%s13628_s5 + $0x11e8] ss:$12 sps:$4 sm:$0xff]   ;;  %v9943_v57 = vld [vmem:[%s13628_s5 + $0x1050] ss:$12 sps:$4 sm:$0xff]   ;;  %v9949_v22 = vld [vmem:[%s13628_s5 + $0x1038] ss:$12 sps:$4 sm:$0xff]  }
 0x374   :  { %v9948_v46 = vld [vmem:[%s13628_s5 + $0x11d4] ss:$12 sps:$4 sm:$0xff]   ;;  %v9951_v14 = vld [vmem:[%s13628_s5 + $0x103c] ss:$12 sps:$4 sm:$0xff]   ;;  %v9960_v26 = vld [vmem:[%s13628_s5 + $0x11a4] ss:$12 sps:$4 sm:$0xff]  }
 0x375   :  { %7410 = vmatpush1.bf16.msra.mxu1 %v9901_v4  ;;  %v9954_v4 = vld [vmem:[%s13628_s5 + $0x11bc] ss:$12 sps:$4 sm:$0xff]  }
 0x376   :  { %7451 = vmatpush1.bf16.msra.mxu0 %v9904_v12  ;;  %7411 = vmatprep.subr.bf16.mxu1 %v9909_v24  ;;  %v9952_v12 = vld [vmem:[%s13628_s5 + $0x11b8] ss:$12 sps:$4 sm:$0xff]  }
 0x377   :  { %7452 = vmatprep.subr.bf16.mxu0 %v9912_v5  ;;  %v9957_v24 = vld [vmem:[%s13628_s5 + $0x1024] ss:$12 sps:$4 sm:$0xff]   ;;  %v9955_v5 = vld [vmem:[%s13628_s5 + $0x1020] ss:$12 sps:$4 sm:$0xff]  }
 0x379   :  { %7412 = vmatpush1.bf16.msra.mxu1 %v9907_v28  ;;  %v9958_v28 = vld [vmem:[%s13628_s5 + $0x11a0] ss:$12 sps:$4 sm:$0xff]  }
 0x37a   :  { %7453 = vmatpush1.bf16.msra.mxu0 %v9910_v8  ;;  %7413 = vmatprep.subr.bf16.mxu1 %v9915_v1  ;;  %v9963_v8 = vld [vmem:[%s13628_s5 + $0x100c] ss:$12 sps:$4 sm:$0xff]  }
 0x37b   :  { %7454 = vmatprep.subr.bf16.mxu0 %v9918_v21  ;;  %v9966_v1 = vld [vmem:[%s13628_s5 + $0x118c] ss:$12 sps:$4 sm:$0xff]   ;;  %v9961_v21 = vld [vmem:[%s13628_s5 + $0x1008] ss:$12 sps:$4 sm:$0xff]  }
 0x37d   :  { %7414 = vmatpush1.bf16.msra.mxu1 %v9913_v32  ;;  %v9964_v32 = vld [vmem:[%s13628_s5 + $0x1188] ss:$12 sps:$4 sm:$0xff]  }
 0x37e   :  { %7455 = vmatpush1.bf16.msra.mxu0 %v9916_v7  ;;  %7415 = vmatprep.subr.bf16.mxu1 %v9921_v37  ;;  %v9969_v7 = vld [vmem:[%s13628_s5 + $0xff4] ss:$12 sps:$4 sm:$0xff]  }
 0x37f   :  { %7456 = vmatprep.subr.bf16.mxu0 %v9924_v27  ;;  %v9972_v37 = vld [vmem:[%s13628_s5 + $0x1174] ss:$12 sps:$4 sm:$0xff]   ;;  %v9967_v27 = vld [vmem:[%s13628_s5 + $0xff0] ss:$12 sps:$4 sm:$0xff]  }
 0x381   :  { %7416 = vmatpush1.bf16.msra.mxu1 %v9919_v39  ;;  %v658_v39 = vrot.slane %v12417_v9, %v11934_v20  ;;  %v9973_v20 = vld [vmem:[%s13628_s5 + $0xfd8] ss:$12 sps:$4 sm:$0xff]  }
 0x382   :  { %7457 = vmatpush1.bf16.msra.mxu0 %v9922_v41  ;;  %7417 = vmatprep.subr.bf16.mxu1 %v9927_v38  ;;  %v9970_v41 = vld [vmem:[%s13628_s5 + $0x1170] ss:$12 sps:$4 sm:$0xff]  }
 0x383   :  { %7458 = vmatprep.subr.bf16.mxu0 %v9930_v40  ;;  %v9975_v38 = vld [vmem:[%s13628_s5 + $0xfdc] ss:$12 sps:$4 sm:$0xff]   ;;  %v666_v40 = vrot.slane %v12417_v9, %v11943_v31  ;;  %v9981_v31 = vld [vmem:[%s13628_s5 + $0xfc4] ss:$12 sps:$4 sm:$0xff]  }
 0x385   :  { %7418 = vmatpush1.bf16.msra.mxu1 %v9925_v44  ;;  %v9978_v44 = vld [vmem:[%s13628_s5 + $0x115c] ss:$12 sps:$4 sm:$0xff]   ;;  %v3101_v9 = vadd.f32 %v12248_v36, %v666_v40 }
 0x386   :  { %7459 = vmatpush1.bf16.msra.mxu0 %v9928_v0  ;;  %7419 = vmatprep.subr.bf16.mxu1 %v9933_v49  ;;  %v3060_v0 = vadd.f32 %v12240_v34, %v658_v39  ;;  %v9976_v49 = vld [vmem:[%s13628_s5 + $0x1158] ss:$12 sps:$4 sm:$0xff]   ;;  %v9979_v34 = vld [vmem:[%s13628_s5 + $0xfc0] ss:$12 sps:$4 sm:$0xff]   ;;  %v9985_v36 = vld [vmem:[%s13628_s5 + $0x170] ss:$12 sps:$4 sm:$0xff]  }
 0x387   :  { %7460 = vmatprep.subr.bf16.mxu0 %v9936_v3  ;;  %v9984_v3 = vld [vmem:[%s13628_s5 + $0x1144] ss:$12 sps:$4 sm:$0xff]   ;;  %v9998_v39 = vld [vmem:[%s13628_s5 + $0x2a8] ss:$12 sps:$4 sm:$0xff]  }
 0x388   :  { %v10001_v40 = vld [vmem:[%s13628_s5 + $0x110] ss:$12 sps:$4 sm:$0xff]  }
 0x389   :  { %7420 = vmatpush1.bf16.msra.mxu1 %v9931_v16  ;;  %v3127_v16 = vmax.f32 %v3060_v0, 0.0  ;;  %v10004_v0 = vld [vmem:[%s13628_s5 + $0x1d0] ss:$12 sps:$4 sm:$0xff]  }
 0x38a   :  { %7461 = vmatpush1.bf16.msra.mxu0 %v9934_v23  ;;  %7421 = vmatprep.subr.bf16.mxu1 %v9939_v15  ;;  %v9982_v23 = vld [vmem:[%s13628_s5 + $0x1140] ss:$12 sps:$4 sm:$0xff]   ;;  %v3129_v15 = vmax.f32 %v3101_v9, 0.0  ;;  %v10007_v9 = vld [vmem:[%s13628_s5 + $0x38] ss:$12 sps:$4 sm:$0xff]  }
 0x38b   :  { %7462 = vmatprep.subr.bf16.mxu0 %v9942_v47  ;;  %v9986_v47 = vld [vmem:[%s13628_s5 + $0x2f0] ss:$12 sps:$4 sm:$0xff]  }
 0x38d   :  { %7422 = vmatpush2.bf16.msra.mxu1 %v9937_v51  ;;  %v9987_v51 = vld [vmem:[%s13628_s5 + $0xb0] ss:$12 sps:$4 sm:$0xff]  }
 0x38e   :  { %7463 = vmatpush2.bf16.msra.mxu0 %v9940_v61  ;;  %7423 = vmatprep.subr.bf16.mxu1 %v9945_v56  ;;  %v12893_v61 = vpack.c.bf16 %v3127_v16, %v3127_v16  ;;  %v9988_v56 = vld [vmem:[%s13628_s5 + $0x230] ss:$12 sps:$4 sm:$0xff]   ;;  %v10010_v16 = vld [vmem:[%s13628_s5 + $0x260] ss:$12 sps:$4 sm:$0xff]  }
 0x38f   :  { %7464 = vmatprep.subr.bf16.mxu0 %v9948_v46  ;;  %v12898_v46 = vpack.c.bf16 %v3129_v15, %v3129_v15  ;;  %v10013_v15 = vld [vmem:[%s13628_s5 + $0xc8] ss:$12 sps:$4 sm:$0xff]  }
 0x391   :  { %7424 = vmatpush2.bf16.msra.mxu1 %v9943_v57  ;;  %v9989_v57 = vld [vmem:[%s13628_s5 + $0x158] ss:$12 sps:$4 sm:$0xff]  }
 0x392   :  { %7465 = vmatpush2.bf16.msra.mxu0 %v9946_v11  ;;  %7425 = vmatprep.subr.bf16.mxu1 %v9951_v14  ;;  %v9990_v14 = vld [vmem:[%s13628_s5 + $0x2d8] ss:$12 sps:$4 sm:$0xff]  }
 0x393   :  { %7466 = vmatprep.subr.bf16.mxu0 %v9954_v4 }
 0x395   :  { %7426 = vmatpush2.bf16.msra.mxu1 %v9949_v22 }
 0x396   :  { %7467 = vmatpush2.bf16.msra.mxu0 %v9952_v12  ;;  %7427 = vmatprep.subr.bf16.mxu1 %v9957_v24  ;;  %v9991_v12 = vld [vmem:[%s13628_s5 + $0x98] ss:$12 sps:$4 sm:$0xff]  }
 0x397   :  { %7468 = vmatprep.subr.bf16.mxu0 %v9960_v26  ;;  %v9992_v26 = vld [vmem:[%s13628_s5 + $0x218] ss:$12 sps:$4 sm:$0xff]  }
 0x399   :  { %7428 = vmatpush2.bf16.msra.mxu1 %v9955_v5 }
 0x39a   :  { %7469 = vmatpush2.bf16.msra.mxu0 %v9958_v28  ;;  %7429 = vmatprep.subr.bf16.mxu1 %v9963_v8 }
 0x39b   :  { %7470 = vmatprep.subr.bf16.mxu0 %v9966_v1 }
 0x39d   :  { %7430 = vmatpush2.bf16.msra.mxu1 %v9961_v21 }
 0x39e   :  { %7471 = vmatpush2.bf16.msra.mxu0 %v9964_v32  ;;  %7431 = vmatprep.subr.bf16.mxu1 %v9969_v7  ;;  %v9995_v7 = vld [vmem:[%s13628_s5 + $0x80] ss:$12 sps:$4 sm:$0xff]  }
 0x39f   :  { %7472 = vmatprep.subr.bf16.mxu0 %v9972_v37  ;;  %v9997_v37 = vld [vmem:[%s13628_s5 + $0x128] ss:$12 sps:$4 sm:$0xff]  }
 0x3a1   :  { %7432 = vmatpush2.bf16.msra.mxu1 %v9967_v27 }
 0x3a2   :  { %7473 = vmatpush2.bf16.msra.mxu0 %v9970_v41  ;;  %7433 = vmatprep.subr.bf16.mxu1 %v9975_v38  ;;  %v9999_v41 = vld [vmem:[%s13628_s5 + $0x68] ss:$12 sps:$4 sm:$0xff]  }
 0x3a3   :  { %7474 = vmatprep.subr.bf16.mxu0 %v9978_v44  ;;  %v10000_v38 = vld [vmem:[%s13628_s5 + $0x1e8] ss:$12 sps:$4 sm:$0xff]   ;;  %v10002_v44 = vld [vmem:[%s13628_s5 + $0x290] ss:$12 sps:$4 sm:$0xff]  }
 0x3a5   :  { %7434 = vmatpush2.bf16.msra.mxu1 %v9973_v20  ;;  %v10003_v20 = vld [vmem:[%s13628_s5 + $0x50] ss:$12 sps:$4 sm:$0xff]  }
 0x3a6   :  { %7475 = vmatpush2.bf16.msra.mxu0 %v9976_v49  ;;  %7435 = vmatprep.subr.bf16.mxu1 %v9981_v31  ;;  %v10005_v49 = vld [vmem:[%s13628_s5 + $0xf8] ss:$12 sps:$4 sm:$0xff]  }
 0x3a7   :  { %7476 = vmatprep.subr.bf16.mxu0 %v9984_v3  ;;  %v10006_v31 = vld [vmem:[%s13628_s5 + $0x278] ss:$12 sps:$4 sm:$0xff]  }
 0x3a8   :  { %v10008_v3 = vld [vmem:[%s13628_s5 + $0x1b8] ss:$12 sps:$4 sm:$0xff]  }
 0x3a9   :  { %7436 = vmatpush2.bf16.msra.mxu1 %v9979_v34  ;;  %v10009_v34 = vld [vmem:[%s13628_s5 + $0xe0] ss:$12 sps:$4 sm:$0xff]  }
 0x3aa   :  { %7477 = vmatpush2.bf16.msra.mxu0 %v9982_v23  ;;  %9118 = vmatprep.subr.bf16.mxu1 %v9985_v36  ;;  %v10011_v23 = vld [vmem:[%s13628_s5 + $0x20] ss:$12 sps:$4 sm:$0xff]  }
 0x3ab   :  { %9140 = vmatprep.subr.bf16.mxu0 %v9986_v47  ;;  %v10012_v36 = vld [vmem:[%s13628_s5 + $0x1a0] ss:$12 sps:$4 sm:$0xff]   ;;  %v10014_v47 = vld [vmem:[%s13628_s5 + $0x248] ss:$12 sps:$4 sm:$0xff]  }
 0x3ac   :  { %v7193_v11 = vpop.f32.mrf.mxu1  ;;  %7438 = vmatmul.mubr.bf16.vlgmr.msra.gmra.mxu1 %v12893_v61 }
 0x3ad   :  { %v7194_v4 = vadd.f32 %v7193_v11, %v12707_v48  ;;  %v7234_v22 = vpop.f32.mrf.mxu0  ;;  %7479 = vmatmul.mubr.bf16.vlgmr.msra.gmra.mxu0 %v12898_v46  ;;  %9119 = vmatpush3.bf16.msra.mxu1 %v9987_v51  ;;  %v9993_v48 = vld [vmem:[%s13628_s5 + $0x140] ss:$12 sps:$4 sm:$0xff]   ;;  %v10015_v51 = vld [vmem:[%s13628_s5 + $0x8] ss:$12 sps:$4 sm:$0xff]   ;;  %v10018_v11 = vld [vmem:[%s13628_s5 + $0x5f0] ss:$12 sps:$4 sm:$0xff]  }
 0x3ae   :  { %7519 = vmatprep.mubr.bf16.mxu1 %v11546_v10  ;;  %9141 = vmatpush3.bf16.msra.mxu0 %v9988_v56  ;;  %v7195_v24 = vpop.f32.mrf.mxu1  ;;  %v9994_v10 = vld [vmem:[%s13628_s5 + $0x2c0] ss:$12 sps:$4 sm:$0xff]   ;;  %v10016_v56 = vld [vmem:[%s13628_s5 + $0x188] ss:$12 sps:$4 sm:$0xff]  }
 0x3af   :  { %v12919_v5 = vadd.f32 %v7234_v22, %v7194_v4  ;;  %7559 = vmatprep.mubr.bf16.mxu0 %v11554_v13  ;;  %v7196_v28 = vadd.f32 %v7195_v24, %v12714_v58  ;;  %v7236_v8 = vpop.f32.mrf.mxu0  ;;  %9120 = vmatprep.subr.bf16.mxu1 %v9989_v57  ;;  %v9996_v58 = vld [vmem:[%s13628_s5 + $0x200] ss:$12 sps:$4 sm:$0xff]   ;;  %v10017_v57 = vld [vmem:[%s13628_s5 + $0x470] ss:$12 sps:$4 sm:$0xff]   ;;  %v10021_v22 = vld [vmem:[%s13628_s5 + $0x458] ss:$12 sps:$4 sm:$0xff]  }
 0x3b0   :  { %v7197_v1 = vpop.f32.mrf.mxu1  ;;  %9142 = vmatprep.subr.bf16.mxu0 %v9990_v14  ;;  %v10019_v14 = vld [vmem:[%s13628_s5 + $0x3b0] ss:$12 sps:$4 sm:$0xff]   ;;  %v10023_v24 = vld [vmem:[%s13628_s5 + $0x398] ss:$12 sps:$4 sm:$0xff]  }
 0x3b1   :  { %v12926_v21 = vadd.f32 %v7236_v8, %v7196_v28  ;;  %v7238_v32 = vpop.f32.mrf.mxu0  ;;  %9121 = vmatpush3.bf16.msra.mxu1 %v9991_v12  ;;  %v10020_v4 = vld [vmem:[%s13628_s5 + $0x530] ss:$12 sps:$4 sm:$0xff]   ;;  %v10022_v12 = vld [vmem:[%s13628_s5 + $0x5d8] ss:$12 sps:$4 sm:$0xff]   ;;  %v10030_v28 = vld [vmem:[%s13628_s5 + $0x5a8] ss:$12 sps:$4 sm:$0xff]  }
 0x3b2   :  { %9143 = vmatpush3.bf16.msra.mxu0 %v9992_v26  ;;  %v7198_v13 = vpop.f32.mrf.mxu1  ;;  %9122 = vmatprep.subr.bf16.mxu1 %v9993_v48  ;;  %v10024_v26 = vld [vmem:[%s13628_s5 + $0x518] ss:$12 sps:$4 sm:$0xff]   ;;  %v10028_v48 = vld [vmem:[%s13628_s5 + $0x500] ss:$12 sps:$4 sm:$0xff]   ;;  %v10031_v8 = vld [vmem:[%s13628_s5 + $0x368] ss:$12 sps:$4 sm:$0xff]  }
 0x3b3   :  { %v7239_v27 = vpop.f32.mrf.mxu0  ;;  %9144 = vmatprep.subr.bf16.mxu0 %v9994_v10  ;;  %v10032_v10 = vld [vmem:[%s13628_s5 + $0x4e8] ss:$12 sps:$4 sm:$0xff]   ;;  %v10033_v1 = vld [vmem:[%s13628_s5 + $0x410] ss:$12 sps:$4 sm:$0xff]  }
 0x3b4   :  { %v10034_v32 = vld [vmem:[%s13628_s5 + $0x590] ss:$12 sps:$4 sm:$0xff]   ;;  %v10039_v27 = vld [vmem:[%s13628_s5 + $0x338] ss:$12 sps:$4 sm:$0xff]  }
 0x3b5   :  { %9123 = vmatpush3.bf16.msra.mxu1 %v9995_v7  ;;  %v10035_v7 = vld [vmem:[%s13628_s5 + $0x350] ss:$12 sps:$4 sm:$0xff]  }
 0x3b6   :  { %9145 = vmatpush3.bf16.msra.mxu0 %v9996_v58  ;;  %9124 = vmatprep.subr.bf16.mxu1 %v9997_v37  ;;  %v10036_v13 = vld [vmem:[%s13628_s5 + $0x4d0] ss:$12 sps:$4 sm:$0xff]   ;;  %v10037_v58 = vld [vmem:[%s13628_s5 + $0x3f8] ss:$12 sps:$4 sm:$0xff]  }
 0x3b7   :  { %9146 = vmatprep.subr.bf16.mxu0 %v9998_v39  ;;  %v10038_v37 = vld [vmem:[%s13628_s5 + $0x578] ss:$12 sps:$4 sm:$0xff]  }
 0x3b8   :  { %v10040_v39 = vld [vmem:[%s13628_s5 + $0x4b8] ss:$12 sps:$4 sm:$0xff]  }
 0x3b9   :  { %9125 = vmatpush3.bf16.msra.mxu1 %v9999_v41  ;;  %v10041_v41 = vld [vmem:[%s13628_s5 + $0x3e0] ss:$12 sps:$4 sm:$0xff]  }
 0x3ba   :  { %9147 = vmatpush3.bf16.msra.mxu0 %v10000_v38  ;;  %9126 = vmatprep.subr.bf16.mxu1 %v10001_v40  ;;  %v10042_v38 = vld [vmem:[%s13628_s5 + $0x560] ss:$12 sps:$4 sm:$0xff]  }
 0x3bb   :  { %9148 = vmatprep.subr.bf16.mxu0 %v10002_v44  ;;  %v10043_v40 = vld [vmem:[%s13628_s5 + $0x320] ss:$12 sps:$4 sm:$0xff]  }
 0x3bc   :  { %v10044_v44 = vld [vmem:[%s13628_s5 + $0x4a0] ss:$12 sps:$4 sm:$0xff]  }
 0x3bd   :  { %9127 = vmatpush3.bf16.msra.mxu1 %v10003_v20  ;;  %v10045_v20 = vld [vmem:[%s13628_s5 + $0x3c8] ss:$12 sps:$4 sm:$0xff]  }
 0x3be   :  { %9149 = vmatpush3.bf16.msra.mxu0 %v10004_v0  ;;  %9128 = vmatprep.subr.bf16.mxu1 %v10005_v49  ;;  %v10046_v0 = vld [vmem:[%s13628_s5 + $0x548] ss:$12 sps:$4 sm:$0xff]  }
 0x3bf   :  { %9150 = vmatprep.subr.bf16.mxu0 %v10006_v31  ;;  %v10047_v49 = vld [vmem:[%s13628_s5 + $0x308] ss:$12 sps:$4 sm:$0xff]  }
 0x3c0   :  { %v10048_v31 = vld [vmem:[%s13628_s5 + $0x488] ss:$12 sps:$4 sm:$0xff]  }
 0x3c1   :  { %9129 = vmatpush3.bf16.msra.mxu1 %v10007_v9  ;;  %v10049_v9 = vld [vmem:[%s13628_s5 + $0x770] ss:$12 sps:$4 sm:$0xff]  }
 0x3c2   :  { %9151 = vmatpush3.bf16.msra.mxu0 %v10008_v3  ;;  %9130 = vmatprep.subr.bf16.mxu1 %v10009_v34  ;;  %v10050_v3 = vld [vmem:[%s13628_s5 + $0x8f0] ss:$12 sps:$4 sm:$0xff]  }
 0x3c3   :  { %9152 = vmatprep.subr.bf16.mxu0 %v10010_v16  ;;  %v10051_v34 = vld [vmem:[%s13628_s5 + $0x6b0] ss:$12 sps:$4 sm:$0xff]  }
 0x3c4   :  { %v10052_v16 = vld [vmem:[%s13628_s5 + $0x830] ss:$12 sps:$4 sm:$0xff]  }
 0x3c5   :  { %9131 = vmatpush3.bf16.msra.mxu1 %v10011_v23  ;;  %v10053_v23 = vld [vmem:[%s13628_s5 + $0x758] ss:$12 sps:$4 sm:$0xff]  }
 0x3c6   :  { %9153 = vmatpush3.bf16.msra.mxu0 %v10012_v36  ;;  %9132 = vmatprep.subr.bf16.mxu1 %v10013_v15  ;;  %v10054_v15 = vld [vmem:[%s13628_s5 + $0x8d8] ss:$12 sps:$4 sm:$0xff]  }
 0x3c7   :  { %9154 = vmatprep.subr.bf16.mxu0 %v10014_v47 }
 0x3c9   :  { %9133 = vmatpush3.bf16.msra.mxu1 %v10015_v51 }
 0x3ca   :  { %9155 = vmatpush3.bf16.msra.mxu0 %v10016_v56  ;;  %9162 = vmatprep.subr.bf16.mxu1 %v10017_v57  ;;  %v10055_v56 = vld [vmem:[%s13628_s5 + $0x698] ss:$12 sps:$4 sm:$0xff]  }
 0x3cb   :  { %9184 = vmatprep.subr.bf16.mxu0 %v10018_v11 }
 0x3cc   :  { %7520 = vmatmul.mubr.bf16.vlgmr.msra.gmra.mxu1 %v11769_v60  ;;  %v10025_v60 = vld [vmem:[%s13628_s5 + $0x440] ss:$12 sps:$4 sm:$0xff]  }
 0x3cd   :  { %7560 = vmatmul.mubr.bf16.vlgmr.msra.gmra.mxu0 %v11774_v62  ;;  %9163 = vmatpush3.bf16.msra.mxu1 %v10019_v14  ;;  %v10026_v62 = vld [vmem:[%s13628_s5 + $0x5c0] ss:$12 sps:$4 sm:$0xff]  }
 0x3ce   :  { %7599 = vmatprep.mubr.bf16.mxu1 %v11779_v63  ;;  %9185 = vmatpush3.bf16.msra.mxu0 %v10020_v4  ;;  %v10027_v63 = vld [vmem:[%s13628_s5 + $0x380] ss:$12 sps:$4 sm:$0xff]  }
 0x3cf   :  { %7639 = vmatprep.mubr.bf16.mxu0 %v11787_v2  ;;  %9164 = vmatprep.subr.bf16.mxu1 %v10021_v22  ;;  %v10029_v2 = vld [vmem:[%s13628_s5 + $0x428] ss:$12 sps:$4 sm:$0xff]  }
 0x3d0   :  { %9186 = vmatprep.subr.bf16.mxu0 %v10022_v12 }
 0x3d1   :  { %9165 = vmatpush3.bf16.msra.mxu1 %v10023_v24  ;;  %v10059_v24 = vld [vmem:[%s13628_s5 + $0x680] ss:$12 sps:$4 sm:$0xff]  }
 0x3d2   :  { %9187 = vmatpush3.bf16.msra.mxu0 %v10024_v26  ;;  %9166 = vmatprep.subr.bf16.mxu1 %v10025_v60  ;;  %v10061_v26 = vld [vmem:[%s13628_s5 + $0x728] ss:$12 sps:$4 sm:$0xff]  }
 0x3d3   :  { %9188 = vmatprep.subr.bf16.mxu0 %v10026_v62  ;;  %v10062_v62 = vld [vmem:[%s13628_s5 + $0x8a8] ss:$12 sps:$4 sm:$0xff]  }
 0x3d5   :  { %9167 = vmatpush3.bf16.msra.mxu1 %v10027_v63  ;;  %v10063_v63 = vld [vmem:[%s13628_s5 + $0x668] ss:$12 sps:$4 sm:$0xff]  }
 0x3d6   :  { %9189 = vmatpush3.bf16.msra.mxu0 %v10028_v48  ;;  %9168 = vmatprep.subr.bf16.mxu1 %v10029_v2  ;;  %v10064_v48 = vld [vmem:[%s13628_s5 + $0x7e8] ss:$12 sps:$4 sm:$0xff]   ;;  %v10065_v2 = vld [vmem:[%s13628_s5 + $0x710] ss:$12 sps:$4 sm:$0xff]  }
 0x3d7   :  { %9190 = vmatprep.subr.bf16.mxu0 %v10030_v28  ;;  %v10066_v28 = vld [vmem:[%s13628_s5 + $0x890] ss:$12 sps:$4 sm:$0xff]  }
 0x3d9   :  { %9169 = vmatpush3.bf16.msra.mxu1 %v10031_v8  ;;  %v10067_v8 = vld [vmem:[%s13628_s5 + $0x650] ss:$12 sps:$4 sm:$0xff]  }
 0x3da   :  { %9191 = vmatpush3.bf16.msra.mxu0 %v10032_v10  ;;  %9170 = vmatprep.subr.bf16.mxu1 %v10033_v1  ;;  %v10068_v10 = vld [vmem:[%s13628_s5 + $0x7d0] ss:$12 sps:$4 sm:$0xff]   ;;  %v10069_v1 = vld [vmem:[%s13628_s5 + $0x6f8] ss:$12 sps:$4 sm:$0xff]  }
 0x3db   :  { %9192 = vmatprep.subr.bf16.mxu0 %v10034_v32  ;;  %v10070_v32 = vld [vmem:[%s13628_s5 + $0x878] ss:$12 sps:$4 sm:$0xff]  }
 0x3dd   :  { %9171 = vmatpush3.bf16.msra.mxu1 %v10035_v7  ;;  %v10071_v7 = vld [vmem:[%s13628_s5 + $0x638] ss:$12 sps:$4 sm:$0xff]  }
 0x3de   :  { %9193 = vmatpush3.bf16.msra.mxu0 %v10036_v13  ;;  %9172 = vmatprep.subr.bf16.mxu1 %v10037_v58  ;;  %v10072_v13 = vld [vmem:[%s13628_s5 + $0x7b8] ss:$12 sps:$4 sm:$0xff]   ;;  %v10073_v58 = vld [vmem:[%s13628_s5 + $0x6e0] ss:$12 sps:$4 sm:$0xff]  }
 0x3df   :  { %9194 = vmatprep.subr.bf16.mxu0 %v10038_v37  ;;  %v10074_v37 = vld [vmem:[%s13628_s5 + $0x860] ss:$12 sps:$4 sm:$0xff]  }
 0x3e1   :  { %9173 = vmatpush3.bf16.msra.mxu1 %v10039_v27  ;;  %v10075_v27 = vld [vmem:[%s13628_s5 + $0x620] ss:$12 sps:$4 sm:$0xff]  }
 0x3e2   :  { %9195 = vmatpush3.bf16.msra.mxu0 %v10040_v39  ;;  %9174 = vmatprep.subr.bf16.mxu1 %v10041_v41  ;;  %v10076_v39 = vld [vmem:[%s13628_s5 + $0x7a0] ss:$12 sps:$4 sm:$0xff]   ;;  %v10077_v41 = vld [vmem:[%s13628_s5 + $0x6c8] ss:$12 sps:$4 sm:$0xff]  }
 0x3e3   :  { %9196 = vmatprep.subr.bf16.mxu0 %v10042_v38  ;;  %v10078_v38 = vld [vmem:[%s13628_s5 + $0x848] ss:$12 sps:$4 sm:$0xff]  }
 0x3e5   :  { %9175 = vmatpush3.bf16.msra.mxu1 %v10043_v40  ;;  %v10079_v40 = vld [vmem:[%s13628_s5 + $0x608] ss:$12 sps:$4 sm:$0xff]  }
 0x3e6   :  { %9197 = vmatpush3.bf16.msra.mxu0 %v10044_v44  ;;  %9176 = vmatprep.subr.bf16.mxu1 %v10045_v20  ;;  %v10080_v44 = vld [vmem:[%s13628_s5 + $0x788] ss:$12 sps:$4 sm:$0xff]   ;;  %v10081_v20 = vld [vmem:[%s13628_s5 + $0xa70] ss:$12 sps:$4 sm:$0xff]  }
 0x3e7   :  { %9198 = vmatprep.subr.bf16.mxu0 %v10046_v0  ;;  %v10082_v0 = vld [vmem:[%s13628_s5 + $0xbf0] ss:$12 sps:$4 sm:$0xff]  }
 0x3e9   :  { %9177 = vmatpush3.bf16.msra.mxu1 %v10047_v49  ;;  %v10083_v49 = vld [vmem:[%s13628_s5 + $0x9b0] ss:$12 sps:$4 sm:$0xff]  }
 0x3ea   :  { %9199 = vmatpush3.bf16.msra.mxu0 %v10048_v31  ;;  %9206 = vmatprep.subr.bf16.mxu1 %v10049_v9  ;;  %v10084_v31 = vld [vmem:[%s13628_s5 + $0xb30] ss:$12 sps:$4 sm:$0xff]   ;;  %v10085_v9 = vld [vmem:[%s13628_s5 + $0xa58] ss:$12 sps:$4 sm:$0xff]  }
 0x3eb   :  { %9228 = vmatprep.subr.bf16.mxu0 %v10050_v3  ;;  %v10086_v3 = vld [vmem:[%s13628_s5 + $0xbd8] ss:$12 sps:$4 sm:$0xff]  }
 0x3ec   :  { %v7275_v36 = vpop.f32.mrf.mxu1  ;;  %7600 = vmatmul.mubr.bf16.vlgmr.msra.gmra.mxu1 %v12004_v54  ;;  %v10056_v54 = vld [vmem:[%s13628_s5 + $0x818] ss:$12 sps:$4 sm:$0xff]  }
 0x3ed   :  { %v7276_v47 = vadd.f32 %v7275_v36, %v12919_v5  ;;  %v7316_v51 = vpop.f32.mrf.mxu0  ;;  %7640 = vmatmul.mubr.bf16.vlgmr.msra.gmra.mxu0 %v12009_v59  ;;  %9207 = vmatpush3.bf16.msra.mxu1 %v10051_v34  ;;  %v10057_v5 = vld [vmem:[%s13628_s5 + $0x740] ss:$12 sps:$4 sm:$0xff]   ;;  %v10087_v34 = vld [vmem:[%s13628_s5 + $0x998] ss:$12 sps:$4 sm:$0xff]   ;;  %v10094_v36 = vld [vmem:[%s13628_s5 + $0xba8] ss:$12 sps:$4 sm:$0xff]  }
 0x3ee   :  { %7679 = vmatprep.mubr.bf16.mxu1 %v12014_v45  ;;  %9229 = vmatpush3.bf16.msra.mxu0 %v10052_v16  ;;  %v7277_v57 = vpop.f32.mrf.mxu1  ;;  %v10058_v45 = vld [vmem:[%s13628_s5 + $0x8c0] ss:$12 sps:$4 sm:$0xff]   ;;  %v10088_v16 = vld [vmem:[%s13628_s5 + $0xb18] ss:$12 sps:$4 sm:$0xff]  }
 0x3ef   :  { %v13125_v11 = vadd.f32 %v7316_v51, %v7276_v47  ;;  %7719 = vmatprep.mubr.bf16.mxu0 %v12022_v6  ;;  %v7278_v59 = vadd.f32 %v7277_v57, %v12926_v21  ;;  %v7318_v14 = vpop.f32.mrf.mxu0  ;;  %9208 = vmatprep.subr.bf16.mxu1 %v10053_v23  ;;  %v10060_v21 = vld [vmem:[%s13628_s5 + $0x800] ss:$12 sps:$4 sm:$0xff]   ;;  %v10096_v47 = vld [vmem:[%s13628_s5 + $0xae8] ss:$12 sps:$4 sm:$0xff]   ;;  %v10097_v51 = vld [vmem:[%s13628_s5 + $0xa10] ss:$12 sps:$4 sm:$0xff]  }
 0x3f0   :  { %v7279_v4 = vpop.f32.mrf.mxu1  ;;  %9230 = vmatprep.subr.bf16.mxu0 %v10054_v15  ;;  %v10092_v23 = vld [vmem:[%s13628_s5 + $0xb00] ss:$12 sps:$4 sm:$0xff]   ;;  %v10095_v15 = vld [vmem:[%s13628_s5 + $0x968] ss:$12 sps:$4 sm:$0xff]   ;;  %v10099_v57 = vld [vmem:[%s13628_s5 + $0x950] ss:$12 sps:$4 sm:$0xff]  }
 0x3f1   :  { %v13132_v22 = vadd.f32 %v7318_v14, %v7278_v59  ;;  %v7320_v12 = vpop.f32.mrf.mxu0  ;;  %9209 = vmatpush3.bf16.msra.mxu1 %v10055_v56  ;;  %v10098_v56 = vld [vmem:[%s13628_s5 + $0xb90] ss:$12 sps:$4 sm:$0xff]   ;;  %v10102_v59 = vld [vmem:[%s13628_s5 + $0xb78] ss:$12 sps:$4 sm:$0xff]   ;;  %v10105_v4 = vld [vmem:[%s13628_s5 + $0x9e0] ss:$12 sps:$4 sm:$0xff]  }
 0x3f2   :  { %9231 = vmatpush3.bf16.msra.mxu0 %v10056_v54  ;;  %v7280_v6 = vpop.f32.mrf.mxu1  ;;  %9210 = vmatprep.subr.bf16.mxu1 %v10057_v5  ;;  %v10100_v54 = vld [vmem:[%s13628_s5 + $0xad0] ss:$12 sps:$4 sm:$0xff]   ;;  %v10101_v5 = vld [vmem:[%s13628_s5 + $0x9f8] ss:$12 sps:$4 sm:$0xff]   ;;  %v10106_v12 = vld [vmem:[%s13628_s5 + $0xb60] ss:$12 sps:$4 sm:$0xff]  }
 0x3f3   :  { %v7321_v60 = vpop.f32.mrf.mxu0  ;;  %9232 = vmatprep.subr.bf16.mxu0 %v10058_v45  ;;  %v10103_v14 = vld [vmem:[%s13628_s5 + $0x938] ss:$12 sps:$4 sm:$0xff]   ;;  %v10108_v6 = vld [vmem:[%s13628_s5 + $0xaa0] ss:$12 sps:$4 sm:$0xff]  }
 0x3f4   :  { %v10104_v45 = vld [vmem:[%s13628_s5 + $0xab8] ss:$12 sps:$4 sm:$0xff]   ;;  %v10111_v60 = vld [vmem:[%s13628_s5 + $0x908] ss:$12 sps:$4 sm:$0xff]  }
 0x3f5   :  { %9211 = vmatpush3.bf16.msra.mxu1 %v10059_v24  ;;  %v10107_v24 = vld [vmem:[%s13628_s5 + $0x920] ss:$12 sps:$4 sm:$0xff]  }
 0x3f6   :  { %9233 = vmatpush3.bf16.msra.mxu0 %v10060_v21  ;;  %9212 = vmatprep.subr.bf16.mxu1 %v10061_v26  ;;  %v10109_v21 = vld [vmem:[%s13628_s5 + $0x9c8] ss:$12 sps:$4 sm:$0xff]  }
 0x3f7   :  { %9234 = vmatprep.subr.bf16.mxu0 %v10062_v62  ;;  %v10110_v26 = vld [vmem:[%s13628_s5 + $0xb48] ss:$12 sps:$4 sm:$0xff]  }
 0x3f8   :  { %v10112_v62 = vld [vmem:[%s13628_s5 + $0xa88] ss:$12 sps:$4 sm:$0xff]  }
 0x3f9   :  { %9213 = vmatpush3.bf16.msra.mxu1 %v10063_v63  ;;  %v10113_v63 = vld [vmem:[%s13628_s5 + $0xd70] ss:$12 sps:$4 sm:$0xff]  }
 0x3fa   :  { %9235 = vmatpush3.bf16.msra.mxu0 %v10064_v48  ;;  %9214 = vmatprep.subr.bf16.mxu1 %v10065_v2  ;;  %v10114_v48 = vld [vmem:[%s13628_s5 + $0xef0] ss:$12 sps:$4 sm:$0xff]  }
 0x3fb   :  { %9236 = vmatprep.subr.bf16.mxu0 %v10066_v28  ;;  %v10115_v2 = vld [vmem:[%s13628_s5 + $0xcb0] ss:$12 sps:$4 sm:$0xff]  }
 0x3fc   :  { %v10116_v28 = vld [vmem:[%s13628_s5 + $0xe30] ss:$12 sps:$4 sm:$0xff]  }
 0x3fd   :  { %9215 = vmatpush3.bf16.msra.mxu1 %v10067_v8  ;;  %v10117_v8 = vld [vmem:[%s13628_s5 + $0xd58] ss:$12 sps:$4 sm:$0xff]  }
 0x3fe   :  { %9237 = vmatpush3.bf16.msra.mxu0 %v10068_v10  ;;  %9216 = vmatprep.subr.bf16.mxu1 %v10069_v1  ;;  %v10118_v1 = vld [vmem:[%s13628_s5 + $0xed8] ss:$12 sps:$4 sm:$0xff]  }
 0x3ff   :  { %9238 = vmatprep.subr.bf16.mxu0 %v10070_v32 }
 0x401   :  { %9217 = vmatpush3.bf16.msra.mxu1 %v10071_v7 }
 0x402   :  { %9239 = vmatpush3.bf16.msra.mxu0 %v10072_v13  ;;  %9218 = vmatprep.subr.bf16.mxu1 %v10073_v58  ;;  %v10119_v13 = vld [vmem:[%s13628_s5 + $0xc98] ss:$12 sps:$4 sm:$0xff]  }
 0x403   :  { %9240 = vmatprep.subr.bf16.mxu0 %v10074_v37 }
 0x405   :  { %9219 = vmatpush3.bf16.msra.mxu1 %v10075_v27 }
 0x406   :  { %9241 = vmatpush3.bf16.msra.mxu0 %v10076_v39  ;;  %9220 = vmatprep.subr.bf16.mxu1 %v10077_v41 }
 0x407   :  { %9242 = vmatprep.subr.bf16.mxu0 %v10078_v38 }
 0x409   :  { %9221 = vmatpush3.bf16.msra.mxu1 %v10079_v40  ;;  %v10123_v40 = vld [vmem:[%s13628_s5 + $0xc80] ss:$12 sps:$4 sm:$0xff]  }
 0x40a   :  { %9243 = vmatpush3.bf16.msra.mxu0 %v10080_v44  ;;  %9250 = vmatprep.subr.bf16.mxu1 %v10081_v20  ;;  %v10125_v44 = vld [vmem:[%s13628_s5 + $0xd28] ss:$12 sps:$4 sm:$0xff]  }
 0x40b   :  { %9272 = vmatprep.subr.bf16.mxu0 %v10082_v0  ;;  %v10126_v0 = vld [vmem:[%s13628_s5 + $0xea8] ss:$12 sps:$4 sm:$0xff]  }
 0x40c   :  { %7680 = vmatmul.mubr.bf16.vlgmr.msra.gmra.mxu1 %v12228_v19  ;;  %v10089_v19 = vld [vmem:[%s13628_s5 + $0xa40] ss:$12 sps:$4 sm:$0xff]  }
 0x40d   :  { %7720 = vmatmul.mubr.bf16.vlgmr.msra.gmra.mxu0 %v12233_v25  ;;  %9251 = vmatpush3.bf16.msra.mxu1 %v10083_v49  ;;  %v10090_v25 = vld [vmem:[%s13628_s5 + $0xbc0] ss:$12 sps:$4 sm:$0xff]   ;;  %v10127_v49 = vld [vmem:[%s13628_s5 + $0xc68] ss:$12 sps:$4 sm:$0xff]  }
 0x40e   :  { %7759 = vmatprep.mubr.bf16.mxu1 %v12238_v33  ;;  %9273 = vmatpush3.bf16.msra.mxu0 %v10084_v31  ;;  %v10091_v33 = vld [vmem:[%s13628_s5 + $0x980] ss:$12 sps:$4 sm:$0xff]   ;;  %v10128_v31 = vld [vmem:[%s13628_s5 + $0xde8] ss:$12 sps:$4 sm:$0xff]  }
 0x40f   :  { %7799 = vmatprep.mubr.bf16.mxu0 %v12246_v35  ;;  %9252 = vmatprep.subr.bf16.mxu1 %v10085_v9  ;;  %v10093_v35 = vld [vmem:[%s13628_s5 + $0xa28] ss:$12 sps:$4 sm:$0xff]   ;;  %v10129_v9 = vld [vmem:[%s13628_s5 + $0xd10] ss:$12 sps:$4 sm:$0xff]  }
 0x410   :  { %9274 = vmatprep.subr.bf16.mxu0 %v10086_v3  ;;  %v10130_v3 = vld [vmem:[%s13628_s5 + $0xe90] ss:$12 sps:$4 sm:$0xff]  }
 0x411   :  { %9253 = vmatpush3.bf16.msra.mxu1 %v10087_v34  ;;  %v10131_v34 = vld [vmem:[%s13628_s5 + $0xc50] ss:$12 sps:$4 sm:$0xff]  }
 0x412   :  { %9275 = vmatpush3.bf16.msra.mxu0 %v10088_v16  ;;  %9254 = vmatprep.subr.bf16.mxu1 %v10089_v19  ;;  %v10132_v16 = vld [vmem:[%s13628_s5 + $0xdd0] ss:$12 sps:$4 sm:$0xff]   ;;  %v10133_v19 = vld [vmem:[%s13628_s5 + $0xcf8] ss:$12 sps:$4 sm:$0xff]  }
 0x413   :  { %9276 = vmatprep.subr.bf16.mxu0 %v10090_v25  ;;  %v10134_v25 = vld [vmem:[%s13628_s5 + $0xe78] ss:$12 sps:$4 sm:$0xff]  }
 0x415   :  { %9255 = vmatpush3.bf16.msra.mxu1 %v10091_v33  ;;  %v10135_v33 = vld [vmem:[%s13628_s5 + $0xc38] ss:$12 sps:$4 sm:$0xff]  }
 0x416   :  { %9277 = vmatpush3.bf16.msra.mxu0 %v10092_v23  ;;  %9256 = vmatprep.subr.bf16.mxu1 %v10093_v35  ;;  %v10136_v23 = vld [vmem:[%s13628_s5 + $0xdb8] ss:$12 sps:$4 sm:$0xff]   ;;  %v10137_v35 = vld [vmem:[%s13628_s5 + $0xce0] ss:$12 sps:$4 sm:$0xff]  }
 0x417   :  { %9278 = vmatprep.subr.bf16.mxu0 %v10094_v36  ;;  %v10138_v36 = vld [vmem:[%s13628_s5 + $0xe60] ss:$12 sps:$4 sm:$0xff]  }
 0x419   :  { %9257 = vmatpush3.bf16.msra.mxu1 %v10095_v15  ;;  %v10139_v15 = vld [vmem:[%s13628_s5 + $0xc20] ss:$12 sps:$4 sm:$0xff]  }
 0x41a   :  { %9279 = vmatpush3.bf16.msra.mxu0 %v10096_v47  ;;  %9258 = vmatprep.subr.bf16.mxu1 %v10097_v51  ;;  %v10140_v47 = vld [vmem:[%s13628_s5 + $0xda0] ss:$12 sps:$4 sm:$0xff]   ;;  %v10141_v51 = vld [vmem:[%s13628_s5 + $0xcc8] ss:$12 sps:$4 sm:$0xff]  }
 0x41b   :  { %9280 = vmatprep.subr.bf16.mxu0 %v10098_v56  ;;  %v10142_v56 = vld [vmem:[%s13628_s5 + $0xe48] ss:$12 sps:$4 sm:$0xff]  }
 0x41d   :  { %9259 = vmatpush3.bf16.msra.mxu1 %v10099_v57  ;;  %v10143_v57 = vld [vmem:[%s13628_s5 + $0xc08] ss:$12 sps:$4 sm:$0xff]  }
 0x41e   :  { %9281 = vmatpush3.bf16.msra.mxu0 %v10100_v54  ;;  %9260 = vmatprep.subr.bf16.mxu1 %v10101_v5  ;;  %v10144_v54 = vld [vmem:[%s13628_s5 + $0xd88] ss:$12 sps:$4 sm:$0xff]   ;;  %v10145_v5 = vld [vmem:[%s13628_s5 + $0x1070] ss:$12 sps:$4 sm:$0xff]  }
 0x41f   :  { %9282 = vmatprep.subr.bf16.mxu0 %v10102_v59  ;;  %v10146_v59 = vld [vmem:[%s13628_s5 + $0x11f0] ss:$12 sps:$4 sm:$0xff]  }
 0x421   :  { %9261 = vmatpush3.bf16.msra.mxu1 %v10103_v14  ;;  %v10147_v14 = vld [vmem:[%s13628_s5 + $0xfb0] ss:$12 sps:$4 sm:$0xff]  }
 0x422   :  { %9283 = vmatpush3.bf16.msra.mxu0 %v10104_v45  ;;  %9262 = vmatprep.subr.bf16.mxu1 %v10105_v4  ;;  %v10148_v45 = vld [vmem:[%s13628_s5 + $0x1130] ss:$12 sps:$4 sm:$0xff]   ;;  %v10149_v4 = vld [vmem:[%s13628_s5 + $0x1058] ss:$12 sps:$4 sm:$0xff]  }
 0x423   :  { %9284 = vmatprep.subr.bf16.mxu0 %v10106_v12  ;;  %v10150_v12 = vld [vmem:[%s13628_s5 + $0x11d8] ss:$12 sps:$4 sm:$0xff]  }
 0x425   :  { %9263 = vmatpush3.bf16.msra.mxu1 %v10107_v24  ;;  %v10151_v24 = vld [vmem:[%s13628_s5 + $0xf98] ss:$12 sps:$4 sm:$0xff]  }
 0x426   :  { %9285 = vmatpush3.bf16.msra.mxu0 %v10108_v6  ;;  %9264 = vmatprep.subr.bf16.mxu1 %v10109_v21  ;;  %v10152_v6 = vld [vmem:[%s13628_s5 + $0x1118] ss:$12 sps:$4 sm:$0xff]   ;;  %v10156_v21 = vld [vmem:[%s13628_s5 + $0x1100] ss:$12 sps:$4 sm:$0xff]  }
 0x427   :  { %9286 = vmatprep.subr.bf16.mxu0 %v10110_v26  ;;  %v10158_v26 = vld [vmem:[%s13628_s5 + $0x11a8] ss:$12 sps:$4 sm:$0xff]  }
 0x429   :  { %9265 = vmatpush3.bf16.msra.mxu1 %v10111_v60  ;;  %v10159_v60 = vld [vmem:[%s13628_s5 + $0xf68] ss:$12 sps:$4 sm:$0xff]  }
 0x42a   :  { %9287 = vmatpush3.bf16.msra.mxu0 %v10112_v62  ;;  %9294 = vmatprep.subr.bf16.mxu1 %v10113_v63  ;;  %v10160_v62 = vld [vmem:[%s13628_s5 + $0x10e8] ss:$12 sps:$4 sm:$0xff]   ;;  %v10161_v63 = vld [vmem:[%s13628_s5 + $0x1010] ss:$12 sps:$4 sm:$0xff]  }
 0x42b   :  { %9316 = vmatprep.subr.bf16.mxu0 %v10114_v48  ;;  %v10162_v48 = vld [vmem:[%s13628_s5 + $0x1190] ss:$12 sps:$4 sm:$0xff]  }
 0x42c   :  { %v7357_v10 = vpop.f32.mrf.mxu1  ;;  %7760 = vmatmul.mubr.bf16.vlgmr.msra.gmra.mxu1 %v12457_v55  ;;  %v10120_v55 = vld [vmem:[%s13628_s5 + $0xe18] ss:$12 sps:$4 sm:$0xff]  }
 0x42d   :  { %v7358_v32 = vadd.f32 %v7357_v10, %v13125_v11  ;;  %v7398_v7 = vpop.f32.mrf.mxu0  ;;  %7800 = vmatmul.mubr.bf16.vlgmr.msra.gmra.mxu0 %v12462_v17  ;;  %9295 = vmatpush3.bf16.msra.mxu1 %v10115_v2  ;;  %v10121_v11 = vld [vmem:[%s13628_s5 + $0xd40] ss:$12 sps:$4 sm:$0xff]   ;;  %v10163_v2 = vld [vmem:[%s13628_s5 + $0xf50] ss:$12 sps:$4 sm:$0xff]   ;;  %v10166_v10 = vld [vmem:[%s13628_s5 + $0x1178] ss:$12 sps:$4 sm:$0xff]  }
 0x42e   :  { %7839 = vmatprep.mubr.bf16.mxu1 %v12467_v18  ;;  %9317 = vmatpush3.bf16.msra.mxu0 %v10116_v28  ;;  %v7359_v58 = vpop.f32.mrf.mxu1  ;;  %v10122_v18 = vld [vmem:[%s13628_s5 + $0xec0] ss:$12 sps:$4 sm:$0xff]   ;;  %v10164_v28 = vld [vmem:[%s13628_s5 + $0x10d0] ss:$12 sps:$4 sm:$0xff]  }
 0x42f   :  { %v13331_v37 = vadd.f32 %v7398_v7, %v7358_v32  ;;  %7879 = vmatprep.mubr.bf16.mxu0 %v12473_v53  ;;  %v7360_v17 = vadd.f32 %v7359_v58, %v13132_v22  ;;  %v7400_v27 = vpop.f32.mrf.mxu0  ;;  %9296 = vmatprep.subr.bf16.mxu1 %v10117_v8  ;;  %v10124_v22 = vld [vmem:[%s13628_s5 + $0xe00] ss:$12 sps:$4 sm:$0xff]   ;;  %v10165_v8 = vld [vmem:[%s13628_s5 + $0xff8] ss:$12 sps:$4 sm:$0xff]  }
 0x430   :  { %v7361_v39 = vpop.f32.mrf.mxu1  ;;  %9318 = vmatprep.subr.bf16.mxu0 %v10118_v1  ;;  %v10167_v1 = vld [vmem:[%s13628_s5 + $0xf38] ss:$12 sps:$4 sm:$0xff]   ;;  %v10169_v7 = vld [vmem:[%s13628_s5 + $0xfe0] ss:$12 sps:$4 sm:$0xff]  }
 0x431   :  { %v13338_v41 = vadd.f32 %v7400_v27, %v7360_v17  ;;  %v7402_v38 = vpop.f32.mrf.mxu0  ;;  %9297 = vmatpush3.bf16.msra.mxu1 %v10119_v13  ;;  %v10168_v32 = vld [vmem:[%s13628_s5 + $0x10b8] ss:$12 sps:$4 sm:$0xff]   ;;  %v10170_v13 = vld [vmem:[%s13628_s5 + $0x1160] ss:$12 sps:$4 sm:$0xff]   ;;  %v10174_v17 = vld [vmem:[%s13628_s5 + $0x1148] ss:$12 sps:$4 sm:$0xff]  }
 0x432   :  { %9319 = vmatpush3.bf16.msra.mxu0 %v10120_v55  ;;  %v7362_v53 = vpop.f32.mrf.mxu1  ;;  %9298 = vmatprep.subr.bf16.mxu1 %v10121_v11  ;;  %v10171_v58 = vld [vmem:[%s13628_s5 + $0xf20] ss:$12 sps:$4 sm:$0xff]   ;;  %v10173_v11 = vld [vmem:[%s13628_s5 + $0xfc8] ss:$12 sps:$4 sm:$0xff]  }
 0x433   :  { %v7403_v20 = vpop.f32.mrf.mxu0  ;;  %9320 = vmatprep.subr.bf16.mxu0 %v10122_v18  ;;  %v10172_v55 = vld [vmem:[%s13628_s5 + $0x10a0] ss:$12 sps:$4 sm:$0xff]   ;;  %v10175_v27 = vld [vmem:[%s13628_s5 + $0xf08] ss:$12 sps:$4 sm:$0xff]  }
 0x434   :  { %v10176_v18 = vld [vmem:[%s13628_s5 + $0x1088] ss:$12 sps:$4 sm:$0xff]  }
 0x435   :  { %9299 = vmatpush3.bf16.msra.mxu1 %v10123_v40 }
 0x436   :  { %9321 = vmatpush3.bf16.msra.mxu0 %v10124_v22  ;;  %9300 = vmatprep.subr.bf16.mxu1 %v10125_v44 }
 0x437   :  { %9322 = vmatprep.subr.bf16.mxu0 %v10126_v0 }
 0x439   :  { %9301 = vmatpush3.bf16.msra.mxu1 %v10127_v49 }
 0x43a   :  { %9323 = vmatpush3.bf16.msra.mxu0 %v10128_v31  ;;  %9302 = vmatprep.subr.bf16.mxu1 %v10129_v9 }
 0x43b   :  { %9324 = vmatprep.subr.bf16.mxu0 %v10130_v3 }
 0x43d   :  { %9303 = vmatpush3.bf16.msra.mxu1 %v10131_v34 }
 0x43e   :  { %9325 = vmatpush3.bf16.msra.mxu0 %v10132_v16  ;;  %9304 = vmatprep.subr.bf16.mxu1 %v10133_v19 }
 0x43f   :  { %9326 = vmatprep.subr.bf16.mxu0 %v10134_v25 }
 0x441   :  { %9305 = vmatpush3.bf16.msra.mxu1 %v10135_v33 }
 0x442   :  { %9327 = vmatpush3.bf16.msra.mxu0 %v10136_v23  ;;  %9306 = vmatprep.subr.bf16.mxu1 %v10137_v35 }
 0x443   :  { %9328 = vmatprep.subr.bf16.mxu0 %v10138_v36 }
 0x445   :  { %9307 = vmatpush3.bf16.msra.mxu1 %v10139_v15 }
 0x446   :  { %9329 = vmatpush3.bf16.msra.mxu0 %v10140_v47  ;;  %9308 = vmatprep.subr.bf16.mxu1 %v10141_v51 }
 0x447   :  { %9330 = vmatprep.subr.bf16.mxu0 %v10142_v56 }
 0x449   :  { %9309 = vmatpush3.bf16.msra.mxu1 %v10143_v57 }
 0x44a   :  { %9331 = vmatpush3.bf16.msra.mxu0 %v10144_v54  ;;  %9338 = vmatprep.subr.bf16.mxu1 %v10145_v5 }
 0x44b   :  { %9360 = vmatprep.subr.bf16.mxu0 %v10146_v59 }
 0x44c   :  { %7840 = vmatmul.mubr.bf16.vlgmr.msra.gmra.mxu1 %v12677_v52  ;;  %v10153_v52 = vld [vmem:[%s13628_s5 + $0x1040] ss:$12 sps:$4 sm:$0xff]  }
 0x44d   :  { %7880 = vmatmul.mubr.bf16.vlgmr.msra.gmra.mxu0 %v12682_v42  ;;  %9339 = vmatpush3.bf16.msra.mxu1 %v10147_v14  ;;  %v10154_v42 = vld [vmem:[%s13628_s5 + $0x11c0] ss:$12 sps:$4 sm:$0xff]  }
 0x44e   :  { %7919 = vmatprep.mubr.bf16.mxu1 %v12687_v43  ;;  %9361 = vmatpush3.bf16.msra.mxu0 %v10148_v45  ;;  %v10155_v43 = vld [vmem:[%s13628_s5 + $0xf80] ss:$12 sps:$4 sm:$0xff]  }
 0x44f   :  { %7959 = vmatprep.mubr.bf16.mxu0 %v12693_v50  ;;  %9340 = vmatprep.subr.bf16.mxu1 %v10149_v4  ;;  %v10157_v50 = vld [vmem:[%s13628_s5 + $0x1028] ss:$12 sps:$4 sm:$0xff]  }
 0x450   :  { %9362 = vmatprep.subr.bf16.mxu0 %v10150_v12 }
 0x451   :  { %9341 = vmatpush3.bf16.msra.mxu1 %v10151_v24 }
 0x452   :  { %9363 = vmatpush3.bf16.msra.mxu0 %v10152_v6  ;;  %9342 = vmatprep.subr.bf16.mxu1 %v10153_v52 }
 0x453   :  { %9364 = vmatprep.subr.bf16.mxu0 %v10154_v42 }
 0x455   :  { %9343 = vmatpush3.bf16.msra.mxu1 %v10155_v43 }
 0x456   :  { %9365 = vmatpush3.bf16.msra.mxu0 %v10156_v21  ;;  %9344 = vmatprep.subr.bf16.mxu1 %v10157_v50 }
 0x457   :  { %9366 = vmatprep.subr.bf16.mxu0 %v10158_v26 }
 0x459   :  { %9345 = vmatpush3.bf16.msra.mxu1 %v10159_v60 }
 0x45a   :  { %9367 = vmatpush3.bf16.msra.mxu0 %v10160_v62  ;;  %9346 = vmatprep.subr.bf16.mxu1 %v10161_v63 }
 0x45b   :  { %9368 = vmatprep.subr.bf16.mxu0 %v10162_v48 }
 0x45d   :  { %9347 = vmatpush3.bf16.msra.mxu1 %v10163_v2 }
 0x45e   :  { %9369 = vmatpush3.bf16.msra.mxu0 %v10164_v28  ;;  %9348 = vmatprep.subr.bf16.mxu1 %v10165_v8 }
 0x45f   :  { %9370 = vmatprep.subr.bf16.mxu0 %v10166_v10 }
 0x461   :  { %9349 = vmatpush3.bf16.msra.mxu1 %v10167_v1 }
 0x462   :  { %9371 = vmatpush3.bf16.msra.mxu0 %v10168_v32  ;;  %9350 = vmatprep.subr.bf16.mxu1 %v10169_v7 }
 0x463   :  { %9372 = vmatprep.subr.bf16.mxu0 %v10170_v13 }
 0x465   :  { %9351 = vmatpush3.bf16.msra.mxu1 %v10171_v58 }
 0x466   :  { %9373 = vmatpush3.bf16.msra.mxu0 %v10172_v55  ;;  %9352 = vmatprep.subr.bf16.mxu1 %v10173_v11 }
 0x467   :  { %9374 = vmatprep.subr.bf16.mxu0 %v10174_v17 }
 0x469   :  { %9353 = vmatpush3.bf16.msra.mxu1 %v10175_v27 }
 0x46a   :  { %9375 = vmatpush3.bf16.msra.mxu0 %v10176_v18 }
 0x46c   :  { %v7439_v39 = vpop.f32.mrf.mxu1  ;;  %7920 = vmatmul.mubr.bf16.vlgmr.msra.gmra.mxu1 %v12893_v61 }
 0x46d   :  { %v7440_v38 = vadd.f32 %v7439_v39, %v13331_v37  ;;  %v7480_v40 = vpop.f32.mrf.mxu0  ;;  %7960 = vmatmul.mubr.bf16.vlgmr.msra.gmra.mxu0 %v12898_v46 }
 0x46e   :  { %v7441_v53 = vpop.f32.mrf.mxu1 }
 0x46f   :  { %v13509_v22 = vadd.f32 %v7480_v40, %v7440_v38  ;;  %v7442_v44 = vadd.f32 %v7441_v53, %v13338_v41  ;;  %v7482_v20 = vpop.f32.mrf.mxu0 }
 0x470   :  { %v7443_v0 = vpop.f32.mrf.mxu1 }
 0x471   :  { %v13512_v49 = vadd.f32 %v7482_v20, %v7442_v44  ;;  %v7484_v31 = vpop.f32.mrf.mxu0 }
 0x472   :  { %v7444_v9 = vpop.f32.mrf.mxu1 }
 0x473   :  { %v7485_v3 = vpop.f32.mrf.mxu0 }
 0x48c   :  { %v9134_v34 = vpop.f32.mrf.mxu1 }
 0x48d   :  { %v9156_v16 = vpop.f32.mrf.mxu0 }
 0x48e   :  { %v9135_v61 = vpop.f32.mrf.mxu1 }
 0x48f   :  { %v9136_v19 = vadd.f32 %v9135_v61, %v9134_v34  ;;  %v9157_v37 = vpop.f32.mrf.mxu0 }
 0x490   :  { %v9158_v25 = vadd.f32 %v9157_v37, %v9156_v16  ;;  %v9137_v33 = vpop.f32.mrf.mxu1 }
 0x491   :  { %v9159_v46 = vpop.f32.mrf.mxu0 }
 0x492   :  { %v7562_v23 = vadd.f32 %v9158_v25, %v9136_v19  ;;  %v9138_v35 = vpop.f32.mrf.mxu1 }
 0x493   :  { %v9160_v36 = vpop.f32.mrf.mxu0 }
 0x4ac   :  { %v9178_v15 = vpop.f32.mrf.mxu1 }
 0x4ad   :  { %v9200_v41 = vpop.f32.mrf.mxu0 }
 0x4ae   :  { %v9179_v47 = vpop.f32.mrf.mxu1 }
 0x4af   :  { %v9180_v51 = vadd.f32 %v9179_v47, %v9178_v15  ;;  %v9201_v56 = vpop.f32.mrf.mxu0  ;;  %v8010_v47 = vld [vmem:[%s13629_s6 + $0xf0] sm:$0xff] }
 0x4b0   :  { %v9202_v57 = vadd.f32 %v9201_v56, %v9200_v41  ;;  %v9181_v54 = vpop.f32.mrf.mxu1  ;;  %v8011_v41 = vld [vmem:[%s13629_s6 + $0xf8] sm:$0xff]  ;;  %v8008_v56 = vld [vmem:[%s13629_s6 + $0xe0] sm:$0xff] }
 0x4b1   :  { %v7602_v5 = vadd.f32 %v9180_v51, %v7562_v23  ;;  %v9203_v59 = vpop.f32.mrf.mxu0  ;;  %v8009_v51 = vld [vmem:[%s13629_s6 + $0xe8] sm:$0xff]  ;;  %8012 = vmatprep.subr.mxu1 %v8011_v41  ;;  %v8006_v54 = vld [vmem:[%s13629_s6 + $0xd0] sm:$0xff] }
 0x4b2   :  { %v9182_v14 = vpop.f32.mrf.mxu1  ;;  %8013 = vmatpush1.msra.mxu1 %v8010_v47  ;;  %v8004_v59 = vld [vmem:[%s13629_s6 + $0xc0] sm:$0xff] }
 0x4b3   :  { %v7642_v45 = vadd.f32 %v9202_v57, %v7602_v5  ;;  %v9204_v4 = vpop.f32.mrf.mxu0  ;;  %v8007_v57 = vld [vmem:[%s13629_s6 + $0xd8] sm:$0xff]  ;;  %8014 = vmatprep.subr.mxu1 %v8009_v51  ;;  %v8005_v5 = vld [vmem:[%s13629_s6 + $0xc8] sm:$0xff] }
 0x4b4   :  { %8015 = vmatpush1.msra.mxu1 %v8008_v56  ;;  %v8003_v14 = vld [vmem:[%s13629_s6 + $0xb8] sm:$0xff]  ;;  %v8001_v4 = vld [vmem:[%s13629_s6 + $0xa8] sm:$0xff] }
 0x4b5   :  { %8016 = vmatprep.subr.mxu1 %v8007_v57 }
 0x4b6   :  { %8017 = vmatpush1.msra.mxu1 %v8006_v54 }
 0x4b7   :  { %8018 = vmatprep.subr.mxu1 %v8005_v5 }
 0x4b8   :  { %8019 = vmatpush1.msra.mxu1 %v8004_v59 }
 0x4b9   :  { %8020 = vmatprep.subr.mxu1 %v8003_v14 }
 0x4cc   :  { %v9222_v12 = vpop.f32.mrf.mxu1 }
 0x4cd   :  { %v9244_v24 = vpop.f32.mrf.mxu0 }
 0x4ce   :  { %v9223_v6 = vpop.f32.mrf.mxu1 }
 0x4cf   :  { %v9224_v52 = vadd.f32 %v9223_v6, %v9222_v12  ;;  %v9245_v42 = vpop.f32.mrf.mxu0  ;;  %v8000_v12 = vld [vmem:[%s13629_s6 + $0xa0] sm:$0xff]  ;;  %v7998_v6 = vld [vmem:[%s13629_s6 + $0x90] sm:$0xff] }
 0x4d0   :  { %v9246_v43 = vadd.f32 %v9245_v42, %v9244_v24  ;;  %v9225_v21 = vpop.f32.mrf.mxu1  ;;  %v7999_v24 = vld [vmem:[%s13629_s6 + $0x98] sm:$0xff]  ;;  %v7996_v42 = vld [vmem:[%s13629_s6 + $0x80] sm:$0xff] }
 0x4d1   :  { %v7682_v50 = vadd.f32 %v9224_v52, %v7642_v45  ;;  %v9247_v26 = vpop.f32.mrf.mxu0  ;;  %v8002_v45 = vld [vmem:[%s13629_s6 + $0xb0] sm:$0xff]  ;;  %v7997_v52 = vld [vmem:[%s13629_s6 + $0x88] sm:$0xff] }
 0x4d2   :  { %v9226_v60 = vpop.f32.mrf.mxu1  ;;  %8021 = vmatpush1.msra.mxu1 %v8002_v45 }
 0x4d3   :  { %v7722_v62 = vadd.f32 %v9246_v43, %v7682_v50  ;;  %v9248_v63 = vpop.f32.mrf.mxu0  ;;  %8022 = vmatprep.subr.mxu1 %v8001_v4 }
 0x4d4   :  { %8023 = vmatpush1.msra.mxu1 %v8000_v12  ;;  %v7994_v63 = vld [vmem:[%s13629_s6 + $0x70] sm:$0xff] }
 0x4d5   :  { %8024 = vmatprep.subr.mxu1 %v7999_v24 }
 0x4d6   :  { %8025 = vmatpush1.msra.mxu1 %v7998_v6 }
 0x4d7   :  { %8026 = vmatprep.subr.mxu1 %v7997_v52 }
 0x4d8   :  { %8027 = vmatpush1.msra.mxu1 %v7996_v42 }
 0x4ec   :  { %v9266_v48 = vpop.f32.mrf.mxu1 }
 0x4ed   :  { %v9288_v2 = vpop.f32.mrf.mxu0 }
 0x4ee   :  { %v9267_v28 = vpop.f32.mrf.mxu1 }
 0x4ef   :  { %v9289_v8 = vpop.f32.mrf.mxu0  ;;  %v9268_v38 = vadd.f32 %v9267_v28, %v9266_v48  ;;  %v7993_v48 = vld [vmem:[%s13629_s6 + $0x68] sm:$0xff]  ;;  %v10212_v28 = vmov 0.0  }
 0x4f0   :  { %v9269_v10 = vpop.f32.mrf.mxu1  ;;  %v9290_v53 = vadd.f32 %v9289_v8, %v9288_v2  ;;  %v7992_v2 = vld [vmem:[%s13629_s6 + $0x60] sm:$0xff]  ;;  %8076 = vmatprep.mubr.f32.mxu1 %v10212_v28  ;;  %v7991_v8 = vld [vmem:[%s13629_s6 + $0x58] sm:$0xff] }
 0x4f1   :  { %v9291_v1 = vpop.f32.mrf.mxu0  ;;  %v7762_v40 = vadd.f32 %v9268_v38, %v7722_v62  ;;  %v7995_v62 = vld [vmem:[%s13629_s6 + $0x78] sm:$0xff]  ;;  %v7990_v10 = vld [vmem:[%s13629_s6 + $0x50] sm:$0xff] }
 0x4f2   :  { %v9270_v32 = vpop.f32.mrf.mxu1  ;;  %8028 = vmatprep.subr.mxu1 %v7995_v62  ;;  %v7989_v1 = vld [vmem:[%s13629_s6 + $0x48] sm:$0xff] }
 0x4f3   :  { %v9292_v7 = vpop.f32.mrf.mxu0  ;;  %v7802_v20 = vadd.f32 %v9290_v53, %v7762_v40  ;;  %8029 = vmatpush1.msra.mxu1 %v7994_v63  ;;  %v7988_v32 = vld [vmem:[%s13629_s6 + $0x40] sm:$0xff] }
 0x4f4   :  { %8030 = vmatprep.subr.mxu1 %v7993_v48  ;;  %v7987_v7 = vld [vmem:[%s13629_s6 + $0x38] sm:$0xff]  ;;  %v8085_v53 = vld [vmem:[%s13630_s7] sm:$0x3] }
 0x4f5   :  { %8031 = vmatpush1.msra.mxu1 %v7992_v2 }
 0x4f6   :  { %8032 = vmatprep.subr.mxu1 %v7991_v8 }
 0x4f7   :  { %8033 = vmatpush1.msra.mxu1 %v7990_v10 }
 0x4f8   :  { %8034 = vmatprep.subr.mxu1 %v7989_v1 }
 0x4f9   :  { %8035 = vmatpush1.msra.mxu1 %v7988_v32 }
 0x4fa   :  { %8036 = vmatprep.subr.mxu1 %v7987_v7 }
 0x50c   :  { %v9310_v13 = vpop.f32.mrf.mxu1 }
 0x50d   :  { %v9332_v58 = vpop.f32.mrf.mxu0 }
 0x50e   :  { %v9311_v55 = vpop.f32.mrf.mxu1 }
 0x50f   :  { %v9333_v11 = vpop.f32.mrf.mxu0  ;;  %v9312_v44 = vadd.f32 %v9311_v55, %v9310_v13  ;;  %v7986_v13 = vld [vmem:[%s13629_s6 + $0x30] sm:$0xff]  ;;  %v7984_v55 = vld [vmem:[%s13629_s6 + $0x20] sm:$0xff] }
 0x510   :  { %v9313_v17 = vpop.f32.mrf.mxu1  ;;  %v9334_v9 = vadd.f32 %v9333_v11, %v9332_v58  ;;  %v7985_v58 = vld [vmem:[%s13629_s6 + $0x28] sm:$0xff]  ;;  %8037 = vmatpush1.msra.mxu1 %v7986_v13  ;;  %v7983_v11 = vld [vmem:[%s13629_s6 + $0x18] sm:$0xff] }
 0x511   :  { %v9335_v27 = vpop.f32.mrf.mxu0  ;;  %v7842_v0 = vadd.f32 %v9312_v44, %v7802_v20  ;;  %8038 = vmatprep.subr.mxu1 %v7985_v58  ;;  %v7982_v17 = vld [vmem:[%s13629_s6 + $0x10] sm:$0xff]  ;;  %v8090_v44 = vrot.slane %v8085_v53, %v10520_v29 }
 0x512   :  { %v9314_v18 = vpop.f32.mrf.mxu1  ;;  %8039 = vmatpush1.msra.mxu1 %v7984_v55  ;;  %v7981_v27 = vld [vmem:[%s13629_s6 + $0x8] sm:$0xff] }
 0x513   :  { %v9336_v39 = vpop.f32.mrf.mxu0  ;;  %v7882_v16 = vadd.f32 %v9334_v9, %v7842_v0  ;;  %8040 = vmatprep.subr.mxu1 %v7983_v11  ;;  %v7980_v18 = vld [vmem:[%s13629_s6] sm:$0xff]  ;;  %s10213_s6 = smov [#allocation2]  }
 0x514   :  { %8041 = vmatpush1.msra.mxu1 %v7982_v17  ;;  %s8129_s7 = sshll.u32 %s10213_s6, 4  ;;  %s8130_s7 = int_to_ptr.vmem [resolvable:$true] %s8129_s7 }
 0x515   :  { %8042 = vmatprep.subr.mxu1 %v7981_v27  ;;  %s10189_s17 = scalar_lea.vmem %s8130_s7, 128  ;;  %p10194_p1 = scmp.lt.s32.totalorder %s8130_s7, %s8130_s7 }
 0x516   :  { %8043 = vmatpush1.msra.mxu1 %v7980_v18  ;;  %p10190_p0 = scmp.ne.s32.totalorder %s8130_s7, %s10189_s17  ;;  %p10195_p2 = scmp.lt.s32.totalorder %s10189_s17, %s10189_s17 }
 0x518   :  { %p10196_p3 = por %p10195_p2, %p10194_p1 }
 0x51a   :  { %p10197_p4 = pnand %p10196_p3, %p10190_p0 }
 0x52c   :  { %v9354_v31 = vpop.f32.mrf.mxu1 }
 0x52d   :  { %v9376_v3 = vpop.f32.mrf.mxu0 }
 0x52e   :  { %v9355_v34 = vpop.f32.mrf.mxu1 }
 0x52f   :  { %v9356_v61 = vadd.f32 %v9355_v34, %v9354_v31  ;;  %v9377_v19 = vpop.f32.mrf.mxu0  ;;  %v8094_v31 = vrot.slane %v8085_v53, %v10523_v30 }
 0x530   :  { %v9357_v37 = vpop.f32.mrf.mxu1  ;;  %v9378_v33 = vadd.f32 %v9377_v19, %v9376_v3 }
 0x531   :  { %v7922_v25 = vadd.f32 %v9356_v61, %v7882_v16  ;;  %v9379_v46 = vpop.f32.mrf.mxu0 }
 0x532   :  { %v9358_v23 = vpop.f32.mrf.mxu1 }
 0x533   :  { %v9380_v35 = vpop.f32.mrf.mxu0  ;;  %v7962_v36 = vadd.f32 %v9378_v33, %v7922_v25 }
 0x535   :  { %v7968_v15 = vsel %vm7967_vm0, %v7962_v36, -inf }
 0x536   :  { %7969 = vmax.xlane.f32.xlu0 %v7968_v15 }
 0x5bf   :  { %v7970_v43 = vpop.xlane.xlu0 %7969 }
 0x5c0   :  { %v7971_v21 = vsub.f32 %v7962_v36, %v7970_v43 }
 0x5c2   :  { %v7972_v50 = vmul.f32 1.442695, %v7971_v21 }
 0x5c4   :  { %10177 = vpow2.f32 %v7972_v50 }
 0x5d1   :  { %v10178_v26 = vpop.eup %10177 }
 0x5d2   :  { %v7974_v60 = vsel %vm7967_vm0, %v10178_v26, 0.0 }
 0x5d3   :  { %7975 = vadd.xlane.f32.xlu0 %v7974_v60 }
 0x65c   :  { %v7976_v39 = vpop.xlane.xlu0 %7975 }
 0x65d   :  { %10179 = vrcp.f32 %v7976_v39 }
 0x66a   :  { %v10180_v38 = vpop.eup %10179 }
 0x66b   :  { %v7978_v40 = vmul.f32 %v10180_v38, %v10178_v26 }
 0x66d   :  { %9113 = vmatmul.mubr.msk.f32.vlgmr.msra.gmra.mxu1 %vm7967_vm0, %v7978_v40 }
 0x72d   :  { %v8078_v20 = vpop.f32.mrf.mxu1 }
 0x72e   :  { %v8083_v0 = vmul.f32 %v8078_v20, %v13509_v22 }
 0x72f   :  { %v8080_v9 = vpop.f32.mrf.mxu1 }
 0x730   :  { %v8097_v3 = vadd.f32 %v8090_v44, %v8083_v0  ;;  %v8084_v34 = vmul.f32 %v8080_v9, %v13512_v49 }
 0x732   :  { %v9114_v16 = vmul.f32 -1.442695, %v8097_v3  ;;  %v8098_v61 = vadd.f32 %v8094_v31, %v8084_v34 }
 0x734   :  { %10181 = vpow2.f32 %v9114_v16  ;;  %v9115_v19 = vmul.f32 -1.442695, %v8098_v61 }
 0x736   :  { %10183 = vpow2.f32 %v9115_v19 }
 0x741   :  { %v10182_v37 = vpop.eup %10181 }
 0x742   :  { %v8105_v25 = vadd.f32 1.0, %v10182_v37 }
 0x743   :  { %v10184_v33 = vpop.eup %10183 }
 0x744   :  { %v8106_v46 = vadd.f32 1.0, %v10184_v33  ;;  %10185 = vrcp.f32 %v8105_v25 }
 0x746   :  { %10187 = vrcp.f32 %v8106_v46 }
 0x751   :  { %v10186_v29 = vpop.eup %10185 }
 0x753   :  { %v10188_v30 = vpop.eup %10187 }
 0x754   :  { %v9117_v22 = vpack.c.bf16 %v10188_v30, %v10186_v29 }
 0x756   :  { %8122 = vst.msk [vmem:[#allocation2] sm:$0xff] %vm8121_vm3, %v9117_v22 }
 0x757   :  { %10200 = shalt.err (!%p10197_p4)
}
 0x758   :  { %8132 = dma.vmem_to_hbm [thread:$0]  %s8130_s7, 128, %s13631_s8, [#allocation3]  }
 0x759   :  { %10209 = dma.done.wait [#allocation3], 128  }
 0x75a   :  { %10210 = vsyncadd [#allocation3], 4294967168 }
 0x75b   :  { %8136 = vsyncpa [#allocation3], 1 }

</bundles_post_ra>
